<compile_context>
chip_gen: v5e
topology: v5e:2x2
jax: 0.10.0
libtpu: 0.0.40
codegen_flags: <defaults>
</compile_context>

<pallas_src>
import math
from functools import partial

import jax
import jax.numpy as jnp
from jax.experimental import pallas as pl
from jax.experimental.pallas import tpu as pltpu


def _kernel(x_ref, tm_ref, lat_ref, w_ref, out_ref, *, L, Em1):
    """One batch block.

    x_ref   (Bb, N, L)  attn_in
    tm_ref  (Bb, 2, N)  row 0 = times, row 1 = mask   (N on the lane axis)
    lat_ref (Bb, N, D)  latents
    w_ref   (5, K)      packed weights:
                          row 0: wa_x   (L)
                          row 1: w_per  (Em1)
                          row 2: b_per  (Em1)
                          row 3: wa_per (Em1)
                          row 4: [c1, c0]  (folded linear-time branch + bias)
    out_ref (1, Bb, D)
    """
    x = x_ref[...]
    tm = tm_ref[...]
    lat = lat_ref[...]
    wp = w_ref[...]

    t = tm[:, 0, :]                                   # (Bb, N)
    m = tm[:, 1, :]                                   # (Bb, N)

    wax = wp[0:1, :L].reshape(1, 1, L)
    wper = wp[1:2, :Em1].reshape(1, 1, Em1)
    bper = wp[2:3, :Em1].reshape(1, 1, Em1)
    waper = wp[3:4, :Em1].reshape(1, 1, Em1)
    c1 = wp[4:5, 0:1]                                 # (1, 1)
    c0 = wp[4:5, 1:2]                                 # (1, 1)

    # ---- attention score (linear-time branch pre-folded into c1/c0) -------
    s_x = jnp.sum(x * wax, axis=-1)                   # (Bb, N)  cross-lane reduce
    per = jnp.sin(t[:, :, None] * wper + bper)        # (Bb, N, Em1)
    s_per = jnp.sum(per * waper, axis=-1)             # (Bb, N)
    s = jnp.maximum(s_x + t * c1 + s_per + c0, 0.0)   # ReLU     (Bb, N)

    # ---- masked softmax over the sequence (lane) axis ----------------------
    # TODO(synk): no max-subtraction (matches the PyTorch reference exactly);
    # exp can overflow for unbounded score magnitudes.
    e = jnp.exp(s) * m                                # (Bb, N)
    denom = jnp.sum(e, axis=-1, keepdims=True)        # (Bb, 1)
    w = e * pl.reciprocal(denom, approx=True)         # (Bb, N)

    # ---- weighted reduction of the latents (one relayout of w) -------------
    out = jnp.sum(w[:, :, None] * lat, axis=1)        # (Bb, D)
    out_ref[...] = out[None, :, :]


def _num_batch_blocks(B):
    """2 batch blocks only on v7x (2 TensorCores/chip); 1 step on v5e/v6e."""
    try:
        kind = jax.devices()[0].device_kind.lower()
    except Exception:
        return 1
    if (("v7" in kind) or ("7x" in kind)) and B >= 2 and B % 2 == 0:
        return 2
    return 1


def latent_attention_net(attn_in, times_in, lat, mask, params):
    """attn_in (B,N,L), times_in (B,N,1), lat (B,N,D), mask (B,N) -> (B,1,D)."""
    B, N, L = attn_in.shape
    D = lat.shape[-1]
    Em1 = params["w_per"].shape[-1]       # embed_time - 1
    K = max(L, Em1, 2)

    attn_in = attn_in.astype(jnp.float32)
    lat = lat.astype(jnp.float32)

    # times & mask as one lane-dense (B, 2, N) tensor (N on the lane axis).
    tm = jnp.stack([times_in.reshape(B, N).astype(jnp.float32),
                    mask.reshape(B, N).astype(jnp.float32)], axis=1)

    # Fold the linear-time branch: wa_lin*(w_lin*t + b_lin) + b_a == c1*t + c0.
    c1 = (params["wa_lin"] * params["w_lin"]).reshape(())
    c0 = (params["wa_lin"] * params["b_lin"] + params["b_a"]).reshape(())

    def row(v):
        v = jnp.asarray(v, jnp.float32).reshape(-1)
        return jnp.pad(v, (0, K - v.shape[0]))

    wpack = jnp.stack([
        row(params["wa_x"]),
        row(params["w_per"]),
        row(params["b_per"]),
        row(params["wa_per"]),
        row(jnp.stack([c1, c0])),
    ], axis=0)                                        # (5, K)

    n_blocks = _num_batch_blocks(B)
    Bb = B // n_blocks

    if n_blocks == 2:
        semantics = (pltpu.CORE_PARALLEL,)            # one block per v7x TC
    else:
        semantics = ("arbitrary",)

    # TODO(synk): at production N/L/D sizes, derive Bb/N tiling from
    # pltpu.get_tpu_info().vmem_capacity_bytes (v7x has half the VMEM of
    # v5e/v6e) instead of shipping whole-sequence blocks.

    out = pl.pallas_call(
        partial(_kernel, L=L, Em1=Em1),
        out_shape=jax.ShapeDtypeStruct((n_blocks, Bb, D), jnp.float32),
        grid=(n_blocks,),
        in_specs=[
            pl.BlockSpec((Bb, N, L), lambda i: (i, 0, 0)),   # attn_in
            pl.BlockSpec((Bb, 2, N), lambda i: (i, 0, 0)),   # times + mask
            pl.BlockSpec((Bb, N, D), lambda i: (i, 0, 0)),   # latents
            pl.BlockSpec((5, K), lambda i: (0, 0)),          # packed weights
        ],
        out_specs=pl.BlockSpec((1, Bb, D), lambda i: (i, 0, 0)),
        compiler_params=pltpu.CompilerParams(dimension_semantics=semantics),
    )(attn_in, tm, lat, wpack)
    return out.reshape(B, 1, D)


def init_params(key, latent_dim, embed_time):
    """Deterministic init mirroring the module's layers (shapes, not exact RNG)."""
    L, E = latent_dim, embed_time
    ks = jax.random.split(key, 6)

    def lin_init(kw, kb, fan_in, shape_w, shape_b):
        bound = 1.0 / math.sqrt(fan_in)
        w = jax.random.uniform(kw, shape_w, jnp.float32, -bound, bound)
        b = jax.random.uniform(kb, shape_b, jnp.float32, -bound, bound)
        return w, b

    # periodic: nn.Linear(1, E-1), stored transposed as (1, E-1)
    w_per, b_per = lin_init(ks[0], ks[1], 1, (1, E - 1), (1, E - 1))
    # linear: nn.Linear(1, 1)
    w_lin, b_lin = lin_init(ks[2], ks[3], 1, (1, 1), (1, 1))
    # attn_lyr[0]: nn.Linear(L+E, 1), kaiming-uniform scale, stored transposed
    # and pre-split into [attn_in | linear-time | periodic-time] column groups.
    dim_attn = L + E
    kbound = math.sqrt(6.0 / dim_attn)
    wa = jax.random.uniform(ks[4], (1, dim_attn), jnp.float32, -kbound, kbound)
    bbound = 1.0 / math.sqrt(dim_attn)
    b_a = jax.random.uniform(ks[5], (1, 1), jnp.float32, -bbound, bbound)
    return dict(w_per=w_per, b_per=b_per, w_lin=w_lin, b_lin=b_lin,
                wa_x=wa[:, :L], wa_lin=wa[:, L:L + 1], wa_per=wa[:, L + 1:],
                b_a=b_a)


def reference_jax(attn_in, times_in, lat, mask, params):
    """Pure-JAX reference mirroring the PyTorch forward (eval mode, embed_time>1)."""
    out1 = times_in * params["w_lin"] + params["b_lin"]                  # (B,N,1)
    out2 = jnp.sin(times_in * params["w_per"] + params["b_per"])         # (B,N,E-1)
    tt = jnp.concatenate([out1, out2], axis=-1)                          # (B,N,E)
    feat = jnp.concatenate([attn_in, tt], axis=-1)                       # (B,N,L+E)
    wa = jnp.concatenate([params["wa_x"], params["wa_lin"], params["wa_per"]],
                         axis=-1)                                        # (1,L+E)
    score = jnp.maximum(feat @ wa.T + params["b_a"], 0.0)                # (B,N,1)
    m = mask[..., None]
    e = jnp.exp(score) * m
    w = e / jnp.sum(e, axis=1, keepdims=True)
    return jnp.sum(w * lat, axis=1, keepdims=True)                       # (B,1,D)


if __name__ == "__main__":
    # B=batch, N=sequence, L=latent_dim (attn_in width), E=embed_time, D=lat width
    B, N, L, E, D = 8, 16, 32, 16, 32

    key = jax.random.PRNGKey(0)
    ka, kt, kl, km, kp = jax.random.split(key, 5)

    attn_in = jax.random.normal(ka, (B, N, L), dtype=jnp.float32)
    times_in = jax.random.uniform(kt, (B, N, 1), dtype=jnp.float32)
    lat = jax.random.normal(kl, (B, N, D), dtype=jnp.float32)
    mask = (jax.random.uniform(km, (B, N)) > 0.3).astype(jnp.float32)
    # Guarantee >=1 valid position per sequence (module asserts no NaN/inf).
    mask = mask.at[:, 0].set(1.0)

    params = init_params(kp, L, E)

    out = latent_attention_net(attn_in, times_in, lat, mask, params)
    out = jax.block_until_ready(out)

    ref = reference_jax(attn_in, times_in, lat, mask, params)
    assert out.shape == (B, 1, D)
    assert jnp.allclose(out, ref, atol=1e-3, rtol=1e-3), \
        float(jnp.max(jnp.abs(out - ref)))

    print("KERNEL_OK")
</pallas_src>

<mosaic_0001>
module attributes {stable_mosaic.version = 11 : i64} {
  func.func @_kernel(%arg0: i32, %arg1: memref<8x16x32xf32, #tpu.memory_space<vmem>>, %arg2: memref<8x2x16xf32, #tpu.memory_space<vmem>>, %arg3: memref<8x16x32xf32, #tpu.memory_space<vmem>>, %arg4: memref<5x32xf32, #tpu.memory_space<vmem>>, %arg5: memref<1x8x32xf32, #tpu.memory_space<vmem>>) attributes {dimension_semantics = [#tpu.dimension_semantics<arbitrary>], iteration_bounds = array<i64: 1>, scalar_prefetch = 0 : i64, scratch_operands = 0 : i64, tpu.core_type = #tpu.core_type<tc>, window_params = [{transform_indices = @transform_0, window_bounds = array<i64: 8, 16, 32>}, {transform_indices = @transform_1, window_bounds = array<i64: 8, 2, 16>}, {transform_indices = @transform_2, window_bounds = array<i64: 8, 16, 32>}, {pipeline_mode = #tpu.pipeline_mode<synchronous>, transform_indices = @transform_3, window_bounds = array<i64: 5, 32>}, {transform_indices = @transform_4, window_bounds = array<i64: 1, 8, 32>}]} {
    %c0 = arith.constant 0 : index
    %c0_0 = arith.constant 0 : index
    %c0_1 = arith.constant 0 : index
    %0 = vector.load %arg1[%c0, %c0_0, %c0_1] : memref<8x16x32xf32, #tpu.memory_space<vmem>>, vector<8x16x32xf32>
    %c0_2 = arith.constant 0 : index
    %c0_3 = arith.constant 0 : index
    %c0_4 = arith.constant 0 : index
    %1 = vector.load %arg2[%c0_2, %c0_3, %c0_4] : memref<8x2x16xf32, #tpu.memory_space<vmem>>, vector<8x2x16xf32>
    %c0_5 = arith.constant 0 : index
    %c0_6 = arith.constant 0 : index
    %c0_7 = arith.constant 0 : index
    %2 = vector.load %arg3[%c0_5, %c0_6, %c0_7] : memref<8x16x32xf32, #tpu.memory_space<vmem>>, vector<8x16x32xf32>
    %c0_8 = arith.constant 0 : index
    %c0_9 = arith.constant 0 : index
    %3 = vector.load %arg4[%c0_8, %c0_9] : memref<5x32xf32, #tpu.memory_space<vmem>>, vector<5x32xf32>
    %4 = vector.extract_strided_slice %1 {offsets = [0, 0, 0], sizes = [8, 1, 16], strides = [1, 1, 1]} : vector<8x2x16xf32> to vector<8x1x16xf32>
    %5 = vector.shape_cast %4 : vector<8x1x16xf32> to vector<8x16xf32>
    %6 = vector.extract_strided_slice %1 {offsets = [0, 1, 0], sizes = [8, 1, 16], strides = [1, 1, 1]} : vector<8x2x16xf32> to vector<8x1x16xf32>
    %7 = vector.shape_cast %6 : vector<8x1x16xf32> to vector<8x16xf32>
    %8 = vector.extract_strided_slice %3 {offsets = [0, 0], sizes = [1, 32], strides = [1, 1]} : vector<5x32xf32> to vector<1x32xf32>
    %9 = vector.shape_cast %8 : vector<1x32xf32> to vector<1x1x32xf32>
    %10 = vector.extract_strided_slice %3 {offsets = [1, 0], sizes = [1, 15], strides = [1, 1]} : vector<5x32xf32> to vector<1x15xf32>
    %11 = vector.shape_cast %10 : vector<1x15xf32> to vector<1x1x15xf32>
    %12 = vector.extract_strided_slice %3 {offsets = [2, 0], sizes = [1, 15], strides = [1, 1]} : vector<5x32xf32> to vector<1x15xf32>
    %13 = vector.shape_cast %12 : vector<1x15xf32> to vector<1x1x15xf32>
    %14 = vector.extract_strided_slice %3 {offsets = [3, 0], sizes = [1, 15], strides = [1, 1]} : vector<5x32xf32> to vector<1x15xf32>
    %15 = vector.shape_cast %14 : vector<1x15xf32> to vector<1x1x15xf32>
    %16 = vector.extract_strided_slice %3 {offsets = [4, 0], sizes = [1, 1], strides = [1, 1]} : vector<5x32xf32> to vector<1x1xf32>
    %17 = vector.extract_strided_slice %3 {offsets = [4, 1], sizes = [1, 1], strides = [1, 1]} : vector<5x32xf32> to vector<1x1xf32>
    %18 = vector.broadcast %9 : vector<1x1x32xf32> to vector<8x16x32xf32>
    %19 = arith.mulf %0, %18 : vector<8x16x32xf32>
    %cst = arith.constant dense<0.000000e+00> : vector<8x16xf32>
    %20 = vector.multi_reduction <add>, %19, %cst [2] : vector<8x16x32xf32> to vector<8x16xf32>
    %21 = vector.shape_cast %5 : vector<8x16xf32> to vector<8x16x1xf32>
    %22 = vector.broadcast %21 : vector<8x16x1xf32> to vector<8x16x15xf32>
    %23 = vector.broadcast %11 : vector<1x1x15xf32> to vector<8x16x15xf32>
    %24 = arith.mulf %22, %23 : vector<8x16x15xf32>
    %25 = vector.broadcast %13 : vector<1x1x15xf32> to vector<8x16x15xf32>
    %26 = arith.addf %24, %25 : vector<8x16x15xf32>
    %27 = math.sin %26 : vector<8x16x15xf32>
    %28 = vector.broadcast %15 : vector<1x1x15xf32> to vector<8x16x15xf32>
    %29 = arith.mulf %27, %28 : vector<8x16x15xf32>
    %cst_10 = arith.constant dense<0.000000e+00> : vector<8x16xf32>
    %30 = vector.multi_reduction <add>, %29, %cst_10 [2] : vector<8x16x15xf32> to vector<8x16xf32>
    %31 = vector.broadcast %16 : vector<1x1xf32> to vector<8x16xf32>
    %32 = arith.mulf %5, %31 : vector<8x16xf32>
    %33 = arith.addf %20, %32 : vector<8x16xf32>
    %34 = arith.addf %33, %30 : vector<8x16xf32>
    %35 = vector.broadcast %17 : vector<1x1xf32> to vector<8x16xf32>
    %36 = arith.addf %34, %35 : vector<8x16xf32>
    %cst_11 = arith.constant 0.000000e+00 : f32
    %37 = vector.broadcast %cst_11 : f32 to vector<8x16xf32>
    %38 = arith.maximumf %36, %37 : vector<8x16xf32>
    %39 = math.exp %38 : vector<8x16xf32>
    %40 = arith.mulf %39, %7 : vector<8x16xf32>
    %cst_12 = arith.constant dense<0.000000e+00> : vector<8xf32>
    %41 = vector.multi_reduction <add>, %40, %cst_12 [1] : vector<8x16xf32> to vector<8xf32>
    %42 = vector.shape_cast %41 : vector<8xf32> to vector<8x1xf32>
    %43 = tpu.reciprocal %42 {approx = true} : vector<8x1xf32> -> vector<8x1xf32>
    %44 = vector.broadcast %43 : vector<8x1xf32> to vector<8x16xf32>
    %45 = arith.mulf %40, %44 : vector<8x16xf32>
    %46 = vector.shape_cast %45 : vector<8x16xf32> to vector<8x16x1xf32>
    %47 = vector.broadcast %46 : vector<8x16x1xf32> to vector<8x16x32xf32>
    %48 = arith.mulf %47, %2 : vector<8x16x32xf32>
    %cst_13 = arith.constant dense<0.000000e+00> : vector<8x32xf32>
    %49 = vector.multi_reduction <add>, %48, %cst_13 [1] : vector<8x16x32xf32> to vector<8x32xf32>
    %50 = vector.shape_cast %49 : vector<8x32xf32> to vector<1x8x32xf32>
    %c0_14 = arith.constant 0 : index
    %c0_15 = arith.constant 0 : index
    %c0_16 = arith.constant 0 : index
    %51 = vector.load %arg5[%c0_14, %c0_15, %c0_16] : memref<1x8x32xf32, #tpu.memory_space<vmem>>, vector<1x8x32xf32>
    tpu.vector_store %arg5[%c0_14, %c0_15, %c0_16], %50 {strides = array<i32>} : memref<1x8x32xf32, #tpu.memory_space<vmem>>, vector<1x8x32xf32>,
    return
  }
  func.func @transform_0(%arg0: i32) -> (i32, i32, i32) {
    %c0_i32 = arith.constant 0 : i32
    %c0_i32_0 = arith.constant 0 : i32
    %c0_i32_1 = arith.constant 0 : i32
    return %arg0, %c0_i32, %c0_i32_0 : i32, i32, i32
  }
  func.func @transform_1(%arg0: i32) -> (i32, i32, i32) {
    %c0_i32 = arith.constant 0 : i32
    %c0_i32_0 = arith.constant 0 : i32
    %c0_i32_1 = arith.constant 0 : i32
    return %arg0, %c0_i32, %c0_i32_0 : i32, i32, i32
  }
  func.func @transform_2(%arg0: i32) -> (i32, i32, i32) {
    %c0_i32 = arith.constant 0 : i32
    %c0_i32_0 = arith.constant 0 : i32
    %c0_i32_1 = arith.constant 0 : i32
    return %arg0, %c0_i32, %c0_i32_0 : i32, i32, i32
  }
  func.func @transform_3(%arg0: i32) -> (i32, i32) {
    %c0_i32 = arith.constant 0 : i32
    %c0_i32_0 = arith.constant 0 : i32
    %c0_i32_1 = arith.constant 0 : i32
    return %c0_i32, %c0_i32_0 : i32, i32
  }
  func.func @transform_4(%arg0: i32) -> (i32, i32, i32) {
    %c0_i32 = arith.constant 0 : i32
    %c0_i32_0 = arith.constant 0 : i32
    %c0_i32_1 = arith.constant 0 : i32
    return %arg0, %c0_i32, %c0_i32_0 : i32, i32, i32
  }
}

</mosaic_0001>

<bundles_post_ra>
// kernel: tpu_custom_call.1
= control target key start
LH: loop header
LB: loop body
LE: loop exit
PB: predicated region body
PF: predicated region fallthrough
CT: control target
= control target key end

     0   :  { %9 = vsyncpa [#allocation3], 0  ;;  %s6731_s0 = inlined_call_operand.hbm [shape: f32[8,16,32], index: 0, kind: input, shape index: {}]   ;;  %s6732_s1 = inlined_call_operand.hbm [shape: f32[8,2,16], index: 1, kind: input, shape index: {}]   ;;  %s6733_s2 = inlined_call_operand.hbm [shape: f32[8,16,32], index: 2, kind: input, shape index: {}]   ;;  %s6734_s3 = inlined_call_operand.hbm [shape: f32[5,32], index: 3, kind: input, shape index: {}]   ;;  %s6735_s4 = inlined_call_operand.hbm [shape: f32[1,8,32], index: 4, kind: output, shape index: {}]  }
   0x1   :  { %10 = vsyncpa [#allocation6], 0 }
   0x2   :  { %11 = vsyncpa [#allocation9], 0  ;;  %s30_s17 = sshll.u32 %s6732_s1, 4  ;;  %s31_s17 = int_to_ptr.hbm [resolvable:$true] %s30_s17 }
   0x3   :  { %12 = vsyncpa [#allocation4], 0  ;;  %s3869_s18 = smov [#allocation5]   ;;  %s17_s22 = sshll.u32 %s6731_s0, 4  ;;  %s18_s22 = int_to_ptr.hbm [resolvable:$true] %s17_s22 }
   0x4   :  { %s32_s19 = sshll.u32 %s3869_s18, 4  ;;  %s3870_s23 = smov 32   ;;  %s33_s19 = int_to_ptr.vmem [resolvable:$true] %s32_s19 }
   0x5   :  { %s3871_s24 = smov 2   ;;  %s3872_s25 = smov [#allocation2]  }
   0x6   :  { %38 = dma.hbm_to_vmem [thread:$0]  %s31_s17, 256, %s33_s19, [#allocation6], %s3870_s23, %s3870_s23, %s3871_s24  }
   0x7   :  { %s19_s26 = sshll.u32 %s3872_s25, 4  ;;  %s3873_s27 = smov 128   ;;  %s20_s26 = int_to_ptr.vmem [resolvable:$true] %s19_s26 }
   0x8   :  { %s3874_s28 = smov 8   ;;  %s43_s30 = sshll.u32 %s6733_s2, 4  ;;  %s44_s30 = int_to_ptr.hbm [resolvable:$true] %s43_s30 }
   0x9   :  { %25 = dma.hbm_to_vmem [thread:$0]  %s18_s22, 2048, %s20_s26, [#allocation3], %s3873_s27, %s3873_s27, %s3874_s28  }
   0xa   :  { %s3875_s5 = smov [#allocation7]   ;;  %s57_s8 = sshll.u32 %s6734_s3, 4  ;;  %s58_s8 = int_to_ptr.hbm [resolvable:$true] %s57_s8 }
   0xb   :  { %s45_s6 = sshll.u32 %s3875_s5, 4  ;;  %s3876_s9 = smov [#allocation8]   ;;  %s46_s6 = int_to_ptr.vmem [resolvable:$true] %s45_s6 }
   0xc   :  { %51 = dma.hbm_to_vmem [thread:$0]  %s44_s30, 2048, %s46_s6, [#allocation6], %s3873_s27, %s3873_s27, %s3874_s28  }
   0xd   :  { %s59_s10 = sshll.u32 %s3876_s9, 4  ;;  %s60_s10 = int_to_ptr.vmem [resolvable:$true] %s59_s10 }
   0xe   :  { %62 = dma.hbm_to_vmem [thread:$0]  %s58_s8, 128, %s60_s10, [#allocation9]  }
   0xf   :  { %3861 = dma.done.wait [#allocation3], 2048  }
  0x10   :  { %3862 = vsyncadd [#allocation3], 4294965248 }
  0x11   :  { %3863 = dma.done.wait [#allocation6], 2304  }
  0x12   :  { %3864 = vsyncadd [#allocation6], 4294964992 }
  0x13   :  { %3865 = dma.done.wait [#allocation9], 128  }
  0x14   :  { %3866 = vsyncadd [#allocation9], 4294967168  ;;  %v83_v0 = vld [vmem:[#allocation2 + $0x20] sm:$0xff]  ;;  %v3923_v1 = vld [vmem:[#allocation8] sm:$0x1f]  ;;  %vm6837_vm0 = vcmask 261120   ;;  %v6736_v26 = vlaneseq }
  0x15   :  { %6855 = vst [vmem:[#allocation15_spill] sm:$0xff] %v3923_v1  ;;  %v81_v2 = vld [vmem:[#allocation2 + $0x10] sm:$0xff]  ;;  %v3926_v3 = vperm.slane %v3923_v1, 0  ;;  %v79_v4 = vld [vmem:[#allocation2] sm:$0xff]  ;;  %v84_v8 = vld [vmem:[#allocation2 + $0x28] sm:$0xff]  ;;  %v6739_v17 = vrot.slane %v3923_v1, 4 }
  0x16   :  { %v82_v9 = vld [vmem:[#allocation2 + $0x18] sm:$0xff]  ;;  %v80_v13 = vld [vmem:[#allocation2 + $0x8] sm:$0xff]  ;;  %v87_v21 = vld [vmem:[#allocation2 + $0x40] sm:$0xff]  ;;  %v3947_v28 = vshrl.u32 %v6736_v26, 7  ;;  %s3884_s3 = smov 127   ;;  %s3885_s12 = smov [#allocation10]  }
  0x17   :  { %v125_v5 = vmul.f32 %v3926_v3, %v83_v0  ;;  %v123_v6 = vmul.f32 %v3926_v3, %v81_v2  ;;  %v121_v7 = vmul.f32 %v3926_v3, %v79_v4  ;;  %v126_v14 = vmul.f32 %v3926_v3, %v84_v8  ;;  %3653 = vpush %v6739_v17  ;;  %v86_v22 = vld [vmem:[#allocation2 + $0x38] sm:$0xff]  ;;  %v85_v23 = vld [vmem:[#allocation2 + $0x30] sm:$0xff]  ;;  %v88_v35 = vld [vmem:[#allocation2 + $0x48] sm:$0xff]  ;;  %s3591_s13 = sshll.u32 %s3885_s12, 4  ;;  %s3593_s16 = sshll.u32 %s6735_s4, 4  ;;  %s3592_s13 = int_to_ptr.vmem [resolvable:$true] %s3591_s13  ;;  %s3594_s16 = int_to_ptr.hbm [resolvable:$true] %s3593_s16 }
  0x18   :  { %v124_v15 = vmul.f32 %v3926_v3, %v82_v9  ;;  %v122_v16 = vmul.f32 %v3926_v3, %v80_v13  ;;  %v129_v24 = vmul.f32 %v3926_v3, %v87_v21  ;;  %v128_v25 = vmul.f32 %v3926_v3, %v86_v22  ;;  %6856 = vst [vmem:[#allocation16_spill] sm:$0xff] %v3947_v28  ;;  %v90_v33 = vld [vmem:[#allocation2 + $0x58] sm:$0xff]  ;;  %v89_v34 = vld [vmem:[#allocation2 + $0x50] sm:$0xff]  ;;  %v92_v43 = vld [vmem:[#allocation2 + $0x68] sm:$0xff] }
  0x19   :  { %v150_v10 = vsel %vm6837_vm0, %v125_v5, 0.0  ;;  %v144_v11 = vsel %vm6837_vm0, %v123_v6, 0.0  ;;  %v138_v12 = vsel %vm6837_vm0, %v121_v7, 0.0  ;;  %v153_v18 = vsel %vm6837_vm0, %v126_v14, 0.0  ;;  %3674 = vset.pattern.permute.xlu1 %v3947_v28  ;;  %v93_v42 = vld [vmem:[#allocation2 + $0x70] sm:$0xff]  ;;  %v91_v44 = vld [vmem:[#allocation2 + $0x60] sm:$0xff] }
  0x1a   :  { %151 = vadd.xlane.f32.xlu2 %v150_v10  ;;  %145 = vadd.xlane.f32.xlu1 %v144_v11  ;;  %v147_v19 = vsel %vm6837_vm0, %v124_v15, 0.0  ;;  %v141_v20 = vsel %vm6837_vm0, %v122_v16, 0.0  ;;  %v127_v27 = vmul.f32 %v3926_v3, %v85_v23  ;;  %v162_v29 = vsel %vm6837_vm0, %v129_v24, 0.0  ;;  %v94_v51 = vld [vmem:[#allocation2 + $0x78] sm:$0xff]  ;;  %v95_v54 = vld [vmem:[#allocation5] sm:$0x3] }
  0x1b   :  { %139 = vadd.xlane.f32.xlu0 %v138_v12  ;;  %v159_v30 = vsel %vm6837_vm0, %v128_v25, 0.0  ;;  %v3952_v31 = vadd.s32 8, %v3947_v28  ;;  %v132_v36 = vmul.f32 %v3926_v3, %v90_v33  ;;  %v131_v37 = vmul.f32 %v3926_v3, %v89_v34  ;;  %v3972_v56 = vld [vmem:[#allocation5 + $0x8] sm:$0x3]  ;;  %v96_v58 = vld [vmem:[#allocation5 + $0x2] sm:$0x3] }
  0x1c   :  { %v156_v32 = vsel %vm6837_vm0, %v127_v27, 0.0  ;;  %v130_v38 = vmul.f32 %v3926_v3, %v88_v35  ;;  %v135_v45 = vmul.f32 %v3926_v3, %v93_v42  ;;  %v134_v46 = vmul.f32 %v3926_v3, %v92_v43  ;;  %v97_v59 = vld [vmem:[#allocation5 + $0x4] sm:$0x3]  ;;  %v98_v62 = vld [vmem:[#allocation5 + $0x6] sm:$0x3] }
  0x1d   :  { %6857 = vst [vmem:[#allocation17_spill] sm:$0xff] %v3952_v31  ;;  %3675 = vset.pattern.permute.xlu2 %v3952_v31  ;;  %3676 = vset.pattern.permute.xlu0 %v3952_v31  ;;  %v171_v39 = vsel %vm6837_vm0, %v132_v36, 0.0  ;;  %v168_v40 = vsel %vm6837_vm0, %v131_v37, 0.0  ;;  %v133_v47 = vmul.f32 %v3926_v3, %v91_v44  ;;  %v136_v52 = vmul.f32 %v3926_v3, %v94_v51  ;;  %v102_v0 = vld [vmem:[#allocation5 + $0xe] sm:$0x3] }
  0x1e   :  { %v165_v41 = vsel %vm6837_vm0, %v130_v38, 0.0  ;;  %v180_v48 = vsel %vm6837_vm0, %v135_v45, 0.0  ;;  %v177_v49 = vsel %vm6837_vm0, %v134_v46, 0.0  ;;  %v186_v55 = vperm.slane %v95_v54, 0  ;;  %v100_v6 = vld [vmem:[#allocation5 + $0xa] sm:$0x3] }
  0x1f   :  { %v174_v50 = vsel %vm6837_vm0, %v133_v47, 0.0  ;;  %v183_v53 = vsel %vm6837_vm0, %v136_v52, 0.0  ;;  %v238_v57 = vperm.slane %v3972_v56, 0  ;;  %v199_v60 = vperm.slane %v96_v58, 0  ;;  %v101_v10 = vld [vmem:[#allocation5 + $0xc] sm:$0x3] }
  0x20   :  { %v212_v61 = vperm.slane %v97_v59, 0  ;;  %v225_v63 = vperm.slane %v98_v62, 0  ;;  %v277_v2 = vperm.slane %v102_v0, 0  ;;  %v251_v7 = vperm.slane %v100_v6, 0 }
  0x21   :  { %v264_v11 = vperm.slane %v101_v10, 0  ;;  %v4036_v38 = vperm.slane %v3923_v1, 1 }
  0x22   :  { %154 = vadd.xlane.f32.xlu2 %v153_v18  ;;  %148 = vadd.xlane.f32.xlu1 %v147_v19 }
  0x23   :  { %142 = vadd.xlane.f32.xlu0 %v141_v20 }
  0x2a   :  { %163 = vadd.xlane.f32.xlu2 %v162_v29  ;;  %160 = vadd.xlane.f32.xlu1 %v159_v30 }
  0x2b   :  { %157 = vadd.xlane.f32.xlu0 %v156_v32 }
  0x32   :  { %172 = vadd.xlane.f32.xlu2 %v171_v39  ;;  %169 = vadd.xlane.f32.xlu1 %v168_v40  ;;  %v4039_v39 = vperm.slane %v3923_v1, 2 }
  0x33   :  { %166 = vadd.xlane.f32.xlu0 %v165_v41 }
  0x3a   :  { %181 = vadd.xlane.f32.xlu2 %v180_v48  ;;  %178 = vadd.xlane.f32.xlu1 %v177_v49 }
  0x3b   :  { %175 = vadd.xlane.f32.xlu0 %v174_v50 }
  0x43   :  { %184 = vadd.xlane.f32.xlu0 %v183_v53 }
  0x48   :  { %s3654_s2 = spop %3653 }
  0x49   :  { %v3976_v3 = vstv %s3654_s2 }
  0x4a   :  { %6858 = vst [vmem:[#allocation18_spill] sm:$0xff] %v3976_v3  ;;  %v2875_v4 = vmul.f32 %v3976_v3, %v95_v54  ;;  %v3982_v8 = vmul.f32 %v3976_v3, %v100_v6  ;;  %v2877_v13 = vmul.f32 %v3976_v3, %v97_v59  ;;  %v3996_v16 = vmul.f32 %v3976_v3, %v96_v58 }
  0x4b   :  { %v3999_v18 = vmul.f32 %v3976_v3, %v98_v62  ;;  %v2879_v29 = vmul.f32 %v3976_v3, %v3972_v56 }
  0x4c   :  { %v2891_v5 = vperm.slane %v2875_v4, 0  ;;  %6859 = vst [vmem:[#allocation19_spill] sm:$0xff] %v3982_v8  ;;  %v6740_v9 = vperm.slane %v3982_v8, 0  ;;  %v2917_v15 = vperm.slane %v2877_v13, 0  ;;  %v6738_v21 = vperm.slane %v3996_v16, 0 }
  0x4d   :  { %6862 = vst [vmem:[#allocation22_spill] sm:$0xff] %v3996_v16  ;;  %v6737_v22 = vperm.slane %v3999_v18, 0  ;;  %v2943_v30 = vperm.slane %v2879_v29, 0 }
  0x4e   :  { %6863 = vst [vmem:[#allocation23_spill] sm:$0xff] %v3999_v18 }
  0x52   :  { %197 = vperm.xlu2 %3675, %v186_v55  }
  0x53   :  { %191 = vperm.xlu1 %3674, %v186_v55  }
  0x57   :  { %249 = vperm.xlu0 %3676, %v238_v57  }
  0x5a   :  { %210 = vperm.xlu2 %3675, %v199_v60  }
  0x5b   :  { %217 = vperm.xlu1 %3674, %v212_v61  }
  0x5f   :  { %3677 = vset.pattern.permute.xlu0 %v3947_v28 }
  0x62   :  { %223 = vperm.xlu2 %3675, %v212_v61  }
  0x63   :  { %230 = vperm.xlu1 %3674, %v225_v63  }
  0x67   :  { %204 = vperm.xlu0 %3677, %v199_v60  }
  0x6a   :  { %236 = vperm.xlu2 %3675, %v225_v63  }
  0x6b   :  { %243 = vperm.xlu1 %3674, %v238_v57  }
  0x6f   :  { %282 = vperm.xlu0 %3677, %v277_v2  }
  0x72   :  { %3678 = vset.pattern.permute.xlu2 %v3947_v28 }
  0x73   :  { %3679 = vset.pattern.permute.xlu1 %v3952_v31 }
  0x77   :  { %2896 = vperm.xlu0 %3677, %v2891_v5  }
  0x7a   :  { %256 = vperm.xlu2 %3678, %v251_v7  }
  0x7b   :  { %262 = vperm.xlu1 %3679, %v251_v7  }
  0x7f   :  { %2961 = vperm.xlu0 %3677, %v6740_v9  }
  0x82   :  { %269 = vperm.xlu2 %3678, %v264_v11  }
  0x83   :  { %275 = vperm.xlu1 %3679, %v264_v11  }
  0x8a   :  { %3680 = vset.pattern.permute.xlu2 %v3952_v31 }
  0x8b   :  { %2902 = vperm.xlu1 %3679, %v2891_v5  }
  0x8d   :  { %v3988_v12 = vpop.xlane.xlu2 %151  ;;  %v4007_v23 = vpop.xlane.xlu1 %145 }
  0x8e   :  { %6860 = vst [vmem:[#allocation20_spill] sm:$0xff] %v3988_v12  ;;  %v4001_v19 = vpop.xlane.xlu0 %139 }
  0x8f   :  { %6864 = vst [vmem:[#allocation24_spill] sm:$0xff] %v4001_v19 }
  0x90   :  { %6866 = vst [vmem:[#allocation26_spill] sm:$0xff] %v4007_v23 }
  0x92   :  { %288 = vperm.xlu2 %3680, %v277_v2  }
  0x93   :  { %3682 = vset.pattern.permute.xlu1 %v3947_v28 }
  0x95   :  { %v3992_v14 = vpop.xlane.xlu2 %154  ;;  %v4017_v27 = vpop.xlane.xlu1 %148 }
  0x96   :  { %6861 = vst [vmem:[#allocation21_spill] sm:$0xff] %v3992_v14  ;;  %v4013_v24 = vpop.xlane.xlu0 %142 }
  0x97   :  { %6867 = vst [vmem:[#allocation27_spill] sm:$0xff] %v4013_v24 }
  0x98   :  { %6869 = vst [vmem:[#allocation29_spill] sm:$0xff] %v4017_v27 }
  0x9a   :  { %3681 = vset.pattern.permute.xlu2 %v3947_v28 }
  0x9b   :  { %2922 = vperm.xlu1 %3682, %v2917_v15  }
  0x9d   :  { %v4003_v20 = vpop.xlane.xlu2 %163  ;;  %v4027_v34 = vpop.xlane.xlu1 %160 }
  0x9e   :  { %6865 = vst [vmem:[#allocation25_spill] sm:$0xff] %v4003_v20  ;;  %v4023_v32 = vpop.xlane.xlu0 %157 }
  0x9f   :  { %6870 = vst [vmem:[#allocation30_spill] sm:$0xff] %v4023_v32 }
  0xa0   :  { %6872 = vst [vmem:[#allocation32_spill] sm:$0xff] %v4027_v34 }
  0xa2   :  { %2909 = vperm.xlu2 %3681, %v6738_v21  }
  0xa3   :  { %2935 = vperm.xlu1 %3682, %v6737_v22  }
  0xa5   :  { %v4015_v25 = vpop.xlane.xlu2 %172  ;;  %v4033_v37 = vpop.xlane.xlu1 %169 }
  0xa6   :  { %6868 = vst [vmem:[#allocation28_spill] sm:$0xff] %v4015_v25  ;;  %v4029_v35 = vpop.xlane.xlu0 %166 }
  0xa7   :  { %6873 = vst [vmem:[#allocation33_spill] sm:$0xff] %v4029_v35  ;;  %v6900_v35 = vmov 2102212464  }
  0xa8   :  { %6874 = vst [vmem:[#allocation34_spill] sm:$0xff] %v4033_v37 }
  0xaa   :  { %3683 = vset.pattern.permute.xlu2 %v3952_v31 }
  0xab   :  { %3685 = vset.pattern.permute.xlu1 %v3952_v31 }
  0xad   :  { %v4025_v33 = vpop.xlane.xlu2 %181  ;;  %v4044_v43 = vpop.xlane.xlu1 %178 }
  0xae   :  { %6871 = vst [vmem:[#allocation31_spill] sm:$0xff] %v4025_v33  ;;  %v4042_v41 = vpop.xlane.xlu0 %175 }
  0xaf   :  { %6875 = vst [vmem:[#allocation35_spill] sm:$0xff] %v4042_v41 }
  0xb0   :  { %6876 = vst [vmem:[#allocation36_spill] sm:$0xff] %v4044_v43 }
  0xb2   :  { %2928 = vperm.xlu2 %3683, %v2917_v15  }
  0xb3   :  { %2954 = vperm.xlu1 %3685, %v2943_v30  }
  0xb5   :  { %v198_v36 = vpop.permute.xlu2 %197 }
  0xb6   :  { %v292_v40 = vmul.f32 %v4036_v38, %v198_v36  ;;  %v4055_v48 = vpop.xlane.xlu0 %184 }
  0xb7   :  { %6879 = vst [vmem:[#allocation39_spill] sm:$0xff] %v4055_v48 }
  0xb8   :  { %v4047_v44 = vadd.f32 %v4039_v39, %v292_v40 }
  0xba   :  { %3684 = vset.pattern.permute.xlu2 %v3947_v28  ;;  %6877 = vst [vmem:[#allocation37_spill] sm:$0xff] %v4047_v44  ;;  %v482_v46 = vand.u32 2139095040, %v4047_v44 }
  0xbb   :  { %3687 = vset.pattern.permute.xlu1 %v3947_v28 }
  0xbc   :  { %v483_v50 = vshrl.u32 %v482_v46, 23 }
  0xbd   :  { %v211_v42 = vpop.permute.xlu2 %210 }
  0xbe   :  { %v294_v45 = vmul.f32 %v4036_v38, %v211_v42  ;;  %v3608_v53 = vadd.s32 4294967169, %v483_v50 }
  0xc0   :  { %v4053_v47 = vadd.f32 %v4039_v39, %v294_v45  ;;  %v489_v57 = vadd.s32 1, %v3608_v53 }
  0xc2   :  { %2948 = vperm.xlu2 %3684, %v2943_v30   ;;  %6878 = vst [vmem:[#allocation38_spill] sm:$0xff] %v4053_v47  ;;  %v792_v51 = vand.u32 2139095040, %v4053_v47  ;;  %vm490_vm1 = vcmp.gt.s32.totalorder %v489_v57, 0 }
  0xc3   :  { %v491_v7 = vsel %vm490_vm1, %v489_v57, 0 }
  0xc4   :  { %v793_v54 = vshrl.u32 %v792_v51, 23  ;;  %v4073_v15 = vand.u32 31, %v491_v7 }
  0xc5   :  { %v224_v49 = vpop.permute.xlu2 %223  ;;  %v192_v52 = vpop.permute.xlu1 %191 }
  0xc6   :  { %v296_v55 = vmul.f32 %v4036_v38, %v224_v49  ;;  %v291_v56 = vmul.f32 %v4036_v38, %v192_v52  ;;  %v3614_v58 = vadd.s32 4294967169, %v793_v54  ;;  %6882 = vst [vmem:[#allocation42_spill] sm:$0xff] %v4073_v15  ;;  %v4081_v50 = vsub.s32 32, %v4073_v15 }
  0xc8   :  { %v4061_v59 = vadd.f32 %v4039_v39, %v296_v55  ;;  %v4064_v61 = vadd.f32 %v4039_v39, %v291_v56  ;;  %v799_v2 = vadd.s32 1, %v3614_v58  ;;  %6884 = vst [vmem:[#allocation44_spill] sm:$0xff] %v4081_v50 }
  0xc9   :  { %v250_v60 = vpop.permute.xlu0 %249 }
  0xca   :  { %3686 = vset.pattern.permute.xlu2 %v3952_v31  ;;  %6880 = vst [vmem:[#allocation40_spill] sm:$0xff] %v4061_v59  ;;  %v300_v0 = vmul.f32 %v4036_v38, %v250_v60  ;;  %v1102_v4 = vand.u32 2139095040, %v4061_v59  ;;  %v327_v5 = vand.u32 2139095040, %v4064_v61  ;;  %vm800_vm2 = vcmp.gt.s32.totalorder %v799_v2, 0 }
  0xcb   :  { %v801_v30 = vsel %vm800_vm2, %v799_v2, 0 }
  0xcc   :  { %v4071_v10 = vadd.f32 %v4039_v39, %v300_v0  ;;  %v1103_v11 = vshrl.u32 %v1102_v4, 23  ;;  %v328_v13 = vshrl.u32 %v327_v5, 23  ;;  %v4083_v51 = vand.u32 31, %v801_v30 }
  0xcd   :  { %v237_v62 = vpop.permute.xlu2 %236  ;;  %v218_v63 = vpop.permute.xlu1 %217 }
  0xce   :  { %v298_v6 = vmul.f32 %v4036_v38, %v237_v62  ;;  %6881 = vst [vmem:[#allocation41_spill] sm:$0xff] %v4071_v10  ;;  %v1722_v36 = vand.u32 2139095040, %v4071_v10  ;;  %v295_v40 = vmul.f32 %v4036_v38, %v218_v63  ;;  %v3620_v45 = vadd.s32 4294967169, %v1103_v11 }
  0xcf   :  { %v3605_v49 = vadd.s32 4294967169, %v328_v13  ;;  %6885 = vst [vmem:[#allocation45_spill] sm:$0xff] %v4083_v51  ;;  %v6745_v62 = vmov 920167782   ;;  %v4094_v0 = vsub.s32 32, %v4083_v51 }
  0xd0   :  { %v4076_v29 = vadd.f32 %v4039_v39, %v298_v6  ;;  %v1723_v54 = vshrl.u32 %v1722_v36, 23  ;;  %v4088_v55 = vadd.f32 %v4039_v39, %v295_v40  ;;  %v1109_v57 = vadd.s32 1, %v3620_v45 }
  0xd1   :  { %v334_v58 = vadd.s32 1, %v3605_v49  ;;  %v506_v63 = vshrl.u32 %v6745_v62, %v4081_v50  ;;  %6886 = vst [vmem:[#allocation46_spill] sm:$0xff] %v4094_v0  ;;  %v6741_v13 = vmov 2102212464   ;;  %v508_v45 = vshll.u32 %v6745_v62, %v4073_v15 }
  0xd2   :  { %6883 = vst [vmem:[#allocation43_spill] sm:$0xff] %v4076_v29  ;;  %v1412_v52 = vand.u32 2139095040, %v4076_v29  ;;  %v3632_v5 = vadd.s32 4294967169, %v1723_v54  ;;  %v947_v6 = vand.u32 2139095040, %v4088_v55  ;;  %v505_v36 = vshll.u32 %v6741_v13, %v4073_v15 }
  0xd3   :  { %vm1110_vm3 = vcmp.gt.s32.totalorder %v1109_v57, 0  ;;  %vm335_vm4 = vcmp.gt.s32.totalorder %v334_v58, 0  ;;  %v815_v21 = vshll.u32 %v6741_v13, %v4083_v51  ;;  %v6929_v29 = vand.u32 2147483647, %v4064_v61 }
  0xd4   :  { %v1413_v2 = vshrl.u32 %v1412_v52, 23  ;;  %v4112_v52 = vor.u32 %v506_v63, %v505_v36  ;;  %v1111_v26 = vsel %vm1110_vm3, %v1109_v57, 0  ;;  %v336_v9 = vsel %vm335_vm4, %v334_v58, 0 }
  0xd5   :  { %v257_v42 = vpop.permute.xlu2 %256  ;;  %v231_v46 = vpop.permute.xlu1 %230  ;;  %v818_v57 = vshll.u32 %v6745_v62, %v4083_v51  ;;  %v4132_v48 = vand.u32 31, %v1111_v26  ;;  %v4171_v25 = vshrl.u32 %v336_v9, 5 }
  0xd6   :  { %v301_v53 = vmul.f32 %v4036_v38, %v257_v42  ;;  %v297_v56 = vmul.f32 %v4036_v38, %v231_v46  ;;  %v4106_v42 = vshrl.u32 %v491_v7, 5  ;;  %v6743_v46 = vmov 1326507024   ;;  %6889 = vst [vmem:[#allocation49_spill] sm:$0xff] %v4112_v52 }
  0xd7   :  { %v509_v49 = vshrl.u32 %v6743_v46, %v4081_v50  ;;  %v3626_v54 = vadd.s32 4294967169, %v1413_v2  ;;  %v948_v7 = vshrl.u32 %v947_v6, 23  ;;  %v819_v17 = vshrl.u32 %v6743_v46, %v4094_v0  ;;  %6892 = vst [vmem:[#allocation52_spill] sm:$0xff] %v4132_v48 }
  0xd8   :  { %v4097_v4 = vadd.f32 %v4039_v39, %v301_v53  ;;  %v4101_v11 = vadd.f32 %v4039_v39, %v297_v56  ;;  %6888 = vst [vmem:[#allocation48_spill] sm:$0xff] %v4106_v42  ;;  %v816_v53 = vshrl.u32 %v6745_v62, %v4094_v0  ;;  %vm514_vm5 = vcmp.lt.s32.totalorder %v4106_v42, 4 }
  0xd9   :  { %v205_v60 = vpop.permute.xlu0 %204  ;;  %v510_v36 = vor.u32 %v509_v49, %v508_v45  ;;  %v4126_v2 = vshrl.u32 %v801_v30, 5  ;;  %v1419_v13 = vadd.s32 1, %v3626_v54  ;;  %v4134_v46 = vand.u32 31, %v336_v9 }
  0xda   :  { %6887 = vst [vmem:[#allocation47_spill] sm:$0xff] %v4097_v4  ;;  %v293_v40 = vmul.f32 %v4036_v38, %v205_v60  ;;  %v1877_v56 = vand.u32 2139095040, %v4097_v4  ;;  %v1729_v60 = vadd.s32 1, %v3632_v5  ;;  %v1257_v22 = vand.u32 2139095040, %v4101_v11 }
  0xdb   :  { %6890 = vst [vmem:[#allocation50_spill] sm:$0xff] %v4126_v2  ;;  %v4130_v6 = vor.u32 %v816_v53, %v815_v21  ;;  %v3617_v58 = vadd.s32 4294967169, %v948_v7  ;;  %v4139_v30 = vsel %vm514_vm5, %v4112_v52, 920167782  ;;  %v820_v45 = vor.u32 %v819_v17, %v818_v57 }
  0xdc   :  { %v4123_v63 = vadd.f32 %v4039_v39, %v293_v40  ;;  %v1878_v43 = vshrl.u32 %v1877_v56, 23  ;;  %vm1730_vm6 = vcmp.gt.s32.totalorder %v1729_v60, 0  ;;  %v1258_v40 = vshrl.u32 %v1257_v22, 23  ;;  %6893 = vst [vmem:[#allocation53_spill] sm:$0xff] %v4139_v30 }
  0xdd   :  { %v270_v5 = vpop.permute.xlu2 %269  ;;  %6891 = vst [vmem:[#allocation51_spill] sm:$0xff] %v4130_v6  ;;  %v4145_v53 = vsel %vm514_vm5, %v510_v36, 1326507024  ;;  %vm6844_vm7 = vcmp.lt.s32.totalorder %v4126_v2, 4  ;;  %v4150_v22 = vsub.s32 32, %v4132_v48  ;;  %v1731_v56 = vsel %vm1730_vm6, %v1729_v60, 0 }
  0xde   :  { %v637_v49 = vand.u32 2139095040, %v4123_v63  ;;  %v303_v21 = vmul.f32 %v4036_v38, %v270_v5  ;;  %6894 = vst [vmem:[#allocation54_spill] sm:$0xff] %v4145_v53  ;;  %vm1420_vm8 = vcmp.gt.s32.totalorder %v1419_v13, 0  ;;  %v3635_v7 = vadd.s32 4294967169, %v1878_v43  ;;  %v244_v43 = vpop.permute.xlu1 %243 }
  0xdf   :  { %6895 = vst [vmem:[#allocation55_spill] sm:$0xff] %v4150_v22  ;;  %v4155_v17 = vsel %vm6844_vm7, %v4130_v6, 920167782  ;;  %v4158_v57 = vsub.s32 32, %v4134_v46  ;;  %v954_v36 = vadd.s32 1, %v3617_v58  ;;  %v3623_v5 = vadd.s32 4294967169, %v1258_v40 }
  0xe0   :  { %6896 = vst [vmem:[#allocation56_spill] sm:$0xff] %v4155_v17  ;;  %v4162_v62 = vsel %vm6844_vm7, %v820_v45, 1326507024  ;;  %v4164_v54 = vshrl.u32 %v1111_v26, 5  ;;  %v638_v33 = vshrl.u32 %v637_v49, 23  ;;  %v4167_v60 = vadd.f32 %v4039_v39, %v303_v21 }
  0xe1   :  { %6897 = vst [vmem:[#allocation57_spill] sm:$0xff] %v4162_v62  ;;  %v1125_v34 = vshll.u32 %v6900_v35, %v4132_v48  ;;  %v4173_v37 = vand.u32 31, %v1731_v56  ;;  %v1421_v58 = vsel %vm1420_vm8, %v1419_v13, 0  ;;  %v6902_v40 = vmov 920167782  }
  0xe2   :  { %6898 = vst [vmem:[#allocation58_spill] sm:$0xff] %v4164_v54  ;;  %v1126_v14 = vshrl.u32 %v6902_v40, %v4150_v22  ;;  %v1128_v26 = vshll.u32 %v6902_v40, %v4132_v48  ;;  %v6903_v45 = vmov 1326507024   ;;  %v1884_v21 = vadd.s32 1, %v3635_v7 }
  0xe3   :  { %6899 = vst [vmem:[#allocation59_spill] sm:$0xff] %v4167_v60  ;;  %v1129_v49 = vshrl.u32 %v6903_v45, %v4150_v22  ;;  %v351_v27 = vshrl.u32 %v6902_v40, %v4158_v57  ;;  %vm955_vm9 = vcmp.gt.s32.totalorder %v954_v36, 0  ;;  %v1264_v20 = vadd.s32 1, %v3623_v5 }
  0xe4   :  { %6901 = vst [vmem:[#allocation60_spill] sm:$0xff] %v4173_v37  ;;  %v299_v9 = vmul.f32 %v4036_v38, %v244_v43  ;;  %vm6838_vm10 = vcmp.lt.s32.totalorder %v4164_v54, 4  ;;  %v4185_v13 = vand.u32 31, %v1421_v58  ;;  %v3611_v23 = vadd.s32 4294967169, %v638_v33 }
  0xe5   :  { %v2187_v19 = vand.u32 2139095040, %v4167_v60  ;;  %v350_v41 = vshll.u32 %v6900_v35, %v4134_v46  ;;  %v353_v7 = vshll.u32 %v6902_v40, %v4134_v46  ;;  %vm359_vm11 = vcmp.lt.s32.totalorder %v4171_v25, 4 }
  0xe6   :  { %6904 = vst [vmem:[#allocation61_spill] sm:$0xff] %v4185_v13  ;;  %v4194_v24 = vsub.s32 32, %v4173_v37  ;;  %v4196_v5 = vor.u32 %v1126_v14, %v1125_v34  ;;  %v354_v43 = vshrl.u32 %v6903_v45, %v4158_v57  ;;  %v956_v32 = vsel %vm955_vm9, %v954_v36, 0 }
  0xe7   :  { %vm1885_vm12 = vcmp.gt.s32.totalorder %v1884_v21, 0  ;;  %v1130_v33 = vor.u32 %v1129_v49, %v1128_v26  ;;  %v4200_v12 = vor.u32 %v351_v27, %v350_v41  ;;  %vm1265_vm13 = vcmp.gt.s32.totalorder %v1264_v20, 0 }
  0xe8   :  { %6905 = vst [vmem:[#allocation62_spill] sm:$0xff] %v4194_v24  ;;  %v4203_v28 = vadd.f32 %v4039_v39, %v299_v9  ;;  %v4205_v18 = vshrl.u32 %v1731_v56, 5  ;;  %v4208_v16 = vsub.s32 32, %v4185_v13  ;;  %v644_v31 = vadd.s32 1, %v3611_v23 }
  0xe9   :  { %6906 = vst [vmem:[#allocation63_spill] sm:$0xff] %v4196_v5  ;;  %v2188_v14 = vshrl.u32 %v2187_v19, 23  ;;  %v1745_v34 = vshll.u32 %v6900_v35, %v4173_v37  ;;  %v1746_v36 = vshrl.u32 %v6902_v40, %v4194_v24  ;;  %v4214_v26 = vand.u32 31, %v956_v32 }
  0xea   :  { %6907 = vst [vmem:[#allocation64_spill] sm:$0xff] %v4203_v28  ;;  %v1886_v27 = vsel %vm1885_vm12, %v1884_v21, 0  ;;  %v4219_v41 = vsel %vm6838_vm10, %v4196_v5, 920167782  ;;  %v1748_v56 = vshll.u32 %v6902_v40, %v4173_v37  ;;  %v1749_v19 = vshrl.u32 %v6903_v45, %v4194_v24 }
  0xeb   :  { %6908 = vst [vmem:[#allocation65_spill] sm:$0xff] %v4205_v18  ;;  %v1266_v23 = vsel %vm1265_vm13, %v1264_v20, 0  ;;  %v4227_v49 = vsel %vm6838_vm10, %v1130_v33, 1326507024  ;;  %v355_v9 = vor.u32 %v354_v43, %v353_v7  ;;  %v4232_v21 = vsel %vm359_vm11, %v4200_v12, 920167782 }
  0xec   :  { %6909 = vst [vmem:[#allocation66_spill] sm:$0xff] %v4208_v16  ;;  %v1567_v1 = vand.u32 2139095040, %v4203_v28  ;;  %v1436_v8 = vshrl.u32 %v6902_v40, %v4208_v16  ;;  %v4237_v3 = vand.u32 31, %v1886_v27  ;;  %vm645_vm14 = vcmp.gt.s32.totalorder %v644_v31, 0 }
  0xed   :  { %6910 = vst [vmem:[#allocation67_spill] sm:$0xff] %v4219_v41  ;;  %v3641_v41 = vadd.s32 4294967169, %v2188_v14  ;;  %v4239_v20 = vor.u32 %v1746_v36, %v1745_v34  ;;  %vm1754_vm15 = vcmp.lt.s32.totalorder %v4205_v18, 4  ;;  %v4243_v7 = vsub.s32 32, %v4214_v26 }
  0xee   :  { %6911 = vst [vmem:[#allocation68_spill] sm:$0xff] %v4227_v49  ;;  %v4245_v43 = vand.u32 31, %v1266_v23  ;;  %v1750_v33 = vor.u32 %v1749_v19, %v1748_v56  ;;  %v4247_v5 = vshrl.u32 %v1421_v58, 5  ;;  %v1435_v49 = vshll.u32 %v6900_v35, %v4185_v13 }
  0xef   :  { %6912 = vst [vmem:[#allocation69_spill] sm:$0xff] %v4237_v3  ;;  %v1439_v54 = vshrl.u32 %v6903_v45, %v4208_v16  ;;  %v4255_v14 = vsel %vm359_vm11, %v355_v9, 1326507024  ;;  %v4257_v34 = vshrl.u32 %v956_v32, 5  ;;  %v646_v36 = vsel %vm645_vm14, %v644_v31, 0 }
  0xf0   :  { %6913 = vst [vmem:[#allocation70_spill] sm:$0xff] %v4239_v20  ;;  %v1568_v48 = vshrl.u32 %v1567_v1, 23  ;;  %v4259_v22 = vor.u32 %v1436_v8, %v1435_v49  ;;  %v1438_v58 = vshll.u32 %v6902_v40, %v4185_v13  ;;  %v4264_v56 = vsub.s32 32, %v4237_v3 }
  0xf1   :  { %6914 = vst [vmem:[#allocation71_spill] sm:$0xff] %v4247_v5  ;;  %v2194_v19 = vadd.s32 1, %v3641_v41  ;;  %v4269_v59 = vsel %vm1754_vm15, %v4239_v20, 920167782  ;;  %v971_v32 = vshrl.u32 %v6902_v40, %v4243_v7  ;;  %v974_v1 = vshrl.u32 %v6903_v45, %v4243_v7 }
  0xf2   :  { %6915 = vst [vmem:[#allocation72_spill] sm:$0xff] %v4259_v22  ;;  %v4276_v31 = vsub.s32 32, %v4245_v43  ;;  %v4280_v8 = vsel %vm1754_vm15, %v1750_v33, 1326507024  ;;  %v1440_v49 = vor.u32 %v1439_v54, %v1438_v58  ;;  %vm1444_vm1 = vcmp.lt.s32.totalorder %v4247_v5, 4 }
  0xf3   :  { %6916 = vst [vmem:[#allocation73_spill] sm:$0xff] %v4264_v56  ;;  %v4283_v41 = vand.u32 31, %v646_v36  ;;  %v970_v9 = vshll.u32 %v6900_v35, %v4214_v26  ;;  %v973_v17 = vshll.u32 %v6902_v40, %v4214_v26  ;;  %vm979_vm2 = vcmp.lt.s32.totalorder %v4257_v34, 4 }
  0xf4   :  { %6917 = vst [vmem:[#allocation74_spill] sm:$0xff] %v4269_v59  ;;  %v3629_v6 = vadd.s32 4294967169, %v1568_v48  ;;  %v4293_v62 = vsel %vm1444_vm1, %v4259_v22, 920167782  ;;  %v1901_v54 = vshrl.u32 %v6902_v40, %v4264_v56  ;;  %v1904_v33 = vshrl.u32 %v6903_v45, %v4264_v56 }
  0xf5   :  { %6918 = vst [vmem:[#allocation75_spill] sm:$0xff] %v4280_v8  ;;  %vm2195_vm3 = vcmp.gt.s32.totalorder %v2194_v19, 0  ;;  %v4299_v58 = vor.u32 %v971_v32, %v970_v9  ;;  %v975_v2 = vor.u32 %v974_v1, %v973_v17  ;;  %v1281_v51 = vshrl.u32 %v6902_v40, %v4276_v31 }
  0xf6   :  { %6919 = vst [vmem:[#allocation76_spill] sm:$0xff] %v4293_v62  ;;  %v1284_v48 = vshrl.u32 %v6903_v45, %v4276_v31  ;;  %v4305_v0 = vshrl.u32 %v1886_v27, 5  ;;  %v1900_v47 = vshll.u32 %v6900_v35, %v4237_v3  ;;  %v1903_v20 = vshll.u32 %v6902_v40, %v4237_v3 }
  0xf7   :  { %v4312_v8 = vsub.s32 32, %v4283_v41  ;;  %v1280_v17 = vshll.u32 %v6900_v35, %v4245_v43  ;;  %v1283_v32 = vshll.u32 %v6902_v40, %v4245_v43  ;;  %v2196_v1 = vsel %vm2195_vm3, %v2194_v19, 0 }
  0xf8   :  { %6920 = vst [vmem:[#allocation77_spill] sm:$0xff] %v4305_v0  ;;  %v1574_v9 = vadd.s32 1, %v3629_v6  ;;  %v4318_v59 = vor.u32 %v1901_v54, %v1900_v47  ;;  %v1905_v27 = vor.u32 %v1904_v33, %v1903_v20  ;;  %v4320_v18 = vshrl.u32 %v1266_v23, 5 }
  0xf9   :  { %v4322_v24 = vshrl.u32 %v646_v36, 5  ;;  %v4326_v37 = vsel %vm1444_vm1, %v1440_v49, 1326507024  ;;  %v4331_v10 = vsel %vm979_vm2, %v4299_v58, 920167782  ;;  %v4333_v62 = vor.u32 %v1281_v51, %v1280_v17  ;;  %v283_v36 = vpop.permute.xlu0 %282 }
  0xfa   :  { %6921 = vst [vmem:[#allocation78_spill] sm:$0xff] %v4318_v59  ;;  %v1285_v19 = vor.u32 %v1284_v48, %v1283_v32  ;;  %v4337_v47 = vsel %vm979_vm2, %v975_v2, 1326507024  ;;  %v660_v6 = vshll.u32 %v6900_v35, %v4283_v41  ;;  %v661_v23 = vshrl.u32 %v6902_v40, %v4312_v8 }
  0xfb   :  { %6922 = vst [vmem:[#allocation79_spill] sm:$0xff] %v4322_v24  ;;  %v4343_v20 = vand.u32 31, %v2196_v1  ;;  %vm1909_vm4 = vcmp.lt.s32.totalorder %v4305_v0, 4  ;;  %v663_v51 = vshll.u32 %v6902_v40, %v4283_v41  ;;  %v664_v49 = vshrl.u32 %v6903_v45, %v4312_v8 }
  0xfc   :  { %6923 = vst [vmem:[#allocation80_spill] sm:$0xff] %v4326_v37  ;;  %vm1575_vm6 = vcmp.gt.s32.totalorder %v1574_v9, 0  ;;  %v4353_v2 = vsel %vm1909_vm4, %v4318_v59, 920167782  ;;  %v4357_v54 = vsel %vm1909_vm4, %v1905_v27, 1326507024  ;;  %v305_v17 = vmul.f32 %v4036_v38, %v283_v36  ;;  %v289_v37 = vpop.permute.xlu2 %288 }
  0xfd   :  { %6924 = vst [vmem:[#allocation81_spill] sm:$0xff] %v4343_v20  ;;  %vm1289_vm8 = vcmp.lt.s32.totalorder %v4320_v18, 4  ;;  %vm669_vm9 = vcmp.lt.s32.totalorder %v4322_v24, 4  ;;  %v4371_v32 = vor.u32 %v661_v23, %v660_v6  ;;  %v4374_v27 = vsub.s32 32, %v4343_v20 }
  0xfe   :  { %6925 = vst [vmem:[#allocation82_spill] sm:$0xff] %v4353_v2  ;;  %v4364_v33 = vsel %vm1289_vm8, %v4333_v62, 920167782  ;;  %v4368_v48 = vsel %vm1289_vm8, %v1285_v19, 1326507024  ;;  %v1576_v22 = vsel %vm1575_vm6, %v1574_v9, 0  ;;  %v665_v16 = vor.u32 %v664_v49, %v663_v51 }
  0xff   :  { %6926 = vst [vmem:[#allocation83_spill] sm:$0xff] %v4357_v54  ;;  %v6794_v5 = vmov 2475754826   ;;  %v331_v30 = vand.u32 8388607, %v6929_v29  ;;  %v348_v36 = vshrl.u32 %v6900_v35, %v4158_v57  ;;  %v4388_v53 = vshrl.u32 %v2196_v1, 5 }
 0x100   :  { %6927 = vst [vmem:[#allocation84_spill] sm:$0xff] %v4371_v32  ;;  %v342_v13 = vshrl.u32 %v6794_v5, %v4158_v57  ;;  %v6796_v52 = vmov 683565275   ;;  %v344_v6 = vshll.u32 %v6794_v5, %v4134_v46  ;;  %v6804_v23 = vmov 2131351028  }
 0x101   :  { %6928 = vst [vmem:[#allocation85_spill] sm:$0xff] %v4374_v27  ;;  %v341_v19 = vshll.u32 %v6796_v52, %v4134_v46  ;;  %v345_v9 = vshrl.u32 %v6804_v23, %v4158_v57  ;;  %v2210_v51 = vshll.u32 %v6900_v35, %v4343_v20  ;;  %v4393_v29 = vadd.f32 %v4039_v39, %v305_v17 }
 0x102   :  { %v306_v49 = vmul.f32 %v4036_v38, %v289_v37  ;;  %v4398_v5 = vshll.u32 %v6902_v40, %v4343_v20  ;;  %v347_v15 = vshll.u32 %v6804_v23, %v4134_v46  ;;  %v4405_v1 = vsel %vm669_vm9, %v4371_v32, 920167782 }
 0x103   :  { %6930 = vst [vmem:[#allocation86_spill] sm:$0xff] %v4393_v29  ;;  %v343_v52 = vor.u32 %v342_v13, %v341_v19  ;;  %v346_v42 = vor.u32 %v345_v9, %v344_v6  ;;  %v4409_v17 = vsel %vm669_vm9, %v665_v16, 1326507024  ;;  %v4411_v50 = vshrl.u32 %v1576_v22, 5 }
 0x104   :  { %6931 = vst [vmem:[#allocation87_spill] sm:$0xff] %v4405_v1  ;;  %v4413_v37 = vand.u32 31, %v1576_v22  ;;  %v2211_v13 = vshrl.u32 %v6902_v40, %v4374_v27  ;;  %v4419_v19 = vshrl.u32 %v6903_v45, %v4374_v27  ;;  %v332_v46 = vor.u32 8388608, %v331_v30 }
 0x105   :  { %6932 = vst [vmem:[#allocation88_spill] sm:$0xff] %v4409_v17  ;;  %v349_v6 = vor.u32 %v348_v36, %v347_v15  ;;  %v2497_v9 = vand.u32 2139095040, %v4393_v29  ;;  %v4423_v23 = vadd.f32 %v4039_v39, %v306_v49  ;;  %vm356_vm12 = vcmp.lt.s32.totalorder %v4171_v25, 1 }
 0x106   :  { %6933 = vst [vmem:[#allocation89_spill] sm:$0xff] %v4413_v37  ;;  %vm358_vm13 = vcmp.lt.s32.totalorder %v4171_v25, 3  ;;  %vm357_vm14 = vcmp.lt.s32.totalorder %v4171_v25, 2  ;;  %v364_v16 = vsel %vm356_vm12, %v343_v52, %v346_v42  ;;  %v4436_v30 = vsub.s32 32, %v4413_v37 }
 0x107   :  { %6934 = vst [vmem:[#allocation90_spill] sm:$0xff] %v4423_v23  ;;  %v366_v22 = vsel %vm358_vm13, %v349_v6, %v4232_v21  ;;  %v368_v15 = vsel %vm356_vm12, %v346_v42, %v349_v6  ;;  %v4440_v36 = vshll.u32 %v6900_v35, %v4413_v37  ;;  %v4444_v49 = vshll.u32 %v6902_v40, %v4413_v37 }
 0x108   :  { %6935 = vst [vmem:[#allocation91_spill] sm:$0xff] %v4436_v30  ;;  %v367_v29 = vsel %vm357_vm14, %v364_v16, %v366_v22  ;;  %v4448_v44 = vor.u32 %v2211_v13, %v2210_v51  ;;  %v6936_v21 = vmov 683565275   ;;  %v370_v59 = vsel %vm358_vm13, %v4200_v12, %v4255_v14 }
 0x109   :  { %v340_v2 = vshrl.u32 %v6936_v21, %v4158_v57  ;;  %v4456_v54 = vshll.u32 %v332_v46, 8  ;;  %v361_v0 = vsel %vm359_vm11, %v349_v6, 2102212464  ;;  %v371_v56 = vsel %vm357_vm14, %v368_v15, %v370_v59 }
 0x10a   :  { %v397_v3 = vand.u32 65535, %v367_v29  ;;  %v398_v16 = vshrl.u32 %v367_v29, 16  ;;  %v375_v57 = vand.u32 65535, %v371_v56  ;;  %v376_v22 = vshrl.u32 %v371_v56, 16 }
 0x10b   :  { %v373_v51 = vand.u32 65535, %v4456_v54  ;;  %v374_v13 = vshrl.u32 %v4456_v54, 16  ;;  %v4468_v12 = vshrl.u32 %v6902_v40, %v4436_v30  ;;  %v4472_v14 = vshrl.u32 %v6903_v45, %v4436_v30 }
 0x10c   :  { %v4474_v59 = vshrl.u32 %v2497_v9, 23  ;;  %v360_v29 = vsel %vm356_vm12, %v340_v2, %v343_v52  ;;  %v362_v46 = vsel %vm358_vm13, %v346_v42, %v361_v0  ;;  %v6836_v37 = vand.u32 2147483647, %v4088_v55 }
 0x10d   :  { %v378_v56 = vmul.u32 %v376_v22, %v373_v51  ;;  %v379_v6 = vmul.u32 %v375_v57, %v374_v13  ;;  %v400_v15 = vmul.u32 %v398_v16, %v373_v51  ;;  %v401_v4 = vmul.u32 %v397_v3, %v374_v13 }
 0x10e   :  { %v377_v40 = vmul.u32 %v375_v57, %v373_v51  ;;  %v380_v28 = vmul.u32 %v376_v22, %v374_v13  ;;  %v961_v45 = vshll.u32 %v6936_v21, %v4214_v26  ;;  %v399_v30 = vmul.u32 %v397_v3, %v373_v51 }
 0x10f   :  { %v381_v27 = vshll.u32 %v378_v56, 16  ;;  %v382_v9 = vshrl.u32 %v378_v56, 16  ;;  %v402_v20 = vmul.u32 %v398_v16, %v374_v13  ;;  %v403_v60 = vshll.u32 %v400_v15, 16 }
 0x110   :  { %v383_v52 = vshll.u32 %v379_v6, 16  ;;  %v405_v0 = vshll.u32 %v401_v4, 16  ;;  %v6840_v42 = vmov 0   ;;  %v951_v57 = vand.u32 8388607, %v6836_v37 }
 0x111   :  { %vm385_vm11 = vc.u32 %v377_v40, %v381_v27  ;;  %v387_v2 = vadd.s32 %v381_v27, %v377_v40  ;;  %vm407_vm3 = vc.u32 %v399_v30, %v403_v60  ;;  %v409_v17 = vadd.s32 %v403_v60, %v399_v30 }
 0x112   :  { %v386_v32 = vsel %vm385_vm11, 1, %v6840_v42  ;;  %v408_v1 = vsel %vm407_vm3, 1, %v6840_v42  ;;  %v6937_v3 = vmov 2475754826   ;;  %v384_v51 = vshrl.u32 %v379_v6, 16 }
 0x113   :  { %v388_v22 = vadd.s32 %v386_v32, %v380_v28  ;;  %vm389_vm6 = vc.u32 %v387_v2, %v383_v52  ;;  %v962_v16 = vshrl.u32 %v6937_v3, %v4243_v7  ;;  %v410_v40 = vadd.s32 %v408_v1, %v402_v20 }
 0x114   :  { %v390_v13 = vsel %vm389_vm6, 1, %v6840_v42  ;;  %vm411_vm12 = vc.u32 %v409_v17, %v405_v0  ;;  %v404_v56 = vshrl.u32 %v400_v15, 16  ;;  %v952_v60 = vor.u32 8388608, %v951_v57 }
 0x115   :  { %v392_v27 = vadd.s32 %v390_v13, %v388_v22  ;;  %v412_v24 = vsel %vm411_vm12, 1, %v6840_v42  ;;  %vm2219_vm13 = vcmp.lt.s32.totalorder %v4388_v53, 4  ;;  %v4492_v28 = vor.u32 %v962_v16, %v961_v45  ;;  %v263_v45 = vpop.permute.xlu1 %262 }
 0x116   :  { %v414_v30 = vadd.s32 %v412_v24, %v410_v40  ;;  %v964_v32 = vshll.u32 %v6937_v3, %v4214_v26  ;;  %v6938_v52 = vmov 2131351028   ;;  %v406_v37 = vshrl.u32 %v401_v4, 16 }
 0x117   :  { %v965_v6 = vshrl.u32 %v6938_v52, %v4243_v7  ;;  %v393_v2 = vadd.s32 %v392_v27, %v382_v9  ;;  %v967_v20 = vshll.u32 %v6938_v52, %v4214_v26  ;;  %v968_v1 = vshrl.u32 %v6900_v35, %v4243_v7 }
 0x118   :  { %v4502_v15 = vadd.s32 %v409_v17, %v405_v0  ;;  %v415_v57 = vadd.s32 %v414_v30, %v404_v56  ;;  %vm976_vm11 = vcmp.lt.s32.totalorder %v4257_v34, 1  ;;  %vm978_vm3 = vcmp.lt.s32.totalorder %v4257_v34, 3 }
 0x119   :  { %v4504_v24 = vor.u32 %v965_v6, %v964_v32  ;;  %v4507_v22 = vadd.s32 %v393_v2, %v384_v51  ;;  %v969_v16 = vor.u32 %v968_v1, %v967_v20  ;;  %v4510_v4 = vshll.u32 %v952_v60, 8 }
 0x11a   :  { %v363_v26 = vsel %vm357_vm14, %v360_v29, %v362_v46  ;;  %v416_v9 = vadd.s32 %v415_v57, %v406_v37  ;;  %v990_v0 = vsel %vm978_vm3, %v4299_v58, %v4337_v47  ;;  %vm977_vm12 = vcmp.lt.s32.totalorder %v4257_v34, 2 }
 0x11b   :  { %v984_v17 = vsel %vm976_vm11, %v4492_v28, %v4504_v24  ;;  %vm419_vm6 = vc.u32 %v4507_v22, %v4502_v15  ;;  %v986_v25 = vsel %vm978_vm3, %v969_v16, %v4331_v10  ;;  %v302_v37 = vmul.f32 %v4036_v38, %v263_v45 }
 0x11c   :  { %v420_v29 = vadd.s32 1, %v416_v9  ;;  %v987_v46 = vsel %vm977_vm12, %v984_v17, %v986_v25  ;;  %v988_v58 = vsel %vm976_vm11, %v4504_v24, %v969_v16  ;;  %v417_v47 = vmul.u32 %v4456_v54, %v363_v26 }
 0x11d   :  { %v991_v13 = vsel %vm977_vm12, %v988_v58, %v990_v0  ;;  %v993_v40 = vand.u32 65535, %v4510_v4  ;;  %v994_v27 = vshrl.u32 %v4510_v4, 16  ;;  %v1017_v30 = vand.u32 65535, %v987_v46 }
 0x11e   :  { %v421_v10 = vsel %vm419_vm6, %v420_v29, %v416_v9  ;;  %v995_v56 = vand.u32 65535, %v991_v13  ;;  %v996_v60 = vshrl.u32 %v991_v13, 16  ;;  %v4543_v32 = vsel %vm2219_vm13, %v4448_v44, 920167782 }
 0x11f   :  { %v6939_v6 = vor.u32 %v4419_v19, %v4398_v5  ;;  %v422_v2 = vadd.s32 %v421_v10, %v417_v47  ;;  %v1018_v20 = vshrl.u32 %v987_v46, 16  ;;  %v4554_v1 = vor.u32 %v4468_v12, %v4440_v36 }
 0x120   :  { %v3647_v57 = vadd.s32 4294967169, %v4474_v59  ;;  %v998_v45 = vmul.u32 %v996_v60, %v993_v40  ;;  %v999_v26 = vmul.u32 %v995_v56, %v994_v27  ;;  %v1021_v5 = vmul.u32 %v1017_v30, %v994_v27 }
 0x121   :  { %v4550_v54 = vsel %vm2219_vm13, %v6939_v6, 1326507024  ;;  %v423_v17 = vadd.s32 536870912, %v422_v2  ;;  %v1020_v0 = vmul.u32 %v1018_v20, %v993_v40  ;;  %v960_v19 = vshrl.u32 %v6936_v21, %v4243_v7 }
 0x122   :  { %v981_v25 = vsel %vm979_vm2, %v969_v16, 2102212464  ;;  %v997_v29 = vmul.u32 %v995_v56, %v993_v40  ;;  %v1001_v46 = vshll.u32 %v998_v45, 16  ;;  %v1000_v12 = vmul.u32 %v996_v60, %v994_v27 }
 0x123   :  { %v4563_v36 = vshrl.u32 %v423_v17, 30  ;;  %v1019_v59 = vmul.u32 %v1017_v30, %v993_v40  ;;  %v1023_v58 = vshll.u32 %v1020_v0, 16  ;;  %v1003_v47 = vshll.u32 %v999_v26, 16 }
 0x124   :  { %vm1005_vm14 = vc.u32 %v997_v29, %v1001_v46  ;;  %v1007_v13 = vadd.s32 %v1001_v46, %v997_v29  ;;  %v1022_v10 = vmul.u32 %v1018_v20, %v994_v27  ;;  %v1025_v51 = vshll.u32 %v1021_v5, 16 }
 0x125   :  { %v425_v6 = vshll.u32 %v4563_v36, 30  ;;  %v1006_v9 = vsel %vm1005_vm14, 1, %v6840_v42  ;;  %vm1027_vm6 = vc.u32 %v1019_v59, %v1023_v58  ;;  %v1029_v56 = vadd.s32 %v1023_v58, %v1019_v59 }
 0x126   :  { %v1008_v7 = vadd.s32 %v1006_v9, %v1000_v12  ;;  %vm1009_vm0 = vc.u32 %v1007_v13, %v1003_v47  ;;  %v1028_v16 = vsel %vm1027_vm6, 1, %v6840_v42  ;;  %v980_v40 = vsel %vm976_vm11, %v960_v19, %v4492_v28 }
 0x127   :  { %v4568_v17 = vsub.s32 %v422_v2, %v425_v6  ;;  %v1010_v60 = vsel %vm1009_vm0, 1, %v6840_v42  ;;  %v1030_v27 = vadd.s32 %v1028_v16, %v1022_v10  ;;  %v1002_v30 = vshrl.u32 %v998_v45, 16 }
 0x128   :  { %v1012_v20 = vadd.s32 %v1010_v60, %v1008_v7  ;;  %vm1031_vm2 = vc.u32 %v1029_v56, %v1025_v51  ;;  %v6839_v29 = vand.u32 2147483647, %v4101_v11  ;;  %vm326_vm14 = vcmp.lt.s32.totalorder %v4064_v61, 0 }
 0x129   :  { %vm427_vm10 = vcmp.lt.s32.totalorder %v4568_v17, 0  ;;  %v428_v9 = vsub.s32 0, %v4568_v17  ;;  %v982_v2 = vsel %vm978_vm3, %v4504_v24, %v981_v25  ;;  %v1032_v28 = vsel %vm1031_vm2, 1, %v6840_v42 }
 0x12a   :  { %v1004_v19 = vshrl.u32 %v999_v26, 16  ;;  %v1013_v46 = vadd.s32 %v1012_v20, %v1002_v30  ;;  %v1024_v12 = vshrl.u32 %v1020_v0, 16  ;;  %v1034_v45 = vadd.s32 %v1032_v28, %v1030_v27  ;;  %v276_v20 = vpop.permute.xlu1 %275 }
 0x12b   :  { %v6940_v59 = vand.u32 2139095040, %v4423_v23  ;;  %v4587_v47 = vadd.f32 %v4039_v39, %v302_v37  ;;  %v429_v13 = vsel %vm427_vm10, %v428_v9, %v4568_v17  ;;  %v1026_v10 = vshrl.u32 %v1021_v5, 16 }
 0x12c   :  { %v6942_v6 = vand.u32 2147483647, %v4064_v61  ;;  %v430_v26 = vclz %v429_v13  ;;  %v4596_v25 = vadd.s32 %v1013_v46, %v1004_v19  ;;  %v4598_v0 = vadd.s32 %v1029_v56, %v1025_v51 }
 0x12d   :  { %v4584_v58 = vshrl.u32 %v6940_v59, 23  ;;  %6941 = vst [vmem:[#allocation92_spill] sm:$0xff] %v4587_v47  ;;  %v1035_v7 = vadd.s32 %v1034_v45, %v1024_v12  ;;  %v4600_v16 = vadd.s32 1, %v3647_v57  ;;  %v448_v37 = vsub.s32 4, %v4563_v36 }
 0x12e   :  { %vm4592_vm0 = vcmp.le.f32.partialorder %v6942_v6, 0.7853982  ;;  %v983_v60 = vsel %vm977_vm12, %v980_v40, %v982_v2  ;;  %v1261_v5 = vand.u32 8388607, %v6839_v29  ;;  %v3606_v27 = vadd.s32 4294967294, %v430_v26 }
 0x12f   :  { %v1036_v30 = vadd.s32 %v1035_v7, %v1026_v10  ;;  %vm1039_vm10 = vc.u32 %v4596_v25, %v4598_v0  ;;  %v1272_v51 = vshrl.u32 %v6937_v3, %v4276_v31  ;;  %v1274_v57 = vshll.u32 %v6937_v3, %v4245_v43 }
 0x130   :  { %v1275_v56 = vshrl.u32 %v6938_v52, %v4276_v31  ;;  %v1277_v34 = vshll.u32 %v6938_v52, %v4245_v43  ;;  %v1278_v40 = vshrl.u32 %v6900_v35, %v4276_v31  ;;  %vm1599_vm11 = vcmp.lt.s32.totalorder %v4411_v50, 4 }
 0x131   :  { %v418_v9 = vadd.s32 %v4502_v15, %v4507_v22  ;;  %vm3607_vm3 = vcmp.lt.s32.totalorder %v3606_v27, 0  ;;  %v1037_v2 = vmul.u32 %v4510_v4, %v983_v60  ;;  %v1040_v28 = vadd.s32 1, %v1036_v30 }
 0x132   :  { %v433_v19 = vsel %vm3607_vm3, 0, %v3606_v27  ;;  %v1271_v46 = vshll.u32 %v6936_v21, %v4245_v43  ;;  %v1276_v12 = vor.u32 %v1275_v56, %v1274_v57  ;;  %v1279_v45 = vor.u32 %v1278_v40, %v1277_v34 }
 0x133   :  { %v434_v59 = vsub.s32 32, %v433_v19  ;;  %v438_v13 = vsub.s32 4294967266, %v433_v19  ;;  %v449_v10 = vsel %vm326_vm14, %v448_v37, %v4563_v36  ;;  %v1041_v15 = vsel %vm1039_vm10, %v1040_v28, %v1036_v30 }
 0x134   :  { %v4632_v22 = vmul.f32 %v4036_v38, %v276_v20  ;;  %v1042_v4 = vadd.s32 %v1041_v15, %v1037_v2  ;;  %v1262_v6 = vor.u32 8388608, %v1261_v5  ;;  %v1273_v26 = vor.u32 %v1272_v51, %v1271_v46 }
 0x135   :  { %v435_v43 = vshll.u32 %v4568_v17, %v433_v19  ;;  %v436_v7 = vshrl.u32 %v418_v9, %v434_v59  ;;  %v439_v60 = vadd.s32 127, %v438_v13  ;;  %vm1286_vm12 = vcmp.lt.s32.totalorder %v4320_v18, 1 }
 0x136   :  { %v451_v27 = vsel %vm4592_vm0, 0, %v449_v10  ;;  %v1043_v36 = vadd.s32 536870912, %v1042_v4  ;;  %vm1288_vm6 = vcmp.lt.s32.totalorder %v4320_v18, 3  ;;  %v1298_v37 = vsel %vm1286_vm12, %v1276_v12, %v1279_v45 }
 0x137   :  { %v437_v38 = vor.u32 %v436_v7, %v435_v43  ;;  %v440_v30 = vshll.u32 %v439_v60, 23  ;;  %vm1287_vm2 = vcmp.lt.s32.totalorder %v4320_v18, 2  ;;  %v1300_v17 = vsel %vm1288_vm6, %v4333_v62, %v4368_v48 }
 0x138   :  { %v1044_v5 = vshrl.u32 %v1043_v36, 30  ;;  %v1294_v51 = vsel %vm1286_vm12, %v1273_v26, %v1276_v12  ;;  %v1301_v57 = vsel %vm1287_vm2, %v1298_v37, %v1300_v17  ;;  %v4650_v56 = vshll.u32 %v1262_v6, 8 }
 0x139   :  { %v441_v34 = vor.u32 4788187, %v440_v30  ;;  %v1296_v40 = vsel %vm1288_vm6, %v1279_v45, %v4364_v33  ;;  %v1305_v20 = vand.u32 65535, %v1301_v57  ;;  %v1306_v9 = vshrl.u32 %v1301_v57, 16 }
 0x13a   :  { %v4658_v62 = vsel %vm1599_vm11, %v4554_v1, 920167782  ;;  %v1045_v48 = vshll.u32 %v1044_v5, 30  ;;  %v1291_v2 = vsel %vm1289_vm8, %v1279_v45, 2102212464  ;;  %v1303_v28 = vand.u32 65535, %v4650_v56 }
 0x13b   :  { %6945 = vst [vmem:[#allocation93_spill] sm:$0xff] %v4658_v62  ;;  %v442_v19 = vand.u32 2147483647, %v441_v34  ;;  %v444_v46 = vcvt.s32.f32 %v437_v38  ;;  %v1270_v59 = vshrl.u32 %v6936_v21, %v4276_v31  ;;  %v1304_v33 = vshrl.u32 %v4650_v56, 16 }
 0x13c   :  { %vm946_vm10 = vcmp.lt.s32.totalorder %v4088_v55, 0  ;;  %v468_v13 = vadd.s32 3, %v451_v27  ;;  %v4667_v10 = vsub.s32 %v1042_v4, %v1045_v48  ;;  %v1297_v15 = vsel %vm1287_vm2, %v1294_v51, %v1296_v40 }
 0x13d   :  { %v4671_v6 = vmul.u32 %v1306_v9, %v1303_v28  ;;  %v445_v45 = vmul.f32 %v444_v46, %v442_v19  ;;  %v1290_v43 = vsel %vm1286_vm12, %v1270_v59, %v1273_v26  ;;  %v1292_v7 = vsel %vm1288_vm6, %v1276_v12, %v1291_v2 }
 0x13e   :  { %v4677_v31 = vmul.u32 %v1305_v20, %v1304_v33  ;;  %vm1047_vm8 = vcmp.lt.s32.totalorder %v4667_v10, 0  ;;  %v1048_v60 = vsub.s32 0, %v4667_v10  ;;  %v1307_v4 = vmul.u32 %v1305_v20, %v1303_v28 }
 0x13f   :  { %v1311_v27 = vshll.u32 %v4671_v6, 16  ;;  %v446_v36 = vxor.u32 2147483648, %v445_v45  ;;  %v1068_v37 = vsub.s32 4, %v1044_v5  ;;  %v1327_v38 = vand.u32 65535, %v1297_v15 }
 0x140   :  { %v1328_v30 = vshrl.u32 %v1297_v15, 16  ;;  %v1049_v17 = vsel %vm1047_vm8, %v1048_v60, %v4667_v10  ;;  %v1310_v51 = vmul.u32 %v1306_v9, %v1304_v33  ;;  %v1313_v34 = vshll.u32 %v4677_v31, 16 }
 0x141   :  { %vm1315_vm3 = vc.u32 %v1307_v4, %v1311_v27  ;;  %v1317_v26 = vadd.s32 %v1311_v27, %v1307_v4  ;;  %v447_v12 = vsel %vm326_vm14, %v446_v36, %v445_v45  ;;  %v1050_v57 = vclz %v1049_v17 }
 0x142   :  { %v1316_v40 = vsel %vm1315_vm3, 1, %v6840_v42  ;;  %v4690_v20 = vsel %vm4592_vm0, %v4064_v61, %v447_v12  ;;  %v4692_v48 = vand.u32 3, %v468_v13  ;;  %v1038_v9 = vadd.s32 %v4598_v0, %v4596_v25  ;;  %v3732_v13 = vld [vmem:[#allocation8] sm:$0x1f] }
 0x143   :  { %v4698_v2 = vsel %vm1287_vm2, %v1290_v43, %v1292_v7  ;;  %v452_v19 = vmul.f32 %v4690_v20, %v4690_v20  ;;  %v6946_v46 = vand.u32 2147483647, %v4088_v55  ;;  %v3618_v24 = vadd.s32 4294967294, %v1050_v57 }
 0x144   :  { %v1318_v15 = vadd.s32 %v1316_v40, %v1310_v51  ;;  %vm1319_vm0 = vc.u32 %v1317_v26, %v1313_v34  ;;  %v4708_v45 = vperm.slane %v3732_v13, 3  ;;  %v1330_v18 = vmul.u32 %v1328_v30, %v1303_v28 }
 0x145   :  { %vm4704_vm14 = vcmp.le.f32.partialorder %v6946_v46, 0.7853982  ;;  %v1320_v25 = vsel %vm1319_vm0, 1, %v6840_v42  ;;  %v1331_v0 = vmul.u32 %v1327_v38, %v1304_v33  ;;  %v453_v43 = vmul.f32 -0.001358992, %v452_v19 }
 0x146   :  { %v460_v7 = vmul.f32 -0.00019511016, %v452_v19  ;;  %vm3619_vm12 = vcmp.lt.s32.totalorder %v3618_v24, 0  ;;  %v4713_v60 = vsel %vm946_vm10, %v1068_v37, %v1044_v5  ;;  %v1312_v27 = vshrl.u32 %v4671_v6, 16 }
 0x147   :  { %v1053_v4 = vsel %vm3619_vm12, 0, %v3618_v24  ;;  %v1329_v36 = vmul.u32 %v1327_v38, %v1303_v28  ;;  %v1333_v17 = vshll.u32 %v1330_v18, 16  ;;  %v454_v51 = vadd.f32 0.041655596, %v453_v43 }
 0x148   :  { %v461_v26 = vadd.f32 0.008332121, %v460_v7  ;;  %v1054_v12 = vsub.s32 32, %v1053_v4  ;;  %v1322_v57 = vadd.s32 %v1320_v25, %v1318_v15  ;;  %v1058_v34 = vsub.s32 4294967266, %v1053_v4 }
 0x149   :  { %v1332_v40 = vmul.u32 %v1328_v30, %v1304_v33  ;;  %v1335_v46 = vshll.u32 %v1331_v0, 16  ;;  %vm1337_vm6 = vc.u32 %v1329_v36, %v1333_v17  ;;  %v455_v13 = vmul.f32 %v454_v51, %v452_v19 }
 0x14a   :  { %v462_v29 = vmul.f32 %v461_v26, %v452_v19  ;;  %v1056_v42 = vshrl.u32 %v1038_v9, %v1054_v12  ;;  %v6949_v23 = vmov 0   ;;  %v1055_v5 = vshll.u32 %v4667_v10, %v1053_v4 }
 0x14b   :  { %v1338_v62 = vsel %vm1337_vm6, 1, %v6949_v23  ;;  %v1059_v37 = vadd.s32 127, %v1058_v34  ;;  %v1339_v24 = vadd.s32 %v1333_v17, %v1329_v36  ;;  %v456_v28 = vadd.f32 -0.4999988, %v455_v13 }
 0x14c   :  { %v1340_v6 = vadd.s32 %v1338_v62, %v1332_v40  ;;  %v463_v38 = vadd.f32 -0.16666654, %v462_v29  ;;  %vm474_vm2 = vcmp.eq.s32.totalorder %v4692_v48, 2  ;;  %v1323_v43 = vadd.s32 %v1322_v57, %v1312_v27 }
 0x14d   :  { %v1347_v33 = vmul.u32 %v4650_v56, %v4698_v2  ;;  %vm471_vm8 = vcmp.eq.s32.totalorder %v4692_v48, 0  ;;  %v1057_v30 = vor.u32 %v1056_v42, %v1055_v5  ;;  %v1060_v15 = vshll.u32 %v1059_v37, 23 }
 0x14e   :  { %v1071_v9 = vsel %vm4704_vm14, 0, %v4713_v60  ;;  %vm1341_vm3 = vc.u32 %v1339_v24, %v1335_v46  ;;  %v457_v10 = vmul.f32 %v456_v28, %v452_v19  ;;  %v464_v25 = vmul.f32 %v463_v38, %v452_v19 }
 0x14f   :  { %vm470_vm0 = vcmp.lt.s32.totalorder %v4692_v48, 2  ;;  %v1314_v29 = vshrl.u32 %v4677_v31, 16  ;;  %v1342_v62 = vsel %vm1341_vm3, 1, %v6949_v23  ;;  %vm467_vm12 = vweird.f32 %v4064_v61 }
 0x150   :  { %v1061_v56 = vor.u32 4788187, %v1060_v15  ;;  %v1334_v2 = vshrl.u32 %v1330_v18, 16  ;;  %v1336_v7 = vshrl.u32 %v1331_v0, 16  ;;  %v1344_v42 = vadd.s32 %v1342_v62, %v1340_v6  ;;  %v6950_v15 = vld [vmem:[#allocation79_spill] sm:$0xff] }
 0x151   :  { %v458_v4 = vadd.f32 1.0, %v457_v10  ;;  %v465_v27 = vadd.f32 1.0, %v464_v25  ;;  %v4729_v36 = vadd.s32 %v1323_v43, %v1314_v29  ;;  %v634_v60 = vand.u32 2147483647, %v4123_v63 }
 0x152   :  { %v1062_v17 = vand.u32 2147483647, %v1061_v56  ;;  %v1064_v19 = vcvt.s32.f32 %v1057_v30  ;;  %v4732_v51 = vadd.s32 %v1339_v24, %v1335_v46  ;;  %v1345_v26 = vadd.s32 %v1344_v42, %v1334_v2 }
 0x153   :  { %v466_v31 = vmul.f32 %v465_v27, %v4690_v20  ;;  %v475_v12 = vxor.u32 2147483648, %v458_v4  ;;  %v651_v57 = vshll.u32 %v6936_v21, %v4283_v41  ;;  %v652_v18 = vshrl.u32 %v6937_v3, %v4312_v8 }
 0x154   :  { %v1065_v0 = vmul.f32 %v1064_v19, %v1062_v17  ;;  %v1346_v34 = vadd.s32 %v1345_v26, %v1336_v7  ;;  %v654_v40 = vshll.u32 %v6937_v3, %v4283_v41  ;;  %v655_v13 = vshrl.u32 %v6938_v52, %v4312_v8 }
 0x155   :  { %v472_v46 = vxor.u32 2147483648, %v466_v31  ;;  %vm1349_vm6 = vc.u32 %v4729_v36, %v4732_v51  ;;  %v641_v20 = vand.u32 8388607, %v634_v60  ;;  %v657_v5 = vshll.u32 %v6938_v52, %v4283_v41 }
 0x156   :  { %v476_v37 = vsel %vm474_vm2, %v475_v12, %v466_v31  ;;  %v1066_v24 = vxor.u32 2147483648, %v1065_v0  ;;  %v1350_v6 = vadd.s32 1, %v1346_v34  ;;  %v658_v28 = vshrl.u32 %v6900_v35, %v4312_v8  ;;  %v6951_v31 = vld [vmem:[#allocation87_spill] sm:$0xff]  ;;  %v6952_v12 = vld [vmem:[#allocation88_spill] sm:$0xff] }
 0x157   :  { %v473_v38 = vsel %vm471_vm8, %v458_v4, %v472_v46  ;;  %v653_v43 = vor.u32 %v652_v18, %v651_v57  ;;  %v4755_v30 = vor.u32 %v655_v13, %v654_v40  ;;  %vm666_vm3 = vcmp.lt.s32.totalorder %v6950_v15, 1  ;;  %v6953_v57 = vld [vmem:[#allocation84_spill] sm:$0xff] }
 0x158   :  { %v477_v10 = vsel %vm470_vm0, %v473_v38, %v476_v37  ;;  %v1067_v41 = vsel %vm946_vm10, %v1066_v24, %v1065_v0  ;;  %v1351_v25 = vsel %vm1349_vm6, %v1350_v6, %v1346_v34  ;;  %v659_v29 = vor.u32 %v658_v28, %v657_v5 }
 0x159   :  { %v478_v62 = vsel %vm467_vm12, nan, %v477_v10  ;;  %v4767_v56 = vsel %vm4704_vm14, %v4088_v55, %v1067_v41  ;;  %v1352_v2 = vadd.s32 %v1351_v25, %v1347_v33  ;;  %v642_v7 = vor.u32 8388608, %v641_v20 }
 0x15a   :  { %v2805_v42 = vmul.f32 %v4708_v45, %v478_v62  ;;  %vm2821_vm2 = vcmask 121856   ;;  %v1072_v48 = vmul.f32 %v4767_v56, %v4767_v56  ;;  %vm668_vm10 = vcmp.lt.s32.totalorder %v6950_v15, 3 }
 0x15b   :  { %v1088_v4 = vadd.s32 3, %v1071_v9  ;;  %v1353_v27 = vadd.s32 536870912, %v1352_v2  ;;  %vm667_vm8 = vcmp.lt.s32.totalorder %v6950_v15, 2  ;;  %v678_v61 = vsel %vm666_vm3, %v4755_v30, %v659_v29 }
 0x15c   :  { %v2822_v59 = vsel %vm2821_vm2, %v2805_v42, 0.0  ;;  %v1073_v33 = vmul.f32 -0.001358992, %v1072_v48  ;;  %v1080_v17 = vmul.f32 -0.00019511016, %v1072_v48  ;;  %v674_v19 = vsel %vm666_vm3, %v653_v43, %v4755_v30 }
 0x15d   :  { %2823 = vadd.xlane.f32.xlu1 %v2822_v59  ;;  %v4781_v26 = vshrl.u32 %v1353_v27, 30  ;;  %v676_v9 = vsel %vm668_vm10, %v659_v29, %v6951_v31  ;;  %v680_v18 = vsel %vm668_vm10, %v6953_v57, %v6952_v12  ;;  %v4790_v0 = vshll.u32 %v642_v7, 8 }
 0x15e   :  { %v6954_v34 = vor.u32 %v4472_v14, %v4444_v49  ;;  %v1074_v13 = vadd.f32 0.041655596, %v1073_v33  ;;  %v1081_v46 = vadd.f32 0.008332121, %v1080_v17  ;;  %v681_v20 = vsel %vm667_vm8, %v678_v61, %v680_v18 }
 0x15f   :  { %v4801_v5 = vand.u32 3, %v1088_v4  ;;  %v1355_v37 = vshll.u32 %v4781_v26, 30  ;;  %v650_v24 = vshrl.u32 %v6936_v21, %v4312_v8  ;;  %v683_v6 = vand.u32 65535, %v4790_v0 }
 0x160   :  { %v4797_v40 = vsel %vm1599_vm11, %v6954_v34, 1326507024  ;;  %v1075_v28 = vmul.f32 %v1074_v13, %v1072_v48  ;;  %v1082_v49 = vmul.f32 %v1081_v46, %v1072_v48  ;;  %v677_v14 = vsel %vm667_vm8, %v674_v19, %v676_v9 }
 0x161   :  { %v686_v38 = vshrl.u32 %v681_v20, 16  ;;  %v4810_v10 = vadd.s32 4294967169, %v4584_v58  ;;  %v4812_v41 = vsub.s32 %v1352_v2, %v1355_v37  ;;  %v684_v25 = vshrl.u32 %v4790_v0, 16 }
 0x162   :  { %v685_v62 = vand.u32 65535, %v681_v20  ;;  %v2032_v7 = vand.u32 2139095040, %v4587_v47  ;;  %v1076_v42 = vadd.f32 -0.4999988, %v1075_v28  ;;  %v1083_v8 = vadd.f32 -0.16666654, %v1082_v49 }
 0x163   :  { %v1348_v4 = vadd.s32 %v4732_v51, %v4729_v36  ;;  %vm1091_vm14 = vcmp.eq.s32.totalorder %v4801_v5, 0  ;;  %vm1094_vm0 = vcmp.eq.s32.totalorder %v4801_v5, 2  ;;  %vm1357_vm12 = vcmp.lt.s32.totalorder %v4812_v41, 0 }
 0x164   :  { %v1358_v58 = vsub.s32 0, %v4812_v41  ;;  %v688_v2 = vmul.u32 %v686_v38, %v683_v6  ;;  %v707_v27 = vand.u32 65535, %v677_v14  ;;  %v1077_v61 = vmul.f32 %v1076_v42, %v1072_v48 }
 0x165   :  { %v1084_v59 = vmul.f32 %v1083_v8, %v1072_v48  ;;  %vm1090_vm6 = vcmp.lt.s32.totalorder %v4801_v5, 2  ;;  %v4825_v33 = vsel %vm666_vm3, %v650_v24, %v653_v43  ;;  %v671_v36 = vsel %vm669_vm9, %v659_v29, 2102212464 }
 0x166   :  { %vm1087_vm7 = vweird.f32 %v4088_v55  ;;  %v1359_v51 = vsel %vm1357_vm12, %v1358_v58, %v4812_v41  ;;  %v4831_v17 = vmul.u32 %v685_v62, %v684_v25  ;;  %v691_v19 = vshll.u32 %v688_v2, 16 }
 0x167   :  { %v708_v31 = vshrl.u32 %v677_v14, 16  ;;  %v1078_v9 = vadd.f32 1.0, %v1077_v61  ;;  %v1085_v12 = vadd.f32 1.0, %v1084_v59  ;;  %v1360_v48 = vclz %v1359_v51 }
 0x168   :  { %v687_v57 = vmul.u32 %v685_v62, %v683_v6  ;;  %v1378_v18 = vsub.s32 4, %v4781_v26  ;;  %v672_v43 = vsel %vm668_vm10, %v4755_v30, %v671_v36  ;;  %v690_v34 = vmul.u32 %v686_v38, %v684_v25 }
 0x169   :  { %v709_v29 = vmul.u32 %v707_v27, %v683_v6  ;;  %v1086_v13 = vmul.f32 %v1085_v12, %v4767_v56  ;;  %v1095_v46 = vxor.u32 2147483648, %v1078_v9  ;;  %v3624_v20 = vadd.s32 4294967294, %v1360_v48 }
 0x16a   :  { %vm695_vm9 = vc.u32 %v687_v57, %v691_v19  ;;  %v693_v37 = vshll.u32 %v4831_v17, 16  ;;  %v697_v28 = vadd.s32 %v691_v19, %v687_v57  ;;  %v710_v49 = vmul.u32 %v708_v31, %v683_v6 }
 0x16b   :  { %v696_v24 = vsel %vm695_vm9, 1, %v6949_v23  ;;  %v1092_v14 = vxor.u32 2147483648, %v1086_v13  ;;  %vm3625_vm3 = vcmp.lt.s32.totalorder %v3624_v20, 0  ;;  %v692_v62 = vshrl.u32 %v688_v2, 16 }
 0x16c   :  { %v698_v42 = vadd.s32 %v696_v24, %v690_v34  ;;  %vm1256_vm12 = vcmp.lt.s32.totalorder %v4101_v11, 0  ;;  %v1363_v30 = vsel %vm3625_vm3, 0, %v3624_v20  ;;  %vm699_vm10 = vc.u32 %v697_v28, %v693_v37 }
 0x16d   :  { %v711_v38 = vmul.u32 %v707_v27, %v684_v25  ;;  %v713_v8 = vshll.u32 %v710_v49, 16  ;;  %v1093_v56 = vsel %vm1091_vm14, %v1078_v9, %v1092_v14  ;;  %v1096_v58 = vsel %vm1094_vm0, %v1095_v46, %v1086_v13  ;;  %v6958_v14 = vld [vmem:[#allocation59_spill] sm:$0xff] }
 0x16e   :  { %v1364_v61 = vsub.s32 32, %v1363_v30  ;;  %v1368_v59 = vsub.s32 4294967266, %v1363_v30  ;;  %v1097_v6 = vsel %vm1090_vm6, %v1093_v56, %v1096_v58  ;;  %v1365_v2 = vshll.u32 %v4812_v41, %v1363_v30 }
 0x16f   :  { %v700_v36 = vsel %vm699_vm10, 1, %v6949_v23  ;;  %v712_v51 = vmul.u32 %v708_v31, %v684_v25  ;;  %v1098_v27 = vsel %vm1087_vm7, nan, %v1097_v6  ;;  %vm2505_vm14 = vcmp.gt.s32.totalorder %v4600_v16, 0 }
 0x170   :  { %v1366_v19 = vshrl.u32 %v1348_v4, %v1364_v61  ;;  %v1369_v12 = vadd.s32 127, %v1368_v59  ;;  %v702_v48 = vadd.s32 %v700_v36, %v698_v42  ;;  %v2809_v9 = vmul.f32 %v4708_v45, %v1098_v27  ;;  %v6960_v59 = vld [vmem:[#allocation85_spill] sm:$0xff] }
 0x171   :  { %v715_v57 = vshll.u32 %v711_v38, 16  ;;  %vm717_vm0 = vc.u32 %v709_v29, %v713_v8  ;;  %v719_v34 = vadd.s32 %v713_v8, %v709_v29  ;;  %v4856_v25 = vadd.f32 %v4039_v39, %v4632_v22 }
 0x172   :  { %v1367_v5 = vor.u32 %v1366_v19, %v1365_v2  ;;  %v1370_v13 = vshll.u32 %v1369_v12, 23  ;;  %v703_v46 = vadd.s32 %v702_v48, %v692_v62  ;;  %v718_v41 = vsel %vm717_vm0, 1, %v6949_v23 }
 0x173   :  { %v2834_v55 = vsel %vm2821_vm2, %v2809_v9, 0.0  ;;  %v720_v4 = vadd.s32 %v718_v41, %v712_v51  ;;  %vm721_vm7 = vc.u32 %v719_v34, %v715_v57  ;;  %v6955_v31 = vand.u32 2147483647, %v4101_v11 }
 0x174   :  { %2835 = vadd.xlane.f32.xlu2 %v2834_v55  ;;  %v1371_v29 = vor.u32 4788187, %v1370_v13  ;;  %v694_v37 = vshrl.u32 %v4831_v17, 16  ;;  %v722_v24 = vsel %vm721_vm7, 1, %v6949_v23  ;;  %v673_v39 = vsel %vm667_vm8, %v4825_v33, %v672_v43  ;;  %v6959_v43 = vld [vmem:[#allocation81_spill] sm:$0xff] }
 0x175   :  { %vm4861_vm6 = vcmp.le.f32.partialorder %v6955_v31, 0.7853982  ;;  %v714_v22 = vshrl.u32 %v710_v49, 16  ;;  %v724_v28 = vadd.s32 %v722_v24, %v720_v4  ;;  %v2184_v62 = vand.u32 2147483647, %v6958_v14 }
 0x176   :  { %v1372_v42 = vand.u32 2147483647, %v1371_v29  ;;  %v1374_v30 = vcvt.s32.f32 %v1367_v5  ;;  %v1379_v8 = vsel %vm1256_vm12, %v1378_v18, %v4781_v26  ;;  %v4874_v56 = vadd.s32 %v703_v46, %v694_v37 }
 0x177   :  { %v716_v58 = vshrl.u32 %v711_v38, 16  ;;  %v4876_v17 = vadd.s32 %v719_v34, %v715_v57  ;;  %v725_v61 = vadd.s32 %v724_v28, %v714_v22  ;;  %v2191_v15 = vand.u32 8388607, %v2184_v62 }
 0x178   :  { %v1375_v33 = vmul.f32 %v1374_v30, %v1372_v42  ;;  %v2201_v49 = vshll.u32 %v6936_v21, %v6959_v43  ;;  %v2202_v6 = vshrl.u32 %v6937_v3, %v6960_v59  ;;  %v2205_v2 = vshrl.u32 %v6938_v52, %v6960_v59 }
 0x179   :  { %v726_v26 = vadd.s32 %v725_v61, %v716_v58  ;;  %v2204_v18 = vshll.u32 %v6937_v3, %v6959_v43  ;;  %v2207_v38 = vshll.u32 %v6938_v52, %v6959_v43  ;;  %v2208_v36 = vshrl.u32 %v6900_v35, %v6960_v59 }
 0x17a   :  { %v1376_v51 = vxor.u32 2147483648, %v1375_v33  ;;  %v1381_v27 = vsel %vm4861_vm6, 0, %v1379_v8  ;;  %vm729_vm8 = vc.u32 %v4874_v56, %v4876_v17  ;;  %v2192_v19 = vor.u32 8388608, %v2191_v15 }
 0x17b   :  { %v730_v12 = vadd.s32 1, %v726_v26  ;;  %v4896_v48 = vor.u32 %v2202_v6, %v2201_v49  ;;  %v4898_v9 = vor.u32 %v2205_v2, %v2204_v18  ;;  %v2209_v57 = vor.u32 %v2208_v36, %v2207_v38 }
 0x17c   :  { %v2506_v34 = vsel %vm2505_vm14, %v4600_v16, 0  ;;  %v1377_v5 = vsel %vm1256_vm12, %v1376_v51, %v1375_v33  ;;  %v727_v13 = vmul.u32 %v4790_v0, %v673_v39  ;;  %vm2218_vm9 = vcmp.lt.s32.totalorder %v4388_v53, 3 }
 0x17d   :  { %v4910_v46 = vsel %vm4861_vm6, %v4101_v11, %v1377_v5  ;;  %v1398_v41 = vadd.s32 3, %v1381_v27  ;;  %v731_v55 = vsel %vm729_vm8, %v730_v12, %v726_v26  ;;  %v2230_v4 = vsel %vm2218_vm9, %v4448_v44, %v4550_v54 }
 0x17e   :  { %v1382_v16 = vmul.f32 %v4910_v46, %v4910_v46  ;;  %v732_v31 = vadd.s32 %v731_v55, %v727_v13  ;;  %vm2216_vm3 = vcmp.lt.s32.totalorder %v4388_v53, 1  ;;  %vm2217_vm12 = vcmp.lt.s32.totalorder %v4388_v53, 2 }
 0x17f   :  { %v2224_v0 = vsel %vm2216_vm3, %v4896_v48, %v4898_v9  ;;  %v2226_v20 = vsel %vm2218_vm9, %v2209_v57, %v4543_v32  ;;  %v2228_v44 = vsel %vm2216_vm3, %v4898_v9, %v2209_v57  ;;  %v4930_v54 = vshll.u32 %v2192_v19, 8 }
 0x180   :  { %v1383_v29 = vmul.f32 -0.001358992, %v1382_v16  ;;  %v1390_v37 = vmul.f32 -0.00019511016, %v1382_v16  ;;  %v733_v24 = vadd.s32 536870912, %v732_v31  ;;  %v2231_v39 = vsel %vm2217_vm12, %v2228_v44, %v2230_v4 }
 0x181   :  { %v2233_v22 = vand.u32 65535, %v4930_v54  ;;  %v2234_v28 = vshrl.u32 %v4930_v54, 16  ;;  %v2235_v42 = vand.u32 65535, %v2231_v39  ;;  %v2236_v30 = vshrl.u32 %v2231_v39, 16 }
 0x182   :  { %v1384_v8 = vadd.f32 0.041655596, %v1383_v29  ;;  %v1391_v32 = vadd.f32 0.008332121, %v1390_v37  ;;  %v4936_v58 = vshrl.u32 %v733_v24, 30  ;;  %v2227_v61 = vsel %vm2217_vm12, %v2224_v0, %v2226_v20 }
 0x183   :  { %v4941_v15 = vadd.s32 1, %v4810_v10  ;;  %v1399_v33 = vand.u32 3, %v1398_v41  ;;  %v2238_v43 = vmul.u32 %v2236_v30, %v2233_v22  ;;  %v4943_v49 = vmul.u32 %v2235_v42, %v2234_v28 }
 0x184   :  { %v4945_v6 = vshrl.u32 %v2506_v34, 5  ;;  %v1385_v2 = vmul.f32 %v1384_v8, %v1382_v16  ;;  %v1392_v26 = vmul.f32 %v1391_v32, %v1382_v16  ;;  %v735_v18 = vshll.u32 %v4936_v58, 30 }
 0x185   :  { %v4948_v38 = vand.u32 31, %v2506_v34  ;;  %v2237_v36 = vmul.u32 %v2235_v42, %v2233_v22  ;;  %v2241_v51 = vshll.u32 %v2238_v43, 16  ;;  %v2258_v27 = vshrl.u32 %v2227_v61, 16 }
 0x186   :  { %v1386_v19 = vadd.f32 -0.4999988, %v1385_v2  ;;  %v1393_v12 = vadd.f32 -0.16666654, %v1392_v26  ;;  %v4950_v5 = vsub.s32 %v732_v31, %v735_v18  ;;  %v2221_v10 = vsel %vm2219_vm13, %v2209_v57, 2102212464 }
 0x187   :  { %vm1401_vm10 = vcmp.eq.s32.totalorder %v1399_v33, 0  ;;  %v2240_v13 = vmul.u32 %v2236_v30, %v2234_v28  ;;  %v2243_v41 = vshll.u32 %v4943_v49, 16  ;;  %vm2245_vm14 = vc.u32 %v2237_v36, %v2241_v51 }
 0x188   :  { %v2247_v55 = vadd.s32 %v2241_v51, %v2237_v36  ;;  %v1387_v4 = vmul.f32 %v1386_v19, %v1382_v16  ;;  %v1394_v0 = vmul.f32 %v1393_v12, %v1382_v16  ;;  %vm1400_vm0 = vcmp.lt.s32.totalorder %v1399_v33, 2 }
 0x189   :  { %vm737_vm7 = vcmp.lt.s32.totalorder %v4950_v5, 0  ;;  %v738_v34 = vsub.s32 0, %v4950_v5  ;;  %vm1397_vm6 = vweird.f32 %v4101_v11  ;;  %v2246_v31 = vsel %vm2245_vm14, 1, %v6949_v23 }
 0x18a   :  { %vm2249_vm8 = vc.u32 %v2247_v55, %v2243_v41  ;;  %v2257_v20 = vand.u32 65535, %v2227_v61  ;;  %v2260_v57 = vmul.u32 %v2258_v27, %v2233_v22  ;;  %v1388_v44 = vadd.f32 1.0, %v1387_v4 }
 0x18b   :  { %v1395_v29 = vadd.f32 1.0, %v1394_v0  ;;  %v739_v37 = vsel %vm737_vm7, %v738_v34, %v4950_v5  ;;  %v2248_v24 = vadd.s32 %v2246_v31, %v2240_v13  ;;  %vm1404_vm13 = vcmp.eq.s32.totalorder %v1399_v33, 2 }
 0x18c   :  { %v740_v39 = vclz %v739_v37  ;;  %v2200_v16 = vshrl.u32 %v6936_v21, %v6960_v59  ;;  %v2250_v42 = vsel %vm2249_vm8, 1, %v6949_v23  ;;  %v1405_v8 = vxor.u32 2147483648, %v1388_v44 }
 0x18d   :  { %v1396_v30 = vmul.f32 %v1395_v29, %v4910_v46  ;;  %v728_v32 = vadd.s32 %v4876_v17, %v4874_v56  ;;  %v2252_v61 = vadd.s32 %v2250_v42, %v2248_v24  ;;  %vm636_vm14 = vcmp.lt.s32.totalorder %v4123_v63, 0 }
 0x18e   :  { %v3612_v2 = vadd.s32 4294967294, %v740_v39  ;;  %v2220_v26 = vsel %vm2216_vm3, %v2200_v16, %v4896_v48  ;;  %v2222_v59 = vsel %vm2218_vm9, %v4898_v9, %v2221_v10  ;;  %v2261_v18 = vmul.u32 %v2257_v20, %v2234_v28 }
 0x18f   :  { %v1402_v36 = vxor.u32 2147483648, %v1396_v30  ;;  %v2242_v51 = vshrl.u32 %v2238_v43, 16  ;;  %v2259_v46 = vmul.u32 %v2257_v20, %v2233_v22  ;;  %v2263_v19 = vshll.u32 %v2260_v57, 16 }
 0x190   :  { %v1406_v12 = vsel %vm1404_vm13, %v1405_v8, %v1396_v30  ;;  %vm3613_vm7 = vcmp.lt.s32.totalorder %v3612_v2, 0  ;;  %v758_v56 = vsub.s32 4, %v4936_v58  ;;  %v2262_v17 = vmul.u32 %v2258_v27, %v2234_v28 }
 0x191   :  { %v1403_v13 = vsel %vm1401_vm10, %v1388_v44, %v1402_v36  ;;  %v743_v41 = vsel %vm3613_vm7, 0, %v3612_v2  ;;  %v2253_v55 = vadd.s32 %v2252_v61, %v2242_v51  ;;  %vm2267_vm3 = vc.u32 %v2259_v46, %v2263_v19  ;;  %v6965_v51 = vld [vmem:[#allocation91_spill] sm:$0xff] }
 0x192   :  { %v1407_v48 = vsel %vm1400_vm0, %v1403_v13, %v1406_v12  ;;  %v744_v4 = vsub.s32 32, %v743_v41  ;;  %v748_v9 = vsub.s32 4294967266, %v743_v41  ;;  %v2265_v10 = vshll.u32 %v2261_v18, 16 }
 0x193   :  { %v1408_v22 = vsel %vm1397_vm6, nan, %v1407_v48  ;;  %vm4981_vm9 = vcmp.le.f32.partialorder %v634_v60, 0.7853982  ;;  %v745_v28 = vshll.u32 %v4950_v5, %v743_v41  ;;  %v2268_v27 = vsel %vm2267_vm3, 1, %v6949_v23  ;;  %v6963_v60 = vld [vmem:[#allocation64_spill] sm:$0xff] }
 0x194   :  { %v2269_v0 = vadd.s32 %v2263_v19, %v2259_v46  ;;  %v2811_v33 = vmul.f32 %v4708_v45, %v1408_v22  ;;  %v746_v34 = vshrl.u32 %v728_v32, %v744_v4  ;;  %v749_v31 = vadd.s32 127, %v748_v9 }
 0x195   :  { %v2270_v20 = vadd.s32 %v2268_v27, %v2262_v17  ;;  %v2223_v11 = vsel %vm2217_vm12, %v2220_v26, %v2222_v59  ;;  %v2244_v44 = vshrl.u32 %v4943_v49, 16  ;;  %v1564_v29 = vand.u32 2147483647, %v6963_v60  ;;  %v6964_v59 = vld [vmem:[#allocation89_spill] sm:$0xff] }
 0x196   :  { %vm2271_vm10 = vc.u32 %v2269_v0, %v2265_v10  ;;  %v2840_v37 = vsel %vm2821_vm2, %v2811_v33, 0.0  ;;  %v747_v24 = vor.u32 %v746_v34, %v745_v28  ;;  %v750_v5 = vshll.u32 %v749_v31, 23  ;;  %v6966_v33 = vld [vmem:[#allocation93_spill] sm:$0xff] }
 0x197   :  { %v2272_v39 = vsel %vm2271_vm10, 1, %v6949_v23  ;;  %2841 = vadd.xlane.f32.xlu2 %v2840_v37  ;;  %v759_v16 = vsel %vm636_vm14, %v758_v56, %v4936_v58  ;;  %v2264_v42 = vshrl.u32 %v2260_v57, 16  ;;  %v2266_v30 = vshrl.u32 %v2261_v18, 16 }
 0x198   :  { %v2274_v53 = vadd.s32 %v2272_v39, %v2270_v20  ;;  %v751_v8 = vor.u32 4788187, %v750_v5  ;;  %v4997_v32 = vadd.s32 %v2253_v55, %v2244_v44  ;;  %v4999_v49 = vadd.s32 %v2269_v0, %v2265_v10 }
 0x199   :  { %v1571_v61 = vand.u32 8388607, %v1564_v29  ;;  %v754_v2 = vcvt.s32.f32 %v747_v24  ;;  %v1581_v36 = vshll.u32 %v6936_v21, %v6964_v59  ;;  %v1582_v46 = vshrl.u32 %v6937_v3, %v6965_v51 }
 0x19a   :  { %v2275_v26 = vadd.s32 %v2274_v53, %v2264_v42  ;;  %v752_v58 = vand.u32 2147483647, %v751_v8  ;;  %v1584_v18 = vshll.u32 %v6937_v3, %v6964_v59  ;;  %v1585_v19 = vshrl.u32 %v6938_v52, %v6965_v51 }
 0x19b   :  { %v1572_v57 = vor.u32 8388608, %v1571_v61  ;;  %v5011_v56 = vor.u32 %v1582_v46, %v1581_v36  ;;  %v1587_v17 = vshll.u32 %v6938_v52, %v6964_v59  ;;  %v1588_v13 = vshrl.u32 %v6900_v35, %v6965_v51 }
 0x19c   :  { %v2276_v12 = vadd.s32 %v2275_v26, %v2266_v30  ;;  %v755_v41 = vmul.f32 %v754_v2, %v752_v58  ;;  %v761_v55 = vsel %vm4981_vm9, 0, %v759_v16  ;;  %vm2279_vm12 = vc.u32 %v4997_v32, %v4999_v49 }
 0x19d   :  { %v1586_v48 = vor.u32 %v1585_v19, %v1584_v18  ;;  %v1589_v9 = vor.u32 %v1588_v13, %v1587_v17  ;;  %vm1596_vm0 = vcmp.lt.s32.totalorder %v4411_v50, 1  ;;  %vm1598_vm6 = vcmp.lt.s32.totalorder %v4411_v50, 3 }
 0x19e   :  { %v2280_v4 = vadd.s32 1, %v2276_v12  ;;  %v756_v10 = vxor.u32 2147483648, %v755_v41  ;;  %v2277_v22 = vmul.u32 %v4930_v54, %v2223_v11  ;;  %v1610_v27 = vsel %vm1598_vm6, %v4554_v1, %v4797_v40 }
 0x19f   :  { %v1604_v28 = vsel %vm1596_vm0, %v5011_v56, %v1586_v48  ;;  %v1606_v34 = vsel %vm1598_vm6, %v1589_v9, %v6966_v33  ;;  %v1608_v31 = vsel %vm1596_vm0, %v1586_v48, %v1589_v9  ;;  %v5036_v20 = vshll.u32 %v1572_v57, 8 }
 0x1a0   :  { %v2281_v0 = vsel %vm2279_vm12, %v2280_v4, %v2276_v12  ;;  %v5040_v54 = vshrl.u32 %v2032_v7, 23  ;;  %v757_v11 = vsel %vm636_vm14, %v756_v10, %v755_v41  ;;  %vm1597_vm8 = vcmp.lt.s32.totalorder %v4411_v50, 2 }
 0x1a1   :  { %v2282_v44 = vadd.s32 %v2281_v0, %v2277_v22  ;;  %v2342_v1 = vand.u32 2139095040, %v4856_v25  ;;  %v5049_v40 = vsel %vm4981_vm9, %v4123_v63, %v757_v11  ;;  %v778_v37 = vadd.s32 3, %v761_v55 }
 0x1a2   :  { %v1611_v24 = vsel %vm1597_vm8, %v1608_v31, %v1610_v27  ;;  %v762_v7 = vmul.f32 %v5049_v40, %v5049_v40  ;;  %v5057_v39 = vsel %vm1597_vm8, %v1604_v28, %v1606_v34  ;;  %v5060_v42 = vsub.s32 32, %v4948_v38 }
 0x1a3   :  { %v2283_v5 = vadd.s32 536870912, %v2282_v44  ;;  %v1615_v16 = vand.u32 65535, %v1611_v24  ;;  %v1613_v43 = vand.u32 65535, %v5036_v20  ;;  %v1614_v30 = vshrl.u32 %v5036_v20, 16 }
 0x1a4   :  { %v1616_v53 = vshrl.u32 %v1611_v24, 16  ;;  %v5066_v8 = vshll.u32 %v6900_v35, %v4948_v38  ;;  %v763_v61 = vmul.f32 -0.001358992, %v762_v7  ;;  %v770_v2 = vmul.f32 -0.00019511016, %v762_v7 }
 0x1a5   :  { %v2284_v26 = vshrl.u32 %v2283_v5, 30  ;;  %v5068_v59 = vand.u32 3, %v778_v37  ;;  %v5070_v46 = vmul.u32 %v1615_v16, %v1614_v30  ;;  %v1638_v58 = vshrl.u32 %v5057_v39, 16 }
 0x1a6   :  { %v1618_v36 = vmul.u32 %v1616_v53, %v1613_v43  ;;  %v764_v57 = vadd.f32 0.041655596, %v763_v61  ;;  %v771_v18 = vadd.f32 0.008332121, %v770_v2  ;;  %v1580_v12 = vshrl.u32 %v6936_v21, %v6965_v51 }
 0x1a7   :  { %v2285_v19 = vshll.u32 %v2284_v26, 30  ;;  %v1601_v17 = vsel %vm1599_vm11, %v1589_v9, 2102212464  ;;  %v1617_v13 = vmul.u32 %v1615_v16, %v1613_v43  ;;  %v1637_v55 = vand.u32 65535, %v5057_v39 }
 0x1a8   :  { %v1621_v41 = vshll.u32 %v1618_v36, 16  ;;  %vm2186_vm13 = vcmp.lt.s32.totalorder %v6958_v14, 0  ;;  %v765_v4 = vmul.f32 %v764_v57, %v762_v7  ;;  %v772_v10 = vmul.f32 %v771_v18, %v762_v7 }
 0x1a9   :  { %v5079_v22 = vsub.s32 %v2282_v44, %v2285_v19  ;;  %v1620_v28 = vmul.u32 %v1616_v53, %v1614_v30  ;;  %v1623_v27 = vshll.u32 %v5070_v46, 16  ;;  %v5082_v33 = vmul.u32 %v1638_v58, %v1613_v43 }
 0x1aa   :  { %vm1625_vm14 = vc.u32 %v1617_v13, %v1621_v41  ;;  %v1627_v0 = vadd.s32 %v1621_v41, %v1617_v13  ;;  %v766_v51 = vadd.f32 -0.4999988, %v765_v4  ;;  %v773_v34 = vadd.f32 -0.16666654, %v772_v10 }
 0x1ab   :  { %vm784_vm11 = vcmp.eq.s32.totalorder %v5068_v59, 2  ;;  %vm2287_vm7 = vcmp.lt.s32.totalorder %v5079_v22, 0  ;;  %v2288_v9 = vsub.s32 0, %v5079_v22  ;;  %vm781_vm3 = vcmp.eq.s32.totalorder %v5068_v59, 0 }
 0x1ac   :  { %v1600_v31 = vsel %vm1596_vm0, %v1580_v12, %v5011_v56  ;;  %v1602_v11 = vsel %vm1598_vm6, %v1586_v48, %v1601_v17  ;;  %v1626_v44 = vsel %vm1625_vm14, 1, %v6949_v23  ;;  %vm1629_vm9 = vc.u32 %v1627_v0, %v1623_v27 }
 0x1ad   :  { %v767_v37 = vmul.f32 %v766_v51, %v762_v7  ;;  %v774_v24 = vmul.f32 %v773_v34, %v762_v7  ;;  %vm780_vm10 = vcmp.lt.s32.totalorder %v5068_v59, 2  ;;  %v2289_v5 = vsel %vm2287_vm7, %v2288_v9, %v5079_v22 }
 0x1ae   :  { %v1628_v39 = vadd.s32 %v1626_v44, %v1620_v28  ;;  %vm777_vm12 = vweird.f32 %v4123_v63  ;;  %v2290_v16 = vclz %v2289_v5  ;;  %v2308_v53 = vsub.s32 4, %v2284_v26 }
 0x1af   :  { %v1630_v61 = vsel %vm1629_vm9, 1, %v6949_v23  ;;  %v1641_v56 = vmul.u32 %v1637_v55, %v1614_v30  ;;  %v768_v2 = vadd.f32 1.0, %v767_v37  ;;  %v775_v57 = vadd.f32 1.0, %v774_v24 }
 0x1b0   :  { %v1632_v48 = vadd.s32 %v1630_v61, %v1628_v39  ;;  %v1643_v18 = vshll.u32 %v5082_v33, 16  ;;  %v2278_v7 = vadd.s32 %v4999_v49, %v4997_v32  ;;  %v3642_v19 = vadd.s32 4294967294, %v2290_v16 }
 0x1b1   :  { %v5103_v12 = vsel %vm1597_vm8, %v1600_v31, %v1602_v11  ;;  %v1639_v17 = vmul.u32 %v1637_v55, %v1613_v43  ;;  %v776_v13 = vmul.f32 %v775_v57, %v5049_v40  ;;  %v785_v41 = vxor.u32 2147483648, %v768_v2 }
 0x1b2   :  { %v1622_v4 = vshrl.u32 %v1618_v36, 16  ;;  %v1624_v10 = vshrl.u32 %v5070_v46, 16  ;;  %vm3643_vm0 = vcmp.lt.s32.totalorder %v3642_v19, 0  ;;  %v5109_v28 = vsel %vm2186_vm13, %v2308_v53, %v2284_v26  ;;  %v6967_v26 = vld [vmem:[#allocation47_spill] sm:$0xff] }
 0x1b3   :  { %v1642_v27 = vmul.u32 %v1638_v58, %v1614_v30  ;;  %vm1647_vm6 = vc.u32 %v1639_v17, %v1643_v18  ;;  %v782_v32 = vxor.u32 2147483648, %v776_v13  ;;  %v2293_v49 = vsel %vm3643_vm0, 0, %v3642_v19  ;;  %v6971_v19 = vld [vmem:[#allocation73_spill] sm:$0xff] }
 0x1b4   :  { %v1633_v0 = vadd.s32 %v1632_v48, %v1622_v4  ;;  %v1645_v50 = vshll.u32 %v1641_v56, 16  ;;  %v786_v43 = vsel %vm784_vm11, %v785_v41, %v776_v13  ;;  %v2294_v55 = vsub.s32 32, %v2293_v49 }
 0x1b5   :  { %v2298_v40 = vsub.s32 4294967266, %v2293_v49  ;;  %v1648_v36 = vsel %vm1647_vm6, 1, %v6949_v23  ;;  %v783_v46 = vsel %vm781_vm3, %v768_v2, %v782_v32  ;;  %v1649_v51 = vadd.s32 %v1643_v18, %v1639_v17 }
 0x1b6   :  { %v1650_v34 = vadd.s32 %v1648_v36, %v1642_v27  ;;  %v1874_v9 = vand.u32 2147483647, %v6967_v26  ;;  %v787_v30 = vsel %vm780_vm10, %v783_v46, %v786_v43  ;;  %vm5121_vm8 = vcmp.le.f32.partialorder %v2184_v62, 0.7853982 }
 0x1b7   :  { %v2295_v31 = vshll.u32 %v5079_v22, %v2293_v49  ;;  %v2296_v11 = vshrl.u32 %v2278_v7, %v2294_v55  ;;  %v2299_v44 = vadd.s32 127, %v2298_v40  ;;  %vm2660_vm14 = vcmp.gt.s32.totalorder %v4941_v15, 0  ;;  %v6972_v40 = vld [vmem:[#allocation77_spill] sm:$0xff] }
 0x1b8   :  { %v788_v37 = vsel %vm777_vm12, nan, %v787_v30  ;;  %v1644_v24 = vshrl.u32 %v5082_v33, 16  ;;  %v1646_v5 = vshrl.u32 %v1641_v56, 16  ;;  %vm1651_vm11 = vc.u32 %v1649_v51, %v1645_v50  ;;  %v6970_v56 = vld [vmem:[#allocation69_spill] sm:$0xff] }
 0x1b9   :  { %v2807_v59 = vmul.f32 %v4708_v45, %v788_v37  ;;  %v2297_v39 = vor.u32 %v2296_v11, %v2295_v31  ;;  %v2300_v62 = vshll.u32 %v2299_v44, 23  ;;  %v1652_v16 = vsel %vm1651_vm11, 1, %v6949_v23  ;;  %v6975_v31 = vld [vmem:[#allocation82_spill] sm:$0xff] }
 0x1ba   :  { %v5132_v53 = vadd.s32 %v1633_v0, %v1624_v10  ;;  %v5134_v22 = vadd.s32 %v1649_v51, %v1645_v50  ;;  %v1654_v61 = vadd.s32 %v1652_v16, %v1650_v34  ;;  %v1881_v2 = vand.u32 8388607, %v1874_v9  ;;  %v6973_v51 = vld [vmem:[#allocation83_spill] sm:$0xff] }
 0x1bb   :  { %v2828_v63 = vsel %vm2821_vm2, %v2807_v59, 0.0  ;;  %v2301_v57 = vor.u32 4788187, %v2300_v62  ;;  %v2304_v33 = vcvt.s32.f32 %v2297_v39  ;;  %v1891_v48 = vshll.u32 %v6936_v21, %v6970_v56 }
 0x1bc   :  { %2829 = vadd.xlane.f32.xlu0 %v2828_v63  ;;  %v1655_v18 = vadd.s32 %v1654_v61, %v1644_v24  ;;  %v1882_v7 = vor.u32 8388608, %v1881_v2  ;;  %v1892_v17 = vshrl.u32 %v6937_v3, %v6971_v19  ;;  %v1894_v13 = vshll.u32 %v6937_v3, %v6970_v56 }
 0x1bd   :  { %v2302_v41 = vand.u32 2147483647, %v2301_v57  ;;  %v1895_v4 = vshrl.u32 %v6938_v52, %v6971_v19  ;;  %v1897_v10 = vshll.u32 %v6938_v52, %v6970_v56  ;;  %v1898_v27 = vshrl.u32 %v6900_v35, %v6971_v19 }
 0x1be   :  { %v1656_v32 = vadd.s32 %v1655_v18, %v1646_v5  ;;  %v1657_v49 = vmul.u32 %v5036_v20, %v5103_v12  ;;  %vm1659_vm7 = vc.u32 %v5132_v53, %v5134_v22  ;;  %v5155_v0 = vor.u32 %v1892_v17, %v1891_v48  ;;  %v6974_v20 = vld [vmem:[#allocation78_spill] sm:$0xff] }
 0x1bf   :  { %v2305_v50 = vmul.f32 %v2304_v33, %v2302_v41  ;;  %v5157_v43 = vor.u32 %v1895_v4, %v1894_v13  ;;  %v1899_v55 = vor.u32 %v1898_v27, %v1897_v10  ;;  %vm1908_vm3 = vcmp.lt.s32.totalorder %v6972_v40, 3 }
 0x1c0   :  { %v2311_v36 = vsel %vm5121_vm8, 0, %v5109_v28  ;;  %v1660_v46 = vadd.s32 1, %v1656_v32  ;;  %vm1906_vm9 = vcmp.lt.s32.totalorder %v6972_v40, 1  ;;  %v1920_v12 = vsel %vm1908_vm3, %v6974_v20, %v6973_v51 }
 0x1c1   :  { %v2306_v34 = vxor.u32 2147483648, %v2305_v50  ;;  %v1914_v30 = vsel %vm1906_vm9, %v5155_v0, %v5157_v43  ;;  %v1916_v11 = vsel %vm1908_vm3, %v1899_v55, %v6975_v31  ;;  %v5175_v44 = vshll.u32 %v1882_v7, 8 }
 0x1c2   :  { %v6976_v28 = vmov 920167782   ;;  %v1661_v24 = vsel %vm1659_vm7, %v1660_v46, %v1656_v32  ;;  %vm1907_vm10 = vcmp.lt.s32.totalorder %v6972_v40, 2  ;;  %v1918_v5 = vsel %vm1906_vm9, %v5157_v43, %v1899_v55 }
 0x1c3   :  { %v5179_v37 = vshll.u32 %v6976_v28, %v4948_v38  ;;  %v5188_v59 = vsel %vm2660_vm14, %v4941_v15, 0  ;;  %v2307_v39 = vsel %vm2186_vm13, %v2306_v34, %v2305_v50  ;;  %v1662_v62 = vadd.s32 %v1661_v24, %v1657_v49 }
 0x1c4   :  { %v1921_v16 = vsel %vm1907_vm10, %v1918_v5, %v1920_v12  ;;  %v5197_v61 = vsel %vm5121_vm8, %v6958_v14, %v2307_v39  ;;  %v2328_v2 = vadd.s32 3, %v2311_v36  ;;  %v5201_v63 = vsel %vm1907_vm10, %v1914_v30, %v1916_v11 }
 0x1c5   :  { %v1925_v57 = vand.u32 65535, %v1921_v16  ;;  %v2312_v15 = vmul.f32 %v5197_v61, %v5197_v61  ;;  %v1663_v33 = vadd.s32 536870912, %v1662_v62  ;;  %v1923_v56 = vand.u32 65535, %v5175_v44 }
 0x1c6   :  { %v1926_v48 = vshrl.u32 %v1921_v16, 16  ;;  %v5208_v18 = vshrl.u32 %v6976_v28, %v5060_v42  ;;  %v5211_v58 = vadd.s32 4294967169, %v5040_v54  ;;  %v5215_v7 = vshrl.u32 %v2342_v1, 23 }
 0x1c7   :  { %v1924_v17 = vshrl.u32 %v5175_v44, 16  ;;  %v2313_v13 = vmul.f32 -0.001358992, %v2312_v15  ;;  %v2320_v41 = vmul.f32 -0.00019511016, %v2312_v15  ;;  %v5218_v4 = vshrl.u32 %v1663_v33, 30 }
 0x1c8   :  { %v1928_v10 = vmul.u32 %v1926_v48, %v1923_v56  ;;  %v6977_v27 = vmov 1326507024   ;;  %v5224_v49 = vand.u32 3, %v2328_v2  ;;  %v1948_v54 = vshrl.u32 %v5201_v63, 16 }
 0x1c9   :  { %v5222_v32 = vshrl.u32 %v6977_v27, %v5060_v42  ;;  %v1929_v50 = vmul.u32 %v1925_v57, %v1924_v17  ;;  %v2314_v36 = vadd.f32 0.041655596, %v2313_v13  ;;  %v2321_v46 = vadd.f32 0.008332121, %v2320_v41 }
 0x1ca   :  { %v1665_v1 = vshll.u32 %v5218_v4, 30  ;;  %v1890_v51 = vshrl.u32 %v6936_v21, %v6971_v19  ;;  %v5232_v20 = vadd.s32 %v5134_v22, %v5132_v53  ;;  %v1927_v12 = vmul.u32 %v1925_v57, %v1923_v56 }
 0x1cb   :  { %v1931_v34 = vshll.u32 %v1928_v10, 16  ;;  %v1947_v30 = vand.u32 65535, %v5201_v63  ;;  %v2315_v31 = vmul.f32 %v2314_v36, %v2312_v15  ;;  %v2322_v11 = vmul.f32 %v2321_v46, %v2312_v15 }
 0x1cc   :  { %v5235_v24 = vsub.s32 %v1662_v62, %v1665_v1  ;;  %v1930_v5 = vmul.u32 %v1926_v48, %v1924_v17  ;;  %vm2334_vm13 = vcmp.eq.s32.totalorder %v5224_v49, 2  ;;  %v1933_v39 = vshll.u32 %v1929_v50, 16 }
 0x1cd   :  { %vm1935_vm12 = vc.u32 %v1927_v12, %v1931_v34  ;;  %v1937_v16 = vadd.s32 %v1931_v34, %v1927_v12  ;;  %v5238_v2 = vmul.u32 %v1948_v54, %v1923_v56  ;;  %v2316_v19 = vadd.f32 -0.4999988, %v2315_v31 }
 0x1ce   :  { %v2323_v33 = vadd.f32 -0.16666654, %v2322_v11  ;;  %vm1667_vm0 = vcmp.lt.s32.totalorder %v5235_v24, 0  ;;  %v1668_v53 = vsub.s32 0, %v5235_v24  ;;  %vm2331_vm6 = vcmp.eq.s32.totalorder %v5224_v49, 0 }
 0x1cf   :  { %v1910_v22 = vsel %vm1906_vm9, %v1890_v51, %v5155_v0  ;;  %v1911_v62 = vsel %vm1909_vm4, %v1899_v55, 2102212464  ;;  %v1936_v63 = vsel %vm1935_vm12, 1, %v6949_v23  ;;  %vm1939_vm8 = vc.u32 %v1937_v16, %v1933_v39 }
 0x1d0   :  { %v2317_v57 = vmul.f32 %v2316_v19, %v2312_v15  ;;  %v2324_v48 = vmul.f32 %v2323_v33, %v2312_v15  ;;  %vm2330_vm14 = vcmp.lt.s32.totalorder %v5224_v49, 2  ;;  %v1669_v13 = vsel %vm1667_vm0, %v1668_v53, %v5235_v24 }
 0x1d1   :  { %v1938_v41 = vadd.s32 %v1936_v63, %v1930_v5  ;;  %vm2327_vm11 = vweird.f32 %v6958_v14  ;;  %v1670_v36 = vclz %v1669_v13  ;;  %v1932_v46 = vshrl.u32 %v1928_v10, 16 }
 0x1d2   :  { %v1940_v1 = vsel %vm1939_vm8, 1, %v6949_v23  ;;  %v1953_v0 = vshll.u32 %v5238_v2, 16  ;;  %v2318_v51 = vadd.f32 1.0, %v2317_v57  ;;  %v2325_v55 = vadd.f32 1.0, %v2324_v48 }
 0x1d3   :  { %v1942_v12 = vadd.s32 %v1940_v1, %v1938_v41  ;;  %v1951_v34 = vmul.u32 %v1947_v30, %v1924_v17  ;;  %vm1566_vm4 = vcmp.lt.s32.totalorder %v6963_v60, 0  ;;  %v3630_v15 = vadd.s32 4294967294, %v1670_v36 }
 0x1d4   :  { %v1912_v31 = vsel %vm1908_vm3, %v5157_v43, %v1911_v62  ;;  %v1934_v11 = vshrl.u32 %v1929_v50, 16  ;;  %v1949_v5 = vmul.u32 %v1947_v30, %v1923_v56  ;;  %v2326_v39 = vmul.f32 %v2325_v55, %v5197_v61 }
 0x1d5   :  { %v2335_v10 = vxor.u32 2147483648, %v2318_v51  ;;  %v1688_v16 = vsub.s32 4, %v5218_v4  ;;  %v1943_v19 = vadd.s32 %v1942_v12, %v1932_v46  ;;  %vm3631_vm7 = vcmp.lt.s32.totalorder %v3630_v15, 0 }
 0x1d6   :  { %v1952_v33 = vmul.u32 %v1948_v54, %v1924_v17  ;;  %vm1957_vm9 = vc.u32 %v1949_v5, %v1953_v0  ;;  %v1959_v53 = vadd.s32 %v1953_v0, %v1949_v5  ;;  %v2332_v63 = vxor.u32 2147483648, %v2326_v39 }
 0x1d7   :  { %v2336_v57 = vsel %vm2334_vm13, %v2335_v10, %v2326_v39  ;;  %v1673_v48 = vsel %vm3631_vm7, 0, %v3630_v15  ;;  %v1955_v13 = vshll.u32 %v1951_v34, 16  ;;  %v5262_v50 = vadd.s32 %v1943_v19, %v1934_v11  ;;  %v6978_v11 = vld [vmem:[#allocation37_spill] sm:$0xff]  ;;  %v6979_v19 = vld [vmem:[#allocation44_spill] sm:$0xff] }
 0x1d8   :  { %v1674_v41 = vsub.s32 32, %v1673_v48  ;;  %v1678_v43 = vsub.s32 4294967266, %v1673_v48  ;;  %v1958_v61 = vsel %vm1957_vm9, 1, %v6949_v23  ;;  %v2333_v56 = vsel %vm2331_vm6, %v2318_v51, %v2332_v63 }
 0x1d9   :  { %v1675_v30 = vshll.u32 %v5235_v24, %v1673_v48  ;;  %v1960_v17 = vadd.s32 %v1958_v61, %v1952_v33  ;;  %vm1961_vm3 = vc.u32 %v1959_v53, %v1955_v13  ;;  %v2337_v54 = vsel %vm2330_vm14, %v2333_v56, %v2336_v57 }
 0x1da   :  { %v1676_v62 = vshrl.u32 %v5232_v20, %v1674_v41  ;;  %v1679_v36 = vadd.s32 127, %v1678_v43  ;;  %v1962_v46 = vsel %vm1961_vm3, 1, %v6949_v23  ;;  %v2338_v1 = vsel %vm2327_vm11, nan, %v2337_v54 }
 0x1db   :  { %v1954_v0 = vshrl.u32 %v5238_v2, 16  ;;  %v5275_v55 = vadd.s32 %v1959_v53, %v1955_v13  ;;  %v1964_v51 = vadd.s32 %v1962_v46, %v1960_v17  ;;  %v2817_v24 = vmul.f32 %v4708_v45, %v2338_v1 }
 0x1dc   :  { %v1677_v12 = vor.u32 %v1676_v62, %v1675_v30  ;;  %v1680_v15 = vshll.u32 %v1679_v36, 23  ;;  %v479_v49 = vand.u32 2147483647, %v6978_v11  ;;  %v1689_v20 = vsel %vm1566_vm4, %v1688_v16, %v5218_v4  ;;  %v6980_v16 = vld [vmem:[#allocation42_spill] sm:$0xff]  ;;  %v6983_v36 = vld [vmem:[#allocation48_spill] sm:$0xff] }
 0x1dd   :  { %v1913_v5 = vsel %vm1907_vm10, %v1910_v22, %v1912_v31  ;;  %v1956_v14 = vshrl.u32 %v1951_v34, 16  ;;  %v1965_v39 = vadd.s32 %v1964_v51, %v1954_v0  ;;  %v2858_v2 = vsel %vm2821_vm2, %v2817_v24, 0.0  ;;  %v6984_v0 = vld [vmem:[#allocation54_spill] sm:$0xff]  ;;  %v6985_v51 = vld [vmem:[#allocation49_spill] sm:$0xff] }
 0x1de   :  { %v1681_v10 = vor.u32 4788187, %v1680_v15  ;;  %vm1969_vm13 = vc.u32 %v5262_v50, %v5275_v55  ;;  %v497_v33 = vshrl.u32 %v6937_v3, %v6979_v19  ;;  %2859 = vadd.xlane.f32.xlu2 %v2858_v2  ;;  %v1684_v53 = vcvt.s32.f32 %v1677_v12  ;;  %v6986_v2 = vld [vmem:[#allocation53_spill] sm:$0xff] }
 0x1df   :  { %v1966_v63 = vadd.s32 %v1965_v39, %v1956_v14  ;;  %v486_v4 = vand.u32 8388607, %v479_v49  ;;  %v499_v40 = vshll.u32 %v6937_v3, %v6980_v16  ;;  %v500_v34 = vshrl.u32 %v6938_v52, %v6979_v19 }
 0x1e0   :  { %v1682_v22 = vand.u32 2147483647, %v1681_v10  ;;  %v502_v31 = vshll.u32 %v6938_v52, %v6980_v16  ;;  %v503_v57 = vshrl.u32 %v6900_v35, %v6979_v19  ;;  %vm5301_vm10 = vcmp.le.f32.partialorder %v1564_v29, 0.7853982 }
 0x1e1   :  { %v1970_v13 = vadd.s32 1, %v1966_v63  ;;  %v487_v41 = vor.u32 8388608, %v486_v4  ;;  %v496_v43 = vshll.u32 %v6936_v21, %v6980_v16  ;;  %v1967_v56 = vmul.u32 %v5175_v44, %v1913_v5 }
 0x1e2   :  { %v1685_v61 = vmul.f32 %v1684_v53, %v1682_v22  ;;  %v5308_v30 = vor.u32 %v500_v34, %v499_v40  ;;  %v504_v17 = vor.u32 %v503_v57, %v502_v31  ;;  %v1691_v54 = vsel %vm5301_vm10, 0, %v1689_v20 }
 0x1e3   :  { %v1971_v29 = vsel %vm1969_vm13, %v1970_v13, %v1966_v63  ;;  %v498_v62 = vor.u32 %v497_v33, %v496_v43  ;;  %vm513_vm12 = vcmp.lt.s32.totalorder %v6983_v36, 3  ;;  %vm511_vm0 = vcmp.lt.s32.totalorder %v6983_v36, 1 }
 0x1e4   :  { %v1686_v46 = vxor.u32 2147483648, %v1685_v61  ;;  %v1972_v1 = vadd.s32 %v1971_v29, %v1967_v56  ;;  %v525_v44 = vsel %vm513_vm12, %v6985_v51, %v6984_v0  ;;  %v5323_v24 = vor.u32 %v5208_v18, %v5066_v8 }
 0x1e5   :  { %v5326_v12 = vshrl.u32 %v5188_v59, 5  ;;  %v523_v15 = vsel %vm511_vm0, %v5308_v30, %v504_v17  ;;  %v5331_v20 = vshll.u32 %v487_v41, 8  ;;  %v1708_v14 = vadd.s32 3, %v1691_v54 }
 0x1e6   :  { %v1687_v5 = vsel %vm1566_vm4, %v1686_v46, %v1685_v61  ;;  %v1973_v39 = vadd.s32 536870912, %v1972_v1  ;;  %vm512_vm6 = vcmp.lt.s32.totalorder %v6983_v36, 2  ;;  %v519_v18 = vsel %vm511_vm0, %v498_v62, %v5308_v30 }
 0x1e7   :  { %v5339_v8 = vsel %vm5301_vm10, %v6963_v60, %v1687_v5  ;;  %v521_v10 = vsel %vm513_vm12, %v504_v17, %v6986_v2  ;;  %v526_v33 = vsel %vm512_vm6, %v523_v15, %v525_v44  ;;  %v2525_v40 = vor.u32 %v5222_v32, %v5179_v37 }
 0x1e8   :  { %v1692_v53 = vmul.f32 %v5339_v8, %v5339_v8  ;;  %v1974_v63 = vshrl.u32 %v1973_v39, 30  ;;  %v530_v4 = vand.u32 65535, %v526_v33  ;;  %v531_v16 = vshrl.u32 %v526_v33, 16 }
 0x1e9   :  { %v495_v22 = vshrl.u32 %v6936_v21, %v6979_v19  ;;  %v528_v34 = vand.u32 65535, %v5331_v20  ;;  %v529_v31 = vshrl.u32 %v5331_v20, 16  ;;  %v522_v41 = vsel %vm512_vm6, %v519_v18, %v521_v10 }
 0x1ea   :  { %v1693_v57 = vmul.f32 -0.001358992, %v1692_v53  ;;  %v1700_v48 = vmul.f32 -0.00019511016, %v1692_v53  ;;  %v1975_v13 = vshll.u32 %v1974_v63, 30  ;;  %v5359_v43 = vand.u32 3, %v1708_v14 }
 0x1eb   :  { %v515_v61 = vsel %vm511_vm0, %v495_v22, %v498_v62  ;;  %v5363_v56 = vmul.u32 %v531_v16, %v528_v34  ;;  %v5365_v54 = vmul.u32 %v530_v4, %v529_v31  ;;  %vm1876_vm8 = vcmp.lt.s32.totalorder %v6967_v26, 0 }
 0x1ec   :  { %v1694_v19 = vadd.f32 0.041655596, %v1693_v57  ;;  %v1701_v29 = vadd.f32 0.008332121, %v1700_v48  ;;  %v5368_v46 = vsub.s32 %v1972_v1, %v1975_v13  ;;  %v516_v0 = vsel %vm514_vm5, %v504_v17, 2102212464 }
 0x1ed   :  { %v532_v51 = vmul.u32 %v530_v4, %v528_v34  ;;  %v536_v44 = vshll.u32 %v5363_v56, 16  ;;  %v552_v15 = vand.u32 65535, %v522_v41  ;;  %v553_v5 = vshrl.u32 %v522_v41, 16 }
 0x1ee   :  { %v1695_v14 = vmul.f32 %v1694_v19, %v1692_v53  ;;  %v1702_v62 = vmul.f32 %v1701_v29, %v1692_v53  ;;  %vm1977_vm14 = vcmp.lt.s32.totalorder %v5368_v46, 0  ;;  %v1978_v39 = vsub.s32 0, %v5368_v46 }
 0x1ef   :  { %v535_v18 = vmul.u32 %v531_v16, %v529_v31  ;;  %v538_v2 = vshll.u32 %v5365_v54, 16  ;;  %vm540_vm11 = vc.u32 %v532_v51, %v536_v44  ;;  %v542_v1 = vadd.s32 %v536_v44, %v532_v51 }
 0x1f0   :  { %v1696_v10 = vadd.f32 -0.4999988, %v1695_v14  ;;  %v1703_v33 = vadd.f32 -0.16666654, %v1702_v62  ;;  %v1979_v17 = vsel %vm1977_vm14, %v1978_v39, %v5368_v46  ;;  %v541_v4 = vsel %vm540_vm11, 1, %v6949_v23 }
 0x1f1   :  { %vm1711_vm5 = vcmp.eq.s32.totalorder %v5359_v43, 0  ;;  %v1980_v22 = vclz %v1979_v17  ;;  %v1998_v57 = vsub.s32 4, %v1974_v63  ;;  %v517_v48 = vsel %vm513_vm12, %v5308_v30, %v516_v0 }
 0x1f2   :  { %vm544_vm4 = vc.u32 %v542_v1, %v538_v2  ;;  %v1697_v16 = vmul.f32 %v1696_v10, %v1692_v53  ;;  %v1704_v13 = vmul.f32 %v1703_v33, %v1692_v53  ;;  %vm1710_vm7 = vcmp.lt.s32.totalorder %v5359_v43, 2 }
 0x1f3   :  { %v543_v41 = vadd.s32 %v541_v4, %v535_v18  ;;  %v555_v19 = vmul.u32 %v553_v5, %v528_v34  ;;  %vm1707_vm9 = vweird.f32 %v6963_v60  ;;  %vm1714_vm3 = vcmp.eq.s32.totalorder %v5359_v43, 2 }
 0x1f4   :  { %v1968_v29 = vadd.s32 %v5275_v55, %v5262_v50  ;;  %v3636_v51 = vadd.s32 4294967294, %v1980_v22  ;;  %v545_v44 = vsel %vm544_vm4, 1, %v6949_v23  ;;  %v1698_v14 = vadd.f32 1.0, %v1697_v16 }
 0x1f5   :  { %v1705_v62 = vadd.f32 1.0, %v1704_v13  ;;  %v5390_v30 = vsel %vm512_vm6, %v515_v61, %v517_v48  ;;  %v556_v53 = vmul.u32 %v552_v15, %v529_v31  ;;  %vm5394_vm13 = vcmp.le.f32.partialorder %v1874_v9, 0.7853982 }
 0x1f6   :  { %vm3637_vm10 = vcmp.lt.s32.totalorder %v3636_v51, 0  ;;  %v1999_v50 = vsel %vm1876_vm8, %v1998_v57, %v1974_v63  ;;  %v554_v55 = vmul.u32 %v552_v15, %v528_v34  ;;  %v558_v39 = vshll.u32 %v555_v19, 16 }
 0x1f7   :  { %v1706_v18 = vmul.f32 %v1705_v62, %v5339_v8  ;;  %v1715_v2 = vxor.u32 2147483648, %v1698_v14  ;;  %v1983_v1 = vsel %vm3637_vm10, 0, %v3636_v51  ;;  %v547_v36 = vadd.s32 %v545_v44, %v543_v41  ;;  %v6989_v51 = vld [vmem:[#allocation43_spill] sm:$0xff] }
 0x1f8   :  { %v1984_v61 = vsub.s32 32, %v1983_v1  ;;  %v1988_v10 = vsub.s32 4294967266, %v1983_v1  ;;  %v537_v33 = vshrl.u32 %v5363_v56, 16  ;;  %v557_v17 = vmul.u32 %v553_v5, %v529_v31 }
 0x1f9   :  { %v1712_v9 = vxor.u32 2147483648, %v1706_v18  ;;  %v1985_v4 = vshll.u32 %v5368_v46, %v1983_v1  ;;  %v560_v22 = vshll.u32 %v556_v53, 16  ;;  %vm562_vm12 = vc.u32 %v554_v55, %v558_v39 }
 0x1fa   :  { %vm2529_vm0 = vcmp.lt.s32.totalorder %v4945_v6, 4  ;;  %v1986_v63 = vshrl.u32 %v1968_v29, %v1984_v61  ;;  %v1989_v34 = vadd.s32 127, %v1988_v10  ;;  %v563_v15 = vsel %vm562_vm12, 1, %v6949_v23 }
 0x1fb   :  { %v564_v8 = vadd.s32 %v558_v39, %v554_v55  ;;  %v1713_v57 = vsel %vm1711_vm5, %v1698_v14, %v1712_v9  ;;  %v1716_v48 = vsel %vm1714_vm3, %v1715_v2, %v1706_v18  ;;  %v548_v56 = vadd.s32 %v547_v36, %v537_v33  ;;  %v6990_v33 = vld [vmem:[#allocation66_spill] sm:$0xff] }
 0x1fc   :  { %v565_v31 = vadd.s32 %v563_v15, %v557_v17  ;;  %v1717_v46 = vsel %vm1710_vm7, %v1713_v57, %v1716_v48  ;;  %v1987_v5 = vor.u32 %v1986_v63, %v1985_v4  ;;  %v1990_v16 = vshll.u32 %v1989_v34, 23  ;;  %v6991_v17 = vld [vmem:[#allocation61_spill] sm:$0xff] }
 0x1fd   :  { %vm566_vm6 = vc.u32 %v564_v8, %v560_v22  ;;  %v1718_v13 = vsel %vm1707_vm9, nan, %v1717_v46  ;;  %v539_v41 = vshrl.u32 %v5365_v54, 16  ;;  %v1409_v44 = vand.u32 2147483647, %v6989_v51 }
 0x1fe   :  { %v567_v29 = vsel %vm566_vm6, 1, %v6949_v23  ;;  %v2813_v14 = vmul.f32 %v4708_v45, %v1718_v13  ;;  %v1991_v62 = vor.u32 4788187, %v1990_v16  ;;  %v559_v55 = vshrl.u32 %v555_v19, 16 }
 0x1ff   :  { %v569_v39 = vadd.s32 %v567_v29, %v565_v31  ;;  %v2001_v43 = vsel %vm5394_vm13, 0, %v1999_v50  ;;  %v5419_v18 = vadd.s32 %v548_v56, %v539_v41  ;;  %v561_v2 = vshrl.u32 %v556_v53, 16 }
 0x200   :  { %v568_v1 = vadd.s32 %v564_v8, %v560_v22  ;;  %v2846_v60 = vsel %vm2821_vm2, %v2813_v14, 0.0  ;;  %v1992_v36 = vand.u32 2147483647, %v1991_v62  ;;  %v1994_v54 = vcvt.s32.f32 %v1987_v5  ;;  %v6993_v62 = vld [vmem:[#allocation80_spill] sm:$0xff] }
 0x201   :  { %v570_v61 = vadd.s32 %v569_v39, %v559_v55  ;;  %2847 = vadd.xlane.f32.xlu1 %v2846_v60  ;;  %v1416_v10 = vand.u32 8388607, %v1409_v44  ;;  %v1427_v19 = vshrl.u32 %v6937_v3, %v6990_v33  ;;  %v1429_v9 = vshll.u32 %v6937_v3, %v6991_v17  ;;  %v6994_v55 = vld [vmem:[#allocation72_spill] sm:$0xff] }
 0x202   :  { %v1430_v50 = vshrl.u32 %v6938_v52, %v6990_v33  ;;  %v1995_v53 = vmul.f32 %v1994_v54, %v1992_v36  ;;  %v1432_v22 = vshll.u32 %v6938_v52, %v6991_v17  ;;  %v1433_v63 = vshrl.u32 %v6900_v35, %v6990_v33 }
 0x203   :  { %v571_v4 = vadd.s32 %v570_v61, %v561_v2  ;;  %v5435_v34 = vand.u32 31, %v5188_v59  ;;  %v2018_v15 = vadd.s32 3, %v2001_v43  ;;  %vm574_vm14 = vc.u32 %v5419_v18, %v568_v1 }
 0x204   :  { %v1426_v8 = vshll.u32 %v6936_v21, %v6991_v17  ;;  %v1996_v57 = vxor.u32 2147483648, %v1995_v53  ;;  %v1431_v56 = vor.u32 %v1430_v50, %v1429_v9  ;;  %v1434_v31 = vor.u32 %v1433_v63, %v1432_v22  ;;  %v6998_v22 = vld [vmem:[#allocation76_spill] sm:$0xff] }
 0x205   :  { %v575_v48 = vadd.s32 1, %v571_v4  ;;  %v5443_v46 = vsel %vm2529_vm0, %v5323_v24, 920167782  ;;  %v5450_v59 = vsel %vm2529_vm0, %v2525_v40, 1326507024  ;;  %v5453_v5 = vadd.s32 1, %v5211_v58 }
 0x206   :  { %v572_v16 = vmul.u32 %v5331_v20, %v5390_v30  ;;  %vm481_vm11 = vcmp.lt.s32.totalorder %v6978_v11, 0  ;;  %v1997_v13 = vsel %vm1876_vm8, %v1996_v57, %v1995_v53  ;;  %v1417_v29 = vor.u32 8388608, %v1416_v10  ;;  %v6992_v40 = vld [vmem:[#allocation71_spill] sm:$0xff] }
 0x207   :  { %v576_v41 = vsel %vm574_vm14, %v575_v48, %v571_v4  ;;  %v1428_v14 = vor.u32 %v1427_v19, %v1426_v8  ;;  %v5463_v37 = vsel %vm5394_vm13, %v6967_v26, %v1997_v13  ;;  %vm1441_vm5 = vcmp.lt.s32.totalorder %v6992_v40, 1  ;;  %v6997_v19 = vld [vmem:[#allocation86_spill] sm:$0xff] }
 0x208   :  { %v577_v32 = vadd.s32 %v576_v41, %v572_v16  ;;  %vm1443_vm4 = vcmp.lt.s32.totalorder %v6992_v40, 3  ;;  %v2002_v58 = vmul.f32 %v5463_v37, %v5463_v37  ;;  %v5469_v20 = vand.u32 3, %v2018_v15 }
 0x209   :  { %v1453_v30 = vsel %vm1441_vm5, %v1431_v56, %v1434_v31  ;;  %v1455_v0 = vsel %vm1443_vm4, %v6994_v55, %v6993_v62  ;;  %vm5479_vm8 = vcmp.le.f32.partialorder %v479_v49, 0.7853982  ;;  %v1425_v2 = vshrl.u32 %v6936_v21, %v6990_v33 }
 0x20a   :  { %v578_v43 = vadd.s32 536870912, %v577_v32  ;;  %vm1442_vm7 = vcmp.lt.s32.totalorder %v6992_v40, 2  ;;  %v1446_v60 = vsel %vm1444_vm1, %v1434_v31, 2102212464  ;;  %v2003_v36 = vmul.f32 -0.001358992, %v2002_v58 }
 0x20b   :  { %v2010_v54 = vmul.f32 -0.00019511016, %v2002_v58  ;;  %v1456_v61 = vsel %vm1442_vm7, %v1453_v30, %v1455_v0  ;;  %v5490_v10 = vshll.u32 %v1417_v29, 8  ;;  %v2494_v17 = vand.u32 2147483647, %v6997_v19 }
 0x20c   :  { %v579_v49 = vshrl.u32 %v578_v43, 30  ;;  %v1445_v9 = vsel %vm1441_vm5, %v1425_v2, %v1428_v14  ;;  %v1449_v33 = vsel %vm1441_vm5, %v1428_v14, %v1431_v56  ;;  %v2004_v50 = vadd.f32 0.041655596, %v2003_v36 }
 0x20d   :  { %v2011_v53 = vadd.f32 0.008332121, %v2010_v54  ;;  %v1447_v4 = vsel %vm1443_vm4, %v1431_v56, %v1446_v60  ;;  %v1451_v63 = vsel %vm1443_vm4, %v1434_v31, %v6998_v22  ;;  %v2501_v57 = vand.u32 8388607, %v2494_v17 }
 0x20e   :  { %v580_v15 = vshll.u32 %v579_v49, 30  ;;  %v603_v8 = vsub.s32 4, %v579_v49  ;;  %v1461_v48 = vshrl.u32 %v1456_v61, 16  ;;  %v2005_v16 = vmul.f32 %v2004_v50, %v2002_v58 }
 0x20f   :  { %v2012_v13 = vmul.f32 %v2011_v53, %v2002_v58  ;;  %v573_v41 = vadd.s32 %v568_v1, %v5419_v18  ;;  %v5506_v29 = vand.u32 65535, %v5490_v10  ;;  %v2502_v30 = vor.u32 8388608, %v2501_v57 }
 0x210   :  { %v5508_v14 = vsub.s32 %v577_v32, %v580_v15  ;;  %v604_v56 = vsel %vm481_vm11, %v603_v8, %v579_v49  ;;  %v1460_v31 = vand.u32 65535, %v1456_v61  ;;  %v2006_v62 = vadd.f32 -0.4999988, %v2005_v16 }
 0x211   :  { %v2013_v55 = vadd.f32 -0.16666654, %v2012_v13  ;;  %vm2024_vm1 = vcmp.eq.s32.totalorder %v5469_v20, 2  ;;  %v5515_v0 = vsel %vm1442_vm7, %v1445_v9, %v1447_v4  ;;  %v5519_v18 = vsel %vm1442_vm7, %v1449_v33, %v1451_v63 }
 0x212   :  { %vm2021_vm9 = vcmp.eq.s32.totalorder %v5469_v20, 0  ;;  %vm582_vm3 = vcmp.lt.s32.totalorder %v5508_v14, 0  ;;  %v583_v1 = vsub.s32 0, %v5508_v14  ;;  %v5525_v32 = vshrl.u32 %v5490_v10, 16 }
 0x213   :  { %v5528_v43 = vmul.u32 %v1461_v48, %v5506_v29  ;;  %v2007_v2 = vmul.f32 %v2006_v62, %v2002_v58  ;;  %v2014_v60 = vmul.f32 %v2013_v55, %v2002_v58  ;;  %vm2020_vm13 = vcmp.lt.s32.totalorder %v5469_v20, 2 }
 0x214   :  { %v606_v40 = vsel %vm5479_vm8, 0, %v604_v56  ;;  %v5533_v36 = vshll.u32 %v2502_v30, 8  ;;  %vm2017_vm10 = vweird.f32 %v6967_v26  ;;  %v584_v54 = vsel %vm582_vm3, %v583_v1, %v5508_v14 }
 0x215   :  { %v5538_v61 = vmul.u32 %v1460_v31, %v5506_v29  ;;  %v5541_v49 = vmul.u32 %v1460_v31, %v5525_v32  ;;  %v1482_v9 = vand.u32 65535, %v5519_v18  ;;  %v2008_v58 = vadd.f32 1.0, %v2007_v2 }
 0x216   :  { %v2015_v33 = vadd.f32 1.0, %v2014_v60  ;;  %v585_v50 = vclz %v584_v54  ;;  %v2511_v53 = vshll.u32 %v6936_v21, %v4948_v38  ;;  %v5546_v4 = vadd.s32 3, %v606_v40 }
 0x217   :  { %v2512_v22 = vshrl.u32 %v6937_v3, %v5060_v42  ;;  %v5551_v63 = vmul.u32 %v1461_v48, %v5525_v32  ;;  %v1466_v15 = vshll.u32 %v5528_v43, 16  ;;  %v2025_v57 = vxor.u32 2147483648, %v2008_v58 }
 0x218   :  { %v2016_v8 = vmul.f32 %v2015_v33, %v5463_v37  ;;  %v3609_v16 = vadd.s32 4294967294, %v585_v50  ;;  %v2544_v13 = vshrl.u32 %v5533_v36, 16  ;;  %v2510_v56 = vshrl.u32 %v6936_v21, %v5060_v42 }
 0x219   :  { %v2514_v30 = vshll.u32 %v6937_v3, %v4948_v38  ;;  %v2515_v31 = vshrl.u32 %v6938_v52, %v5060_v42  ;;  %v2517_v48 = vshll.u32 %v6938_v52, %v4948_v38  ;;  %v2513_v55 = vor.u32 %v2512_v22, %v2511_v53 }
 0x21a   :  { %v2022_v62 = vxor.u32 2147483648, %v2016_v8  ;;  %vm3610_vm12 = vcmp.lt.s32.totalorder %v3609_v16, 0  ;;  %v2518_v37 = vshrl.u32 %v6900_v35, %v5060_v42  ;;  %v2026_v1 = vsel %vm2024_vm1, %v2025_v57, %v2016_v8 }
 0x21b   :  { %v588_v2 = vsel %vm3610_vm12, 0, %v3609_v16  ;;  %v2516_v60 = vor.u32 %v2515_v31, %v2514_v30  ;;  %vm2526_vm6 = vcmp.lt.s32.totalorder %v4945_v6, 1  ;;  %vm2527_vm14 = vcmp.lt.s32.totalorder %v4945_v6, 2 }
 0x21c   :  { %v2023_v40 = vsel %vm2021_vm9, %v2008_v58, %v2022_v62  ;;  %v589_v54 = vsub.s32 32, %v588_v2  ;;  %v593_v33 = vsub.s32 4294967266, %v588_v2  ;;  %v590_v50 = vshll.u32 %v5508_v14, %v588_v2 }
 0x21d   :  { %v2027_v38 = vsel %vm2020_vm13, %v2023_v40, %v2026_v1  ;;  %v2519_v42 = vor.u32 %v2518_v37, %v2517_v48  ;;  %vm2528_vm5 = vcmp.lt.s32.totalorder %v4945_v6, 3  ;;  %v2534_v58 = vsel %vm2526_vm6, %v2513_v55, %v2516_v60 }
 0x21e   :  { %v2028_v53 = vsel %vm2017_vm10, nan, %v2027_v38  ;;  %v591_v22 = vshrl.u32 %v573_v41, %v589_v54  ;;  %v594_v8 = vadd.s32 127, %v593_v33  ;;  %v2530_v26 = vsel %vm2526_vm6, %v2510_v56, %v2513_v55 }
 0x21f   :  { %v2815_v57 = vmul.f32 %v4708_v45, %v2028_v53  ;;  %v2531_v16 = vsel %vm2529_vm0, %v2519_v42, 2102212464  ;;  %v2536_v20 = vsel %vm2528_vm5, %v2519_v42, %v5443_v46  ;;  %v2538_v14 = vsel %vm2526_vm6, %v2516_v60, %v2519_v42 }
 0x220   :  { %v592_v30 = vor.u32 %v591_v22, %v590_v50  ;;  %v595_v31 = vshll.u32 %v594_v8, 23  ;;  %v2537_v41 = vsel %vm2527_vm14, %v2534_v58, %v2536_v20  ;;  %v2532_v62 = vsel %vm2528_vm5, %v2516_v60, %v2531_v16 }
 0x221   :  { %v2852_v48 = vsel %vm2821_vm2, %v2815_v57, 0.0  ;;  %v2540_v37 = vsel %vm2528_vm5, %v5323_v24, %v5450_v59  ;;  %v2567_v1 = vand.u32 65535, %v2537_v41  ;;  %v2543_v40 = vand.u32 65535, %v5533_v36 }
 0x222   :  { %2853 = vadd.xlane.f32.xlu0 %v2852_v48  ;;  %v596_v46 = vor.u32 4788187, %v595_v31  ;;  %v2541_v2 = vsel %vm2527_vm14, %v2538_v14, %v2540_v37  ;;  %v2568_v54 = vshrl.u32 %v2537_v41, 16  ;;  %v1468_v38 = vshll.u32 %v5541_v49, 16 }
 0x223   :  { %v2545_v33 = vand.u32 65535, %v2541_v2  ;;  %v2546_v56 = vshrl.u32 %v2541_v2, 16  ;;  %v2571_v55 = vmul.u32 %v2567_v1, %v2544_v13  ;;  %v599_v42 = vcvt.s32.f32 %v592_v30 }
 0x224   :  { %v597_v50 = vand.u32 2147483647, %v596_v46  ;;  %v5599_v60 = vsel %vm2527_vm14, %v2530_v26, %v2532_v62  ;;  %v2570_v24 = vmul.u32 %v2568_v54, %v2543_v40  ;;  %v2569_v22 = vmul.u32 %v2567_v1, %v2543_v40 }
 0x225   :  { %v2548_v59 = vmul.u32 %v2546_v56, %v2543_v40  ;;  %v2549_v53 = vmul.u32 %v2545_v33, %v2544_v13  ;;  %v2572_v8 = vmul.u32 %v2568_v54, %v2544_v13  ;;  %v2547_v57 = vmul.u32 %v2545_v33, %v2543_v40 }
 0x226   :  { %v600_v58 = vmul.f32 %v599_v42, %v597_v50  ;;  %v2550_v16 = vmul.u32 %v2546_v56, %v2544_v13  ;;  %v2573_v20 = vshll.u32 %v2570_v24, 16  ;;  %v2574_v41 = vshrl.u32 %v2570_v24, 16 }
 0x227   :  { %v2551_v14 = vshll.u32 %v2548_v59, 16  ;;  %v2552_v31 = vshrl.u32 %v2548_v59, 16  ;;  %v2575_v48 = vshll.u32 %v2571_v55, 16  ;;  %v2553_v46 = vshll.u32 %v2549_v53, 16 }
 0x228   :  { %v601_v37 = vxor.u32 2147483648, %v600_v58  ;;  %vm2577_vm0 = vc.u32 %v2569_v22, %v2573_v20  ;;  %v2579_v30 = vadd.s32 %v2573_v20, %v2569_v22  ;;  %vm1470_vm7 = vc.u32 %v5538_v61, %v1466_v15 }
 0x229   :  { %vm2555_vm4 = vc.u32 %v2547_v57, %v2551_v14  ;;  %v2557_v6 = vadd.s32 %v2551_v14, %v2547_v57  ;;  %v2578_v26 = vsel %vm2577_vm0, 1, %v6949_v23  ;;  %v2554_v56 = vshrl.u32 %v2549_v53, 16 }
 0x22a   :  { %v602_v13 = vsel %vm481_vm11, %v601_v37, %v600_v58  ;;  %v2556_v62 = vsel %vm2555_vm4, 1, %v6949_v23  ;;  %v2580_v1 = vadd.s32 %v2578_v26, %v2572_v8  ;;  %vm2581_vm1 = vc.u32 %v2579_v30, %v2575_v48 }
 0x22b   :  { %v605_v2 = vsel %vm5479_vm8, %v6978_v11, %v602_v13  ;;  %v2558_v40 = vadd.s32 %v2556_v62, %v2550_v16  ;;  %vm2559_vm9 = vc.u32 %v2557_v6, %v2553_v46  ;;  %v2582_v54 = vsel %vm2581_vm1, 1, %v6949_v23 }
 0x22c   :  { %v607_v33 = vmul.f32 %v605_v2, %v605_v2  ;;  %v2560_v50 = vsel %vm2559_vm9, 1, %v6949_v23  ;;  %v2584_v42 = vadd.s32 %v2582_v54, %v2580_v1  ;;  %v1471_v59 = vsel %vm1470_vm7, 1, %v6949_v23 }
 0x22d   :  { %v2562_v24 = vadd.s32 %v2560_v50, %v2558_v40  ;;  %v1472_v22 = vadd.s32 %v1466_v15, %v5538_v61  ;;  %v1483_v8 = vshrl.u32 %v5519_v18, 16  ;;  %v2576_v57 = vshrl.u32 %v2571_v55, 16 }
 0x22e   :  { %v608_v39 = vmul.f32 -0.001358992, %v607_v33  ;;  %v615_v58 = vmul.f32 -0.00019511016, %v607_v33  ;;  %v2585_v16 = vadd.s32 %v2584_v42, %v2574_v41  ;;  %v1473_v14 = vadd.s32 %v1471_v59, %v5551_v63 }
 0x22f   :  { %v2563_v20 = vadd.s32 %v2562_v24, %v2552_v31  ;;  %vm1474_vm11 = vc.u32 %v1472_v22, %v1468_v38  ;;  %v1485_v53 = vmul.u32 %v1483_v8, %v5506_v29  ;;  %v5623_v61 = vadd.s32 %v2579_v30, %v2575_v48 }
 0x230   :  { %v609_v37 = vadd.f32 0.041655596, %v608_v39  ;;  %v616_v46 = vadd.f32 0.008332121, %v615_v58  ;;  %v2586_v6 = vadd.s32 %v2585_v16, %v2576_v57  ;;  %v1475_v26 = vsel %vm1474_vm11, 1, %v6949_v23  ;;  %v6999_v58 = vld [vmem:[#allocation41_spill] sm:$0xff] }
 0x231   :  { %v5621_v13 = vadd.s32 %v2563_v20, %v2554_v56  ;;  %v1467_v15 = vshrl.u32 %v5528_v43, 16  ;;  %v1486_v55 = vmul.u32 %v1482_v9, %v5525_v32  ;;  %v1488_v41 = vshll.u32 %v1485_v53, 16 }
 0x232   :  { %v610_v31 = vmul.f32 %v609_v37, %v607_v33  ;;  %v617_v63 = vmul.f32 %v616_v46, %v607_v33  ;;  %v2590_v38 = vadd.s32 1, %v2586_v6  ;;  %v2587_v62 = vmul.u32 %v5533_v36, %v5599_v60 }
 0x233   :  { %vm2589_vm8 = vc.u32 %v5621_v13, %v5623_v61  ;;  %v1477_v1 = vadd.s32 %v1475_v26, %v1473_v14  ;;  %v1484_v48 = vmul.u32 %v1482_v9, %v5506_v29  ;;  %v624_v40 = vand.u32 3, %v5546_v4 }
 0x234   :  { %v611_v43 = vadd.f32 -0.4999988, %v610_v31  ;;  %v618_v30 = vadd.f32 -0.16666654, %v617_v63  ;;  %v2591_v54 = vsel %vm2589_vm8, %v2590_v38, %v2586_v6  ;;  %v1487_v50 = vmul.u32 %v1483_v8, %v5525_v32 }
 0x235   :  { %v2592_v56 = vadd.s32 %v2591_v54, %v2587_v62  ;;  %v1490_v42 = vshll.u32 %v1486_v55, 16  ;;  %vm1492_vm3 = vc.u32 %v1484_v48, %v1488_v41  ;;  %v1494_v59 = vadd.s32 %v1488_v41, %v1484_v48  ;;  %v7001_v41 = vld [vmem:[#allocation62_spill] sm:$0xff] }
 0x236   :  { %v612_v24 = vmul.f32 %v611_v43, %v607_v33  ;;  %v619_v36 = vmul.f32 %v618_v30, %v607_v33  ;;  %v1493_v60 = vsel %vm1492_vm3, 1, %v6949_v23  ;;  %vm622_vm13 = vweird.f32 %v6978_v11 }
 0x237   :  { %v2593_v22 = vadd.s32 536870912, %v2592_v56  ;;  %v1469_v29 = vshrl.u32 %v5541_v49, 16  ;;  %v1478_v18 = vadd.s32 %v1477_v1, %v1467_v15  ;;  %v1495_v9 = vadd.s32 %v1493_v60, %v1487_v50 }
 0x238   :  { %v613_v39 = vadd.f32 1.0, %v612_v24  ;;  %v620_v4 = vadd.f32 1.0, %v619_v36  ;;  %vm625_vm10 = vcmp.lt.s32.totalorder %v624_v40, 2  ;;  %vm1496_vm12 = vc.u32 %v1494_v59, %v1490_v42 }
 0x239   :  { %vm626_vm6 = vcmp.eq.s32.totalorder %v624_v40, 0  ;;  %v2594_v32 = vshrl.u32 %v2593_v22, 30  ;;  %v1497_v8 = vsel %vm1496_vm12, 1, %v6949_v23  ;;  %v1719_v33 = vand.u32 2147483647, %v6999_v58 }
 0x23a   :  { %v621_v57 = vmul.f32 %v620_v4, %v605_v2  ;;  %v630_v16 = vxor.u32 2147483648, %v613_v39  ;;  %v1489_v20 = vshrl.u32 %v1485_v53, 16  ;;  %v1499_v14 = vadd.s32 %v1497_v8, %v1495_v9  ;;  %v7000_v53 = vld [vmem:[#allocation60_spill] sm:$0xff] }
 0x23b   :  { %vm629_vm14 = vcmp.eq.s32.totalorder %v624_v40, 2  ;;  %v2595_v37 = vshll.u32 %v2594_v32, 30  ;;  %v5643_v46 = vadd.s32 %v1478_v18, %v1469_v29  ;;  %v1491_v49 = vshrl.u32 %v1486_v55, 16 }
 0x23c   :  { %vm2496_vm5 = vcmp.lt.s32.totalorder %v6997_v19, 0  ;;  %v627_v6 = vxor.u32 2147483648, %v621_v57  ;;  %v5646_v26 = vadd.s32 %v1494_v59, %v1490_v42  ;;  %v1500_v15 = vadd.s32 %v1499_v14, %v1489_v20 }
 0x23d   :  { %v1502_v31 = vmul.u32 %v5490_v10, %v5515_v0  ;;  %v2596_v63 = vsub.s32 %v2592_v56, %v2595_v37  ;;  %v1726_v2 = vand.u32 8388607, %v1719_v33  ;;  %v1736_v38 = vshll.u32 %v6936_v21, %v7000_v53 }
 0x23e   :  { %v1737_v62 = vshrl.u32 %v6937_v3, %v7001_v41  ;;  %v628_v55 = vsel %vm626_vm6, %v613_v39, %v627_v6  ;;  %v631_v1 = vsel %vm629_vm14, %v630_v16, %v621_v57  ;;  %v1501_v48 = vadd.s32 %v1500_v15, %v1491_v49  ;;  %v7002_v16 = vld [vmem:[#allocation65_spill] sm:$0xff]  ;;  %v7003_v49 = vld [vmem:[#allocation74_spill] sm:$0xff] }
 0x23f   :  { %v1739_v43 = vshll.u32 %v6937_v3, %v7000_v53  ;;  %v632_v30 = vsel %vm625_vm10, %v628_v55, %v631_v1  ;;  %vm2597_vm0 = vcmp.lt.s32.totalorder %v2596_v63, 0  ;;  %v2598_v10 = vsub.s32 0, %v2596_v63 }
 0x240   :  { %vm1504_vm4 = vc.u32 %v5643_v46, %v5646_v26  ;;  %v633_v0 = vsel %vm622_vm13, nan, %v632_v30  ;;  %v2618_v54 = vsub.s32 4, %v2594_v32  ;;  %v1505_v56 = vadd.s32 1, %v1501_v48 }
 0x241   :  { %v1740_v50 = vshrl.u32 %v6938_v52, %v7001_v41  ;;  %v2806_v42 = vmul.f32 %v4708_v45, %v633_v0  ;;  %v2599_v24 = vsel %vm2597_vm0, %v2598_v10, %v2596_v63  ;;  %v5667_v36 = vor.u32 %v1737_v62, %v1736_v38 }
 0x242   :  { %v1742_v40 = vshll.u32 %v6938_v52, %v7000_v53  ;;  %v2600_v60 = vclz %v2599_v24  ;;  %v1506_v59 = vsel %vm1504_vm4, %v1505_v56, %v1501_v48  ;;  %v1743_v11 = vshrl.u32 %v6900_v35, %v7001_v41  ;;  %v7006_v48 = vld [vmem:[#allocation75_spill] sm:$0xff] }
 0x243   :  { %v5671_v22 = vor.u32 %v1740_v50, %v1739_v43  ;;  %v5676_v29 = vsub.s32 32, %v5435_v34  ;;  %v5680_v18 = vshll.u32 %v6900_v35, %v5435_v34  ;;  %v3644_v9 = vadd.s32 4294967169, %v5215_v7  ;;  %v7007_v43 = vld [vmem:[#allocation70_spill] sm:$0xff] }
 0x244   :  { %v2825_v39 = vsel %vm2821_vm2, %v2806_v42, 0.0  ;;  %v3648_v4 = vadd.s32 4294967294, %v2600_v60  ;;  %v1507_v8 = vadd.s32 %v1506_v59, %v1502_v31  ;;  %v1744_v57 = vor.u32 %v1743_v11, %v1742_v40 }
 0x245   :  { %2826 = vadd.xlane.f32.xlu2 %v2825_v39  ;;  %vm1751_vm7 = vcmp.lt.s32.totalorder %v7002_v16, 1  ;;  %v2619_v20 = vsel %vm2496_vm5, %v2618_v54, %v2594_v32  ;;  %v1727_v14 = vor.u32 8388608, %v1726_v2  ;;  %vm1752_vm1 = vcmp.lt.s32.totalorder %v7002_v16, 2 }
 0x246   :  { %vm1753_vm9 = vcmp.lt.s32.totalorder %v7002_v16, 3  ;;  %vm3649_vm11 = vcmp.lt.s32.totalorder %v3648_v4, 0  ;;  %v1508_v37 = vadd.s32 536870912, %v1507_v8  ;;  %v1759_v7 = vsel %vm1751_vm7, %v5667_v36, %v5671_v22 }
 0x247   :  { %v1761_v6 = vsel %vm1753_vm9, %v1744_v57, %v7003_v49  ;;  %v5698_v15 = vshll.u32 %v6976_v28, %v5435_v34  ;;  %vm5702_vm8 = vcmp.le.f32.partialorder %v2494_v17, 0.7853982  ;;  %v2588_v31 = vadd.s32 %v5623_v61, %v5621_v13 }
 0x248   :  { %v2603_v2 = vsel %vm3649_vm11, 0, %v3648_v4  ;;  %v5708_v62 = vshrl.u32 %v1508_v37, 30  ;;  %v1763_v55 = vsel %vm1751_vm7, %v5671_v22, %v1744_v57  ;;  %v2621_v1 = vsel %vm5702_vm8, 0, %v2619_v20 }
 0x249   :  { %v2604_v53 = vsub.s32 32, %v2603_v2  ;;  %v2608_v38 = vsub.s32 4294967266, %v2603_v2  ;;  %v1762_v17 = vsel %vm1752_vm1, %v1759_v7, %v1761_v6  ;;  %v1765_v13 = vsel %vm1753_vm9, %v7007_v43, %v7006_v48 }
 0x24a   :  { %v5721_v61 = vshll.u32 %v1727_v14, 8  ;;  %v2605_v30 = vshll.u32 %v2596_v63, %v2603_v2  ;;  %v1510_v54 = vshll.u32 %v5708_v62, 30  ;;  %v5724_v56 = vadd.s32 1, %v3644_v9 }
 0x24b   :  { %v2606_v10 = vshrl.u32 %v2588_v31, %v2604_v53  ;;  %v2609_v0 = vadd.s32 127, %v2608_v38  ;;  %v1766_v50 = vsel %vm1752_vm1, %v1763_v55, %v1765_v13  ;;  %v2638_v59 = vadd.s32 3, %v2621_v1 }
 0x24c   :  { %v1768_v42 = vand.u32 65535, %v5721_v61  ;;  %v1769_v24 = vshrl.u32 %v5721_v61, 16  ;;  %v1511_v11 = vsub.s32 %v1507_v8, %v1510_v54  ;;  %v1735_v63 = vshrl.u32 %v6936_v21, %v7001_v41 }
 0x24d   :  { %v2607_v40 = vor.u32 %v2606_v10, %v2605_v30  ;;  %v2610_v60 = vshll.u32 %v2609_v0, 23  ;;  %v1770_v39 = vand.u32 65535, %v1766_v50  ;;  %v1771_v4 = vshrl.u32 %v1766_v50, 16 }
 0x24e   :  { %v1793_v20 = vshrl.u32 %v1762_v17, 16  ;;  %v5734_v9 = vshrl.u32 %v6976_v28, %v5676_v29  ;;  %vm1512_vm3 = vcmp.lt.s32.totalorder %v1511_v11, 0  ;;  %v1513_v37 = vsub.s32 0, %v1511_v11 }
 0x24f   :  { %v2611_v14 = vor.u32 4788187, %v2610_v60  ;;  %v1503_v7 = vadd.s32 %v5646_v26, %v5643_v46  ;;  %v1773_v49 = vmul.u32 %v1771_v4, %v1768_v42  ;;  %v5738_v6 = vmul.u32 %v1770_v39, %v1769_v24 }
 0x250   :  { %v1792_v8 = vand.u32 65535, %v1762_v17  ;;  %v2614_v2 = vcvt.s32.f32 %v2607_v40  ;;  %v5740_v41 = vand.u32 3, %v2638_v59  ;;  %v1514_v53 = vsel %vm1512_vm3, %v1513_v37, %v1511_v11 }
 0x251   :  { %v2612_v31 = vand.u32 2147483647, %v2611_v14  ;;  %v1515_v38 = vclz %v1514_v53  ;;  %v1755_v55 = vsel %vm1751_vm7, %v1735_v63, %v5667_v36  ;;  %v1776_v1 = vshll.u32 %v1773_v49, 16 }
 0x252   :  { %v5745_v48 = vmul.u32 %v1793_v20, %v1768_v42  ;;  %v1533_v46 = vsub.s32 4, %v5708_v62  ;;  %v1756_v26 = vsel %vm1754_vm15, %v1744_v57, 2102212464  ;;  %v1772_v17 = vmul.u32 %v1770_v39, %v1768_v42 }
 0x253   :  { %v2615_v43 = vmul.f32 %v2614_v2, %v2612_v31  ;;  %v3627_v13 = vadd.s32 4294967294, %v1515_v38  ;;  %v1775_v30 = vmul.u32 %v1771_v4, %v1769_v24  ;;  %v1778_v10 = vshll.u32 %v5738_v6, 16 }
 0x254   :  { %v1794_v0 = vmul.u32 %v1792_v8, %v1768_v42  ;;  %vm1411_vm13 = vcmp.lt.s32.totalorder %v6989_v51, 0  ;;  %vm1780_vm10 = vc.u32 %v1772_v17, %v1776_v1  ;;  %v1782_v36 = vadd.s32 %v1776_v1, %v1772_v17 }
 0x255   :  { %v2616_v54 = vxor.u32 2147483648, %v2615_v43  ;;  %v1796_v50 = vmul.u32 %v1792_v8, %v1769_v24  ;;  %vm3628_vm12 = vcmp.lt.s32.totalorder %v3627_v13, 0  ;;  %v1777_v40 = vshrl.u32 %v1773_v49, 16 }
 0x256   :  { %v1781_v60 = vsel %vm1780_vm10, 1, %v6949_v23  ;;  %v1798_v59 = vshll.u32 %v5745_v48, 16  ;;  %v1518_v63 = vsel %vm3628_vm12, 0, %v3627_v13  ;;  %vm1784_vm15 = vc.u32 %v1782_v36, %v1778_v10 }
 0x257   :  { %v2617_v57 = vsel %vm2496_vm5, %v2616_v54, %v2615_v43  ;;  %v1783_v39 = vadd.s32 %v1781_v60, %v1775_v30  ;;  %v1519_v4 = vsub.s32 32, %v1518_v63  ;;  %v1523_v14 = vsub.s32 4294967266, %v1518_v63 }
 0x258   :  { %v5759_v42 = vsel %vm5702_vm8, %v6997_v19, %v2617_v57  ;;  %v1797_v37 = vmul.u32 %v1793_v20, %v1769_v24  ;;  %vm5765_vm6 = vcmp.le.f32.partialorder %v1409_v44, 0.7853982  ;;  %v1520_v31 = vshll.u32 %v1511_v11, %v1518_v63 }
 0x259   :  { %v2622_v49 = vmul.f32 %v5759_v42, %v5759_v42  ;;  %v1785_v2 = vsel %vm1784_vm15, 1, %v6949_v23  ;;  %v1800_v53 = vshll.u32 %v1796_v50, 16  ;;  %v1521_v38 = vshrl.u32 %v1503_v7, %v1519_v4 }
 0x25a   :  { %v1524_v32 = vadd.s32 127, %v1523_v14  ;;  %v1787_v1 = vadd.s32 %v1785_v2, %v1783_v39  ;;  %vm1802_vm14 = vc.u32 %v1794_v0, %v1798_v59  ;;  %v1804_v20 = vadd.s32 %v1798_v59, %v1794_v0 }
 0x25b   :  { %v2623_v43 = vmul.f32 -0.001358992, %v2622_v49  ;;  %v2630_v17 = vmul.f32 -0.00019511016, %v2622_v49  ;;  %v1803_v24 = vsel %vm1802_vm14, 1, %v6949_v23  ;;  %v1522_v13 = vor.u32 %v1521_v38, %v1520_v31 }
 0x25c   :  { %v1525_v30 = vshll.u32 %v1524_v32, 23  ;;  %v1788_v10 = vadd.s32 %v1787_v1, %v1777_v40  ;;  %v1805_v44 = vadd.s32 %v1803_v24, %v1797_v37  ;;  %v1757_v11 = vsel %vm1753_vm9, %v5671_v22, %v1756_v26  ;;  %v7010_v1 = vld [vmem:[#allocation38_spill] sm:$0xff] }
 0x25d   :  { %v2624_v54 = vadd.f32 0.041655596, %v2623_v43  ;;  %v2631_v36 = vadd.f32 0.008332121, %v2630_v17  ;;  %vm1806_vm5 = vc.u32 %v1804_v20, %v1800_v53  ;;  %v1534_v60 = vsel %vm1411_vm13, %v1533_v46, %v5708_v62  ;;  %v7011_v17 = vld [vmem:[#allocation46_spill] sm:$0xff] }
 0x25e   :  { %v1526_v7 = vor.u32 4788187, %v1525_v30  ;;  %v1779_v57 = vshrl.u32 %v5738_v6, 16  ;;  %v1807_v0 = vsel %vm1806_vm5, 1, %v6949_v23  ;;  %v1799_v40 = vshrl.u32 %v5745_v48, 16  ;;  %v7012_v30 = vld [vmem:[#allocation45_spill] sm:$0xff] }
 0x25f   :  { %v2625_v59 = vmul.f32 %v2624_v54, %v2622_v49  ;;  %v2632_v63 = vmul.f32 %v2631_v36, %v2622_v49  ;;  %v1809_v39 = vadd.s32 %v1807_v0, %v1805_v44  ;;  %v1529_v14 = vcvt.s32.f32 %v1522_v13 }
 0x260   :  { %v1527_v4 = vand.u32 2147483647, %v1526_v7  ;;  %v1758_v22 = vsel %vm1752_vm1, %v1755_v55, %v1757_v11  ;;  %v5782_v26 = vadd.s32 %v1788_v10, %v1779_v57  ;;  %v1801_v2 = vshrl.u32 %v1796_v50, 16 }
 0x261   :  { %v2626_v37 = vadd.f32 -0.4999988, %v2625_v59  ;;  %v2633_v31 = vadd.f32 -0.16666654, %v2632_v63  ;;  %v1810_v62 = vadd.s32 %v1809_v39, %v1799_v40  ;;  %vm2641_vm0 = vcmp.eq.s32.totalorder %v5740_v41, 0 }
 0x262   :  { %v1530_v6 = vmul.f32 %v1529_v14, %v1527_v4  ;;  %v1536_v46 = vsel %vm5765_vm6, 0, %v1534_v60  ;;  %v5787_v38 = vadd.s32 %v1804_v20, %v1800_v53  ;;  %vm2640_vm4 = vcmp.lt.s32.totalorder %v5740_v41, 2 }
 0x263   :  { %v2627_v48 = vmul.f32 %v2626_v37, %v2622_v49  ;;  %v2634_v32 = vmul.f32 %v2633_v31, %v2622_v49  ;;  %v1811_v16 = vadd.s32 %v1810_v62, %v1801_v2  ;;  %v1812_v55 = vmul.u32 %v5721_v61, %v1758_v22  ;;  %v7013_v62 = vld [vmem:[#allocation50_spill] sm:$0xff] }
 0x264   :  { %vm2350_vm7 = vcmp.gt.s32.totalorder %v5724_v56, 0  ;;  %vm2637_vm1 = vweird.f32 %v6997_v19  ;;  %v1531_v50 = vxor.u32 2147483648, %v1530_v6  ;;  %vm1814_vm9 = vc.u32 %v5782_v26, %v5787_v38 }
 0x265   :  { %v789_v43 = vand.u32 2147483647, %v7010_v1  ;;  %v807_v53 = vshrl.u32 %v6937_v3, %v7011_v17  ;;  %v2628_v24 = vadd.f32 1.0, %v2627_v48  ;;  %v2635_v49 = vadd.f32 1.0, %v2634_v32 }
 0x266   :  { %v1815_v20 = vadd.s32 1, %v1811_v16  ;;  %v810_v13 = vshrl.u32 %v6938_v52, %v7011_v17  ;;  %v1532_v61 = vsel %vm1411_vm13, %v1531_v50, %v1530_v6  ;;  %v809_v10 = vshll.u32 %v6937_v3, %v7012_v30 }
 0x267   :  { %v812_v44 = vshll.u32 %v6938_v52, %v7012_v30  ;;  %v813_v54 = vshrl.u32 %v6900_v35, %v7011_v17  ;;  %v2636_v36 = vmul.f32 %v2635_v49, %v5759_v42  ;;  %v2645_v11 = vxor.u32 2147483648, %v2628_v24 }
 0x268   :  { %v1535_v7 = vsel %vm5765_vm6, %v6989_v51, %v1532_v61  ;;  %v1816_v60 = vsel %vm1814_vm9, %v1815_v20, %v1811_v16  ;;  %vm2644_vm11 = vcmp.eq.s32.totalorder %v5740_v41, 2  ;;  %v806_v59 = vshll.u32 %v6936_v21, %v7012_v30  ;;  %v7015_v61 = vld [vmem:[#allocation51_spill] sm:$0xff] }
 0x269   :  { %v1537_v57 = vmul.f32 %v1535_v7, %v1535_v7  ;;  %v1817_v0 = vadd.s32 %v1816_v60, %v1812_v55  ;;  %v2642_v63 = vxor.u32 2147483648, %v2636_v36  ;;  %v796_v40 = vand.u32 8388607, %v789_v43 }
 0x26a   :  { %v5817_v39 = vor.u32 %v810_v13, %v809_v10  ;;  %v5819_v42 = vor.u32 %v813_v54, %v812_v44  ;;  %v1553_v8 = vadd.s32 3, %v1536_v46  ;;  %v2646_v31 = vsel %vm2644_vm11, %v2645_v11, %v2636_v36  ;;  %v7014_v13 = vld [vmem:[#allocation57_spill] sm:$0xff]  ;;  %v7016_v11 = vld [vmem:[#allocation56_spill] sm:$0xff] }
 0x26b   :  { %v1538_v4 = vmul.f32 -0.001358992, %v1537_v57  ;;  %v1545_v14 = vmul.f32 -0.00019511016, %v1537_v57  ;;  %v1818_v22 = vadd.s32 536870912, %v1817_v0  ;;  %v2643_v37 = vsel %vm2641_vm0, %v2628_v24, %v2642_v63 }
 0x26c   :  { %v5823_v2 = vor.u32 %v807_v53, %v806_v59  ;;  %vm821_vm8 = vcmp.lt.s32.totalorder %v7013_v62, 1  ;;  %v2647_v6 = vsel %vm2640_vm4, %v2643_v37, %v2646_v31  ;;  %v797_v46 = vor.u32 8388608, %v796_v40 }
 0x26d   :  { %v1539_v48 = vadd.f32 0.041655596, %v1538_v4  ;;  %v1546_v32 = vadd.f32 0.008332121, %v1545_v14  ;;  %v5828_v16 = vshrl.u32 %v1818_v22, 30  ;;  %v2648_v55 = vsel %vm2637_vm1, nan, %v2647_v6 }
 0x26e   :  { %vm823_vm3 = vcmp.lt.s32.totalorder %v7013_v62, 3  ;;  %v833_v50 = vsel %vm821_vm8, %v5817_v39, %v5819_v42  ;;  %v2819_v53 = vmul.f32 %v4708_v45, %v2648_v55  ;;  %v5842_v20 = vsel %vm2350_vm7, %v5724_v56, 0 }
 0x26f   :  { %v1540_v24 = vmul.f32 %v1539_v48, %v1537_v57  ;;  %v1547_v41 = vmul.f32 %v1546_v32, %v1537_v57  ;;  %v1820_v49 = vshll.u32 %v5828_v16, 30  ;;  %v1554_v19 = vand.u32 3, %v1553_v8 }
 0x270   :  { %vm822_vm13 = vcmp.lt.s32.totalorder %v7013_v62, 2  ;;  %v835_v30 = vsel %vm823_vm3, %v7015_v61, %v7014_v13  ;;  %v2864_v10 = vsel %vm2821_vm2, %v2819_v53, 0.0  ;;  %v829_v56 = vsel %vm821_vm8, %v5823_v2, %v5817_v39 }
 0x271   :  { %v1541_v44 = vadd.f32 -0.4999988, %v1540_v24  ;;  %v1548_v54 = vadd.f32 -0.16666654, %v1547_v41  ;;  %v1821_v36 = vsub.s32 %v1817_v0, %v1820_v49  ;;  %2865 = vadd.xlane.f32.xlu1 %v2864_v10  ;;  %v831_v60 = vsel %vm823_vm3, %v5819_v42, %v7016_v11 }
 0x272   :  { %v836_v59 = vsel %vm822_vm13, %v833_v50, %v835_v30  ;;  %v5860_v63 = vshll.u32 %v797_v46, 8  ;;  %v5864_v14 = vshrl.u32 %v6977_v27, %v5676_v29  ;;  %vm2040_vm12 = vcmp.gt.s32.totalorder %v5453_v5, 0 }
 0x273   :  { %v1542_v40 = vmul.f32 %v1541_v44, %v1537_v57  ;;  %v1549_v4 = vmul.f32 %v1548_v54, %v1537_v57  ;;  %vm1822_vm10 = vcmp.lt.s32.totalorder %v1821_v36, 0  ;;  %v1823_v0 = vsub.s32 0, %v1821_v36 }
 0x274   :  { %v5868_v8 = vand.u32 31, %v5842_v20  ;;  %vm1552_vm15 = vweird.f32 %v6989_v51  ;;  %v840_v22 = vand.u32 65535, %v836_v59  ;;  %v839_v48 = vshrl.u32 %v5860_v63, 16 }
 0x275   :  { %v1543_v37 = vadd.f32 1.0, %v1542_v40  ;;  %v1550_v31 = vadd.f32 1.0, %v1549_v4  ;;  %v1824_v6 = vsel %vm1822_vm10, %v1823_v0, %v1821_v36  ;;  %v832_v32 = vsel %vm822_vm13, %v829_v56, %v831_v60 }
 0x276   :  { %v1825_v57 = vclz %v1824_v6  ;;  %v838_v55 = vand.u32 65535, %v5860_v63  ;;  %v841_v46 = vshrl.u32 %v836_v59, 16  ;;  %vm1555_vm6 = vcmp.lt.s32.totalorder %v1554_v19, 2 }
 0x277   :  { %v1551_v50 = vmul.f32 %v1550_v31, %v1535_v7  ;;  %v1560_v53 = vxor.u32 2147483648, %v1543_v37  ;;  %v5875_v24 = vmul.u32 %v840_v22, %v839_v48  ;;  %vm1556_vm14 = vcmp.eq.s32.totalorder %v1554_v19, 0 }
 0x278   :  { %vm1559_vm5 = vcmp.eq.s32.totalorder %v1554_v19, 2  ;;  %v3633_v41 = vadd.s32 4294967294, %v1825_v57  ;;  %v843_v49 = vmul.u32 %v841_v46, %v838_v55  ;;  %v1813_v61 = vadd.s32 %v5787_v38, %v5782_v26 }
 0x279   :  { %v1557_v13 = vxor.u32 2147483648, %v1551_v50  ;;  %v862_v30 = vand.u32 65535, %v832_v32  ;;  %v863_v10 = vshrl.u32 %v832_v32, 16  ;;  %v842_v44 = vmul.u32 %v840_v22, %v838_v55 }
 0x27a   :  { %vm3634_vm0 = vcmp.lt.s32.totalorder %v3633_v41, 0  ;;  %v845_v54 = vmul.u32 %v841_v46, %v839_v48  ;;  %v846_v56 = vshll.u32 %v843_v49, 16  ;;  %v1561_v7 = vsel %vm1559_vm5, %v1560_v53, %v1551_v50 }
 0x27b   :  { %v1558_v11 = vsel %vm1556_vm14, %v1543_v37, %v1557_v13  ;;  %v1828_v60 = vsel %vm3634_vm0, 0, %v3633_v41  ;;  %v848_v59 = vshll.u32 %v5875_v24, 16  ;;  %v865_v38 = vmul.u32 %v863_v10, %v838_v55 }
 0x27c   :  { %v1562_v40 = vsel %vm1555_vm6, %v1558_v11, %v1561_v7  ;;  %v1829_v4 = vsub.s32 32, %v1828_v60  ;;  %v1830_v0 = vshll.u32 %v1821_v36, %v1828_v60  ;;  %v1833_v31 = vsub.s32 4294967266, %v1828_v60 }
 0x27d   :  { %v1563_v6 = vsel %vm1552_vm15, nan, %v1562_v40  ;;  %vm850_vm4 = vc.u32 %v842_v44, %v846_v56  ;;  %v852_v26 = vadd.s32 %v846_v56, %v842_v44  ;;  %v5888_v19 = vsel %vm2040_vm12, %v5453_v5, 0 }
 0x27e   :  { %v2812_v22 = vmul.f32 %v4708_v45, %v1563_v6  ;;  %v1831_v57 = vshrl.u32 %v1813_v61, %v1829_v4  ;;  %v1834_v32 = vadd.s32 127, %v1833_v31  ;;  %v851_v37 = vsel %vm850_vm4, 1, %v6949_v23 }
 0x27f   :  { %v853_v46 = vadd.s32 %v851_v37, %v845_v54  ;;  %vm854_vm7 = vc.u32 %v852_v26, %v848_v59  ;;  %v866_v36 = vmul.u32 %v862_v30, %v839_v48  ;;  %vm1721_vm1 = vcmp.lt.s32.totalorder %v6999_v58, 0 }
 0x280   :  { %v2843_v51 = vsel %vm2821_vm2, %v2812_v22, 0.0  ;;  %v1832_v50 = vor.u32 %v1831_v57, %v1830_v0  ;;  %v1835_v53 = vshll.u32 %v1834_v32, 23  ;;  %v855_v41 = vsel %vm854_vm7, 1, %v6949_v23 }
 0x281   :  { %v5895_v13 = vor.u32 %v5734_v9, %v5680_v18  ;;  %2844 = vadd.xlane.f32.xlu0 %v2843_v51  ;;  %v857_v61 = vadd.s32 %v855_v41, %v853_v46  ;;  %v864_v44 = vmul.u32 %v862_v30, %v838_v55  ;;  %v868_v5 = vshll.u32 %v865_v38, 16 }
 0x282   :  { %v2680_v54 = vor.u32 %v5864_v14, %v5698_v15  ;;  %v5900_v56 = vsub.s32 32, %v5868_v8  ;;  %v1836_v11 = vor.u32 4788187, %v1835_v53  ;;  %v847_v7 = vshrl.u32 %v843_v49, 16 }
 0x283   :  { %v867_v60 = vmul.u32 %v863_v10, %v839_v48  ;;  %v870_v59 = vshll.u32 %v866_v36, 16  ;;  %vm872_vm9 = vc.u32 %v864_v44, %v868_v5  ;;  %v874_v40 = vadd.s32 %v868_v5, %v864_v44 }
 0x284   :  { %v1837_v4 = vand.u32 2147483647, %v1836_v11  ;;  %v1839_v0 = vcvt.s32.f32 %v1832_v50  ;;  %v858_v18 = vadd.s32 %v857_v61, %v847_v7  ;;  %v873_v9 = vsel %vm872_vm9, 1, %v6949_v23  ;;  %v7020_v7 = vld [vmem:[#allocation40_spill] sm:$0xff] }
 0x285   :  { %v1843_v55 = vsub.s32 4, %v5828_v16  ;;  %vm7017_vm11 = vcmp.lt.s32.totalorder %v7013_v62, 4  ;;  %v875_v31 = vadd.s32 %v873_v9, %v867_v60  ;;  %vm876_vm10 = vc.u32 %v874_v40, %v870_v59 }
 0x286   :  { %v826_v30 = vsel %vm7017_vm11, %v5819_v42, 2102212464  ;;  %vm2684_vm12 = vcmp.lt.s32.totalorder %v5326_v12, 4  ;;  %v1840_v49 = vmul.f32 %v1839_v0, %v1837_v4  ;;  %v805_v48 = vshrl.u32 %v6936_v21, %v7011_v17 }
 0x287   :  { %v849_v10 = vshrl.u32 %v5875_v24, 16  ;;  %v877_v6 = vsel %vm876_vm10, 1, %v6949_v23  ;;  %v5913_v26 = vand.u32 31, %v5888_v19  ;;  %v5916_v22 = vshrl.u32 %v5842_v20, 5 }
 0x288   :  { %v869_v57 = vshrl.u32 %v865_v38, 16  ;;  %v879_v42 = vadd.s32 %v877_v6, %v875_v31  ;;  %v1841_v32 = vxor.u32 2147483648, %v1840_v49  ;;  %v825_v37 = vsel %vm821_vm8, %v805_v48, %v5823_v2  ;;  %v7022_v31 = vld [vmem:[#allocation52_spill] sm:$0xff] }
 0x289   :  { %v827_v17 = vsel %vm823_vm3, %v5817_v39, %v826_v30  ;;  %v5924_v24 = vadd.s32 %v858_v18, %v849_v10  ;;  %v2365_v46 = vshll.u32 %v6900_v35, %v5868_v8  ;;  %v1844_v20 = vsel %vm1721_vm1, %v1843_v55, %v5828_v16 }
 0x28a   :  { %v871_v38 = vshrl.u32 %v866_v36, 16  ;;  %v880_v51 = vadd.s32 %v879_v42, %v869_v57  ;;  %v2366_v50 = vshrl.u32 %v6976_v28, %v5900_v56  ;;  %vm5935_vm8 = vcmp.le.f32.partialorder %v1719_v33, 0.7853982 }
 0x28b   :  { %v1842_v39 = vsel %vm1721_vm1, %v1841_v32, %v1840_v49  ;;  %v5941_v53 = vadd.s32 %v874_v40, %v870_v59  ;;  %v2368_v41 = vshll.u32 %v6976_v28, %v5868_v8  ;;  %v828_v36 = vsel %vm822_vm13, %v825_v37, %v827_v17  ;;  %v7021_v59 = vld [vmem:[#allocation55_spill] sm:$0xff] }
 0x28c   :  { %v1845_v16 = vsel %vm5935_vm8, %v6999_v58, %v1842_v39  ;;  %v881_v61 = vadd.s32 %v880_v51, %v871_v38  ;;  %v2369_v33 = vshrl.u32 %v6977_v27, %v5900_v56  ;;  %v1846_v44 = vsel %vm5935_vm8, 0, %v1844_v20  ;;  %v7023_v39 = vld [vmem:[#allocation58_spill] sm:$0xff] }
 0x28d   :  { %v1847_v5 = vmul.f32 %v1845_v16, %v1845_v16  ;;  %vm884_vm3 = vc.u32 %v5924_v24, %v5941_v53  ;;  %v6845_v60 = vand.u32 2147483647, %v7020_v7  ;;  %v1120_v40 = vshrl.u32 %v6938_v52, %v7021_v59 }
 0x28e   :  { %v885_v11 = vadd.s32 1, %v881_v61  ;;  %v1123_v62 = vshrl.u32 %v6900_v35, %v7021_v59  ;;  %v5961_v4 = vor.u32 %v2366_v50, %v2365_v46  ;;  %v882_v9 = vmul.u32 %v5860_v63, %v828_v36 }
 0x28f   :  { %v1848_v0 = vmul.f32 -0.001358992, %v1847_v5  ;;  %v1855_v18 = vmul.f32 -0.00019511016, %v1847_v5  ;;  %v1863_v55 = vadd.s32 3, %v1846_v44  ;;  %v1119_v49 = vshll.u32 %v6937_v3, %v7022_v31  ;;  %v7025_v44 = vld [vmem:[#allocation63_spill] sm:$0xff] }
 0x290   :  { %v886_v30 = vsel %vm884_vm3, %v885_v11, %v881_v61  ;;  %v1122_v48 = vshll.u32 %v6938_v52, %v7022_v31  ;;  %vm2374_vm13 = vcmp.lt.s32.totalorder %v5916_v22, 4  ;;  %v5972_v42 = vsel %vm2684_vm12, %v5895_v13, 920167782 }
 0x291   :  { %v1849_v10 = vadd.f32 0.041655596, %v1848_v0  ;;  %v1856_v6 = vadd.f32 0.008332121, %v1855_v18  ;;  %v887_v57 = vadd.s32 %v886_v30, %v882_v9  ;;  %v1106_v63 = vand.u32 8388607, %v6845_v60 }
 0x292   :  { %v5976_v32 = vor.u32 %v1120_v40, %v1119_v49  ;;  %v1124_v37 = vor.u32 %v1123_v62, %v1122_v48  ;;  %v2370_v17 = vor.u32 %v2369_v33, %v2368_v41  ;;  %v5983_v51 = vsel %vm2684_vm12, %v2680_v54, 1326507024  ;;  %v7024_v54 = vld [vmem:[#allocation68_spill] sm:$0xff] }
 0x293   :  { %v1850_v46 = vmul.f32 %v1849_v10, %v1847_v5  ;;  %v1857_v20 = vmul.f32 %v1856_v6, %v1847_v5  ;;  %v888_v38 = vadd.s32 536870912, %v887_v57  ;;  %v5988_v50 = vsel %vm2374_vm13, %v5961_v4, 920167782 }
 0x294   :  { %v1864_v2 = vand.u32 3, %v1863_v55  ;;  %vm1131_vm15 = vcmp.lt.s32.totalorder %v7023_v39, 1  ;;  %vm1133_vm6 = vcmp.lt.s32.totalorder %v7023_v39, 3  ;;  %v1107_v33 = vor.u32 8388608, %v1106_v63 }
 0x295   :  { %v1851_v36 = vadd.f32 -0.4999988, %v1850_v46  ;;  %v1858_v41 = vadd.f32 -0.16666654, %v1857_v20  ;;  %v889_v61 = vshrl.u32 %v888_v38, 30  ;;  %v1117_v15 = vshrl.u32 %v6937_v3, %v7021_v59  ;;  %v7027_v46 = vld [vmem:[#allocation90_spill] sm:$0xff] }
 0x296   :  { %v1143_v14 = vsel %vm1131_vm15, %v5976_v32, %v1124_v37  ;;  %v1145_v11 = vsel %vm1133_vm6, %v7025_v44, %v7024_v54  ;;  %v6003_v40 = vsel %vm2374_vm13, %v2370_v17, 1326507024  ;;  %vm791_vm14 = vcmp.lt.s32.totalorder %v7010_v1, 0 }
 0x297   :  { %v1852_v62 = vmul.f32 %v1851_v36, %v1847_v5  ;;  %v1859_v0 = vmul.f32 %v1858_v41, %v1847_v5  ;;  %v890_v18 = vshll.u32 %v889_v61, 30  ;;  %vm1862_vm5 = vweird.f32 %v6999_v58 }
 0x298   :  { %vm1865_vm0 = vcmp.lt.s32.totalorder %v1864_v2, 2  ;;  %v1116_v9 = vshll.u32 %v6936_v21, %v7022_v31  ;;  %vm1132_vm4 = vcmp.lt.s32.totalorder %v7023_v39, 2  ;;  %vm1866_vm7 = vcmp.eq.s32.totalorder %v1864_v2, 0 }
 0x299   :  { %v1853_v55 = vadd.f32 1.0, %v1852_v62  ;;  %v1860_v30 = vadd.f32 1.0, %v1859_v0  ;;  %v891_v49 = vsub.s32 %v887_v57, %v890_v18  ;;  %v6012_v48 = vsel %vm1132_vm4, %v1143_v14, %v1145_v11  ;;  %v7031_v11 = vld [vmem:[#allocation67_spill] sm:$0xff] }
 0x29a   :  { %vm1869_vm1 = vcmp.eq.s32.totalorder %v1864_v2, 2  ;;  %v6014_v5 = vor.u32 %v1117_v15, %v1116_v9  ;;  %v6016_v10 = vshll.u32 %v1107_v33, 8  ;;  %v883_v31 = vadd.s32 %v5941_v53, %v5924_v24 }
 0x29b   :  { %v1861_v6 = vmul.f32 %v1860_v30, %v1845_v16  ;;  %v1870_v63 = vxor.u32 2147483648, %v1853_v55  ;;  %vm892_vm9 = vcmp.lt.s32.totalorder %v891_v49, 0  ;;  %v893_v17 = vsub.s32 0, %v891_v49 }
 0x29c   :  { %7026 = vst [vmem:[#allocation79_spill] sm:$0xff] %v6016_v10  ;;  %v6846_v20 = vand.u32 2147483647, %v7027_v46  ;;  %v6023_v57 = vshrl.u32 %v6936_v21, %v7021_v59  ;;  %v1150_v38 = vand.u32 65535, %v6012_v48  ;;  %v913_v15 = vsub.s32 4, %v889_v61 }
 0x29d   :  { %v1867_v36 = vxor.u32 2147483648, %v1861_v6  ;;  %v894_v41 = vsel %vm892_vm9, %v893_v17, %v891_v49  ;;  %vm7028_vm11 = vcmp.lt.s32.totalorder %v7023_v39, 4  ;;  %v6036_v24 = vsel %vm1131_vm15, %v6014_v5, %v5976_v32 }
 0x29e   :  { %v6028_v16 = vsel %vm7028_vm11, %v1124_v37, 2102212464  ;;  %v895_v33 = vclz %v894_v41  ;;  %v2656_v14 = vand.u32 8388607, %v6846_v20  ;;  %v6039_v53 = vand.u32 65535, %v6016_v10 }
 0x29f   :  { %v1868_v59 = vsel %vm1866_vm7, %v1853_v55, %v1867_v36  ;;  %v1871_v54 = vsel %vm1869_vm1, %v1870_v63, %v1861_v6  ;;  %vm6045_vm10 = vcmp.le.f32.partialorder %v789_v43, 0.7853982  ;;  %v6052_v62 = vsel %vm1133_vm6, %v1124_v37, %v7031_v11 }
 0x2a0   :  { %v6055_v0 = vshrl.u32 %v6016_v10, 16  ;;  %v1872_v18 = vsel %vm1865_vm0, %v1868_v59, %v1871_v54  ;;  %v3615_v9 = vadd.s32 4294967294, %v895_v33  ;;  %v6847_v55 = vshrl.u32 %v6012_v48, 16 }
 0x2a1   :  { %v6060_v30 = vmul.u32 %v1150_v38, %v6039_v53  ;;  %v1873_v43 = vsel %vm1862_vm5, nan, %v1872_v18  ;;  %v914_v6 = vsel %vm791_vm14, %v913_v15, %v889_v61  ;;  %v2657_v63 = vor.u32 8388608, %v2656_v14 }
 0x2a2   :  { %v2672_v37 = vshll.u32 %v6938_v52, %v5435_v34  ;;  %v2814_v17 = vmul.f32 %v4708_v45, %v1873_v43  ;;  %vm3616_vm8 = vcmp.lt.s32.totalorder %v3615_v9, 0  ;;  %v2666_v2 = vshll.u32 %v6936_v21, %v5435_v34 }
 0x2a3   :  { %v2667_v36 = vshrl.u32 %v6937_v3, %v5676_v29  ;;  %v898_v41 = vsel %vm3616_vm8, 0, %v3615_v9  ;;  %v2669_v58 = vshll.u32 %v6937_v3, %v5435_v34  ;;  %v2670_v61 = vshrl.u32 %v6938_v52, %v5676_v29 }
 0x2a4   :  { %v2673_v15 = vshrl.u32 %v6900_v35, %v5676_v29  ;;  %v2849_v33 = vsel %vm2821_vm2, %v2814_v17, 0.0  ;;  %v899_v14 = vsub.s32 32, %v898_v41  ;;  %v900_v59 = vshll.u32 %v891_v49, %v898_v41 }
 0x2a5   :  { %v903_v54 = vsub.s32 4294967266, %v898_v41  ;;  %2850 = vadd.xlane.f32.xlu2 %v2849_v33  ;;  %v2665_v11 = vshrl.u32 %v6936_v21, %v5676_v29  ;;  %v2668_v18 = vor.u32 %v2667_v36, %v2666_v2  ;;  %v2671_v9 = vor.u32 %v2670_v61, %v2669_v58 }
 0x2a6   :  { %v2674_v43 = vor.u32 %v2673_v15, %v2672_v37  ;;  %v901_v60 = vshrl.u32 %v883_v31, %v899_v14  ;;  %vm2681_vm3 = vcmp.lt.s32.totalorder %v5326_v12, 1  ;;  %vm2682_vm5 = vcmp.lt.s32.totalorder %v5326_v12, 2 }
 0x2a7   :  { %v904_v34 = vadd.s32 127, %v903_v54  ;;  %vm2683_vm0 = vcmp.lt.s32.totalorder %v5326_v12, 3  ;;  %v2689_v49 = vsel %vm2681_vm3, %v2668_v18, %v2671_v9  ;;  %v6090_v41 = vmul.u32 %v6847_v55, %v6039_v53 }
 0x2a8   :  { %v2686_v17 = vsel %vm2684_vm12, %v2674_v43, 2102212464  ;;  %v902_v29 = vor.u32 %v901_v60, %v900_v59  ;;  %v916_v31 = vsel %vm6045_vm10, 0, %v914_v6  ;;  %v2691_v37 = vsel %vm2683_vm0, %v2674_v43, %v5972_v42 }
 0x2a9   :  { %v905_v2 = vshll.u32 %v904_v34, 23  ;;  %v2685_v36 = vsel %vm2681_vm3, %v2665_v11, %v2668_v18  ;;  %v2692_v58 = vsel %vm2682_vm5, %v2689_v49, %v2691_v37  ;;  %v2693_v61 = vsel %vm2681_vm3, %v2671_v9, %v2674_v43 }
 0x2aa   :  { %v2695_v15 = vsel %vm2683_vm0, %v5895_v13, %v5983_v51  ;;  %v2687_v14 = vsel %vm2683_vm0, %v2671_v9, %v2686_v17  ;;  %v6101_v60 = vshll.u32 %v2657_v63, 8  ;;  %v2723_v6 = vshrl.u32 %v2692_v58, 16 }
 0x2ab   :  { %v906_v33 = vor.u32 4788187, %v905_v2  ;;  %v2696_v54 = vsel %vm2682_vm5, %v2693_v61, %v2695_v15  ;;  %v6104_v42 = vmul.u32 %v1150_v38, %v6055_v0  ;;  %v909_v18 = vcvt.s32.f32 %v902_v29 }
 0x2ac   :  { %v2700_v59 = vand.u32 65535, %v2696_v54  ;;  %v2701_v34 = vshrl.u32 %v2696_v54, 16  ;;  %v2698_v43 = vand.u32 65535, %v6101_v60  ;;  %v2699_v49 = vshrl.u32 %v6101_v60, 16 }
 0x2ad   :  { %v907_v11 = vand.u32 2147483647, %v906_v33  ;;  %v6108_v13 = vadd.s32 3, %v916_v31  ;;  %v6112_v51 = vsel %vm2682_vm5, %v2685_v36, %v2687_v14  ;;  %v2722_v63 = vand.u32 65535, %v2692_v58 }
 0x2ae   :  { %v2703_v2 = vmul.u32 %v2701_v34, %v2698_v43  ;;  %v2704_v37 = vmul.u32 %v2700_v59, %v2699_v49  ;;  %v2725_v61 = vmul.u32 %v2723_v6, %v2698_v43  ;;  %v2356_v29 = vshll.u32 %v6936_v21, %v5868_v8 }
 0x2af   :  { %v910_v17 = vmul.f32 %v909_v18, %v907_v11  ;;  %v2357_v31 = vshrl.u32 %v6937_v3, %v5900_v56  ;;  %v2359_v12 = vshll.u32 %v6937_v3, %v5868_v8  ;;  %v2702_v15 = vmul.u32 %v2700_v59, %v2698_v43 }
 0x2b0   :  { %v2705_v58 = vmul.u32 %v2701_v34, %v2699_v49  ;;  %v2706_v33 = vshll.u32 %v2703_v2, 16  ;;  %v2707_v14 = vshrl.u32 %v2703_v2, 16  ;;  %v2724_v54 = vmul.u32 %v2722_v63, %v2698_v43 }
 0x2b1   :  { %v911_v36 = vxor.u32 2147483648, %v910_v17  ;;  %v2726_v11 = vmul.u32 %v2722_v63, %v2699_v49  ;;  %v2728_v18 = vshll.u32 %v2725_v61, 16  ;;  %v2708_v55 = vshll.u32 %v2704_v37, 16 }
 0x2b2   :  { %vm2710_vm12 = vc.u32 %v2702_v15, %v2706_v33  ;;  %v2712_v9 = vadd.s32 %v2706_v33, %v2702_v15  ;;  %v2727_v47 = vmul.u32 %v2723_v6, %v2699_v49  ;;  %v2709_v33 = vshrl.u32 %v2704_v37, 16 }
 0x2b3   :  { %v912_v20 = vsel %vm791_vm14, %v911_v36, %v910_v17  ;;  %v2711_v3 = vsel %vm2710_vm12, 1, %v6949_v23  ;;  %vm2732_vm7 = vc.u32 %v2724_v54, %v2728_v18  ;;  %v2730_v2 = vshll.u32 %v2726_v11, 16 }
 0x2b4   :  { %v915_v38 = vsel %vm6045_vm10, %v7010_v1, %v912_v20  ;;  %v2713_v34 = vadd.s32 %v2711_v3, %v2705_v58  ;;  %vm2714_vm1 = vc.u32 %v2712_v9, %v2708_v55  ;;  %v2733_v43 = vsel %vm2732_vm7, 1, %v6949_v23 }
 0x2b5   :  { %v917_v59 = vmul.f32 %v915_v38, %v915_v38  ;;  %v2715_v63 = vsel %vm2714_vm1, 1, %v6949_v23  ;;  %v2734_v17 = vadd.s32 %v2728_v18, %v2724_v54  ;;  %v2735_v36 = vadd.s32 %v2733_v43, %v2727_v47 }
 0x2b6   :  { %v2717_v10 = vadd.s32 %v2715_v63, %v2713_v34  ;;  %v2729_v44 = vshrl.u32 %v2725_v61, 16  ;;  %v2731_v20 = vshrl.u32 %v2726_v11, 16  ;;  %v7032_v6 = vand.u32 2147483647, %v4856_v25 }
 0x2b7   :  { %v918_v7 = vmul.f32 -0.001358992, %v917_v59  ;;  %v925_v15 = vmul.f32 -0.00019511016, %v917_v59  ;;  %vm2736_vm14 = vc.u32 %v2734_v17, %v2730_v2  ;;  %v6133_v28 = vor.u32 %v2357_v31, %v2356_v29 }
 0x2b8   :  { %v2346_v49 = vand.u32 8388607, %v7032_v6  ;;  %v2718_v55 = vadd.s32 %v2717_v10, %v2707_v14  ;;  %v2737_v9 = vsel %vm2736_vm14, 1, %v6949_v23  ;;  %v2360_v47 = vshrl.u32 %v6938_v52, %v5900_v56 }
 0x2b9   :  { %v919_v27 = vadd.f32 0.041655596, %v918_v7  ;;  %v926_v3 = vadd.f32 0.008332121, %v925_v15  ;;  %v2739_v58 = vadd.s32 %v2737_v9, %v2735_v36  ;;  %v2362_v37 = vshll.u32 %v6938_v52, %v5868_v8 }
 0x2ba   :  { %v6139_v11 = vadd.s32 %v2718_v55, %v2709_v33  ;;  %v2363_v7 = vshrl.u32 %v6900_v35, %v5900_v56  ;;  %v6143_v18 = vadd.s32 %v2734_v17, %v2730_v2  ;;  %v6145_v14 = vor.u32 %v2360_v47, %v2359_v12 }
 0x2bb   :  { %v920_v61 = vmul.f32 %v919_v27, %v917_v59  ;;  %v927_v54 = vmul.f32 %v926_v3, %v917_v59  ;;  %v2740_v10 = vadd.s32 %v2739_v58, %v2729_v44  ;;  %vm2371_vm9 = vcmp.lt.s32.totalorder %v5916_v22, 1 }
 0x2bc   :  { %v2347_v34 = vor.u32 8388608, %v2346_v49  ;;  %vm2372_vm11 = vcmp.lt.s32.totalorder %v5916_v22, 2  ;;  %vm2744_vm10 = vc.u32 %v6139_v11, %v6143_v18  ;;  %v6151_v27 = vor.u32 %v2363_v7, %v2362_v37 }
 0x2bd   :  { %v921_v29 = vadd.f32 -0.4999988, %v920_v61  ;;  %v928_v31 = vadd.f32 -0.16666654, %v927_v54  ;;  %v2741_v8 = vadd.s32 %v2740_v10, %v2731_v20  ;;  %vm2373_vm8 = vcmp.lt.s32.totalorder %v5916_v22, 3 }
 0x2be   :  { %v2379_v12 = vsel %vm2371_vm9, %v6133_v28, %v6145_v14  ;;  %v2385_v2 = vsel %vm2373_vm8, %v5961_v4, %v6003_v40  ;;  %vm932_vm3 = vweird.f32 %v7010_v1  ;;  %v934_v17 = vand.u32 3, %v6108_v13 }
 0x2bf   :  { %v922_v43 = vmul.f32 %v921_v29, %v917_v59  ;;  %v929_v63 = vmul.f32 %v928_v31, %v917_v59  ;;  %v2745_v36 = vadd.s32 1, %v2741_v8  ;;  %v2381_v59 = vsel %vm2373_vm8, %v6151_v27, %v5988_v50 }
 0x2c0   :  { %v2383_v15 = vsel %vm2371_vm9, %v6145_v14, %v6151_v27  ;;  %v7033_v33 = vshll.u32 %v6090_v41, 16  ;;  %v2742_v44 = vmul.u32 %v6101_v60, %v6112_v51  ;;  %v2382_v49 = vsel %vm2372_vm11, %v2379_v12, %v2381_v59 }
 0x2c1   :  { %v923_v40 = vadd.f32 1.0, %v922_v43  ;;  %v930_v13 = vadd.f32 1.0, %v929_v63  ;;  %v2746_v6 = vsel %vm2744_vm10, %v2745_v36, %v2741_v8  ;;  %v2386_v3 = vsel %vm2372_vm11, %v2383_v15, %v2385_v2 }
 0x2c2   :  { %vm6175_vm5 = vc.u32 %v6060_v30, %v7033_v33  ;;  %v7036_v50 = vmov %v7033_v33  ;;  %v6191_v55 = vshll.u32 %v2347_v34, 8  ;;  %v2747_v47 = vadd.s32 %v2746_v6, %v2742_v44 }
 0x2c3   :  { %v1162_v20 = vadd.s32 %v7036_v50, %v6060_v30  ;;  %v931_v9 = vmul.f32 %v930_v13, %v915_v38  ;;  %v940_v58 = vxor.u32 2147483648, %v923_v40  ;;  %v2390_v60 = vand.u32 65535, %v2386_v3 }
 0x2c4   :  { %vm936_vm0 = vcmp.eq.s32.totalorder %v934_v17, 0  ;;  %v2388_v51 = vand.u32 65535, %v6191_v55  ;;  %v2389_v30 = vshrl.u32 %v6191_v55, 16  ;;  %v2391_v37 = vshrl.u32 %v2386_v3, 16 }
 0x2c5   :  { %v937_v61 = vxor.u32 2147483648, %v931_v9  ;;  %vm939_vm12 = vcmp.eq.s32.totalorder %v934_v17, 2  ;;  %v2748_v54 = vadd.s32 536870912, %v2747_v47  ;;  %v2413_v7 = vshrl.u32 %v2382_v49, 16 }
 0x2c6   :  { %v2392_v10 = vmul.u32 %v2390_v60, %v2388_v51  ;;  %v2393_v29 = vmul.u32 %v2391_v37, %v2388_v51  ;;  %v2394_v31 = vmul.u32 %v2390_v60, %v2389_v30  ;;  %v2412_v8 = vand.u32 65535, %v2382_v49 }
 0x2c7   :  { %vm935_vm7 = vcmp.lt.s32.totalorder %v934_v17, 2  ;;  %v938_v34 = vsel %vm936_vm0, %v923_v40, %v937_v61  ;;  %v941_v38 = vsel %vm939_vm12, %v940_v58, %v931_v9  ;;  %v6195_v43 = vshrl.u32 %v2748_v54, 30 }
 0x2c8   :  { %v942_v63 = vsel %vm935_vm7, %v938_v34, %v941_v38  ;;  %v2395_v12 = vmul.u32 %v2391_v37, %v2389_v30  ;;  %v2396_v2 = vshll.u32 %v2393_v29, 16  ;;  %v2398_v36 = vshll.u32 %v2394_v31, 16 }
 0x2c9   :  { %v943_v59 = vsel %vm932_vm3, nan, %v942_v63  ;;  %v2750_v15 = vshll.u32 %v6195_v43, 30  ;;  %v2415_v33 = vmul.u32 %v2413_v7, %v2388_v51  ;;  %v1158_v13 = vshll.u32 %v6104_v42, 16 }
 0x2ca   :  { %v2808_v44 = vmul.f32 %v4708_v45, %v943_v59  ;;  %vm2400_vm1 = vc.u32 %v2392_v10, %v2396_v2  ;;  %v2402_v17 = vadd.s32 %v2396_v2, %v2392_v10  ;;  %v2416_v40 = vmul.u32 %v2412_v8, %v2389_v30 }
 0x2cb   :  { %v6202_v50 = vsub.s32 %v2747_v47, %v2750_v15  ;;  %v2401_v6 = vsel %vm2400_vm1, 1, %v6949_v23  ;;  %v1161_v49 = vsel %vm6175_vm5, 1, %v6949_v23  ;;  %vm6208_vm14 = vc.u32 %v1162_v20, %v1158_v13 }
 0x2cc   :  { %v2831_v3 = vsel %vm2821_vm2, %v2808_v44, 0.0  ;;  %v2403_v9 = vadd.s32 %v2401_v6, %v2395_v12  ;;  %vm2404_vm10 = vc.u32 %v2402_v17, %v2398_v36  ;;  %v2414_v58 = vmul.u32 %v2412_v8, %v2388_v51 }
 0x2cd   :  { %2832 = vadd.xlane.f32.xlu1 %v2831_v3  ;;  %vm2752_vm3 = vcmp.lt.s32.totalorder %v6202_v50, 0  ;;  %v2753_v47 = vsub.s32 0, %v6202_v50  ;;  %v2355_v60 = vshrl.u32 %v6936_v21, %v5900_v56  ;;  %v2405_v4 = vsel %vm2404_vm10, 1, %v6949_v23 }
 0x2ce   :  { %v2407_v37 = vadd.s32 %v2405_v4, %v2403_v9  ;;  %v2417_v20 = vmul.u32 %v2413_v7, %v2389_v30  ;;  %v2418_v61 = vshll.u32 %v2415_v33, 16  ;;  %v2420_v54 = vshll.u32 %v2416_v40, 16 }
 0x2cf   :  { %v2754_v10 = vsel %vm2752_vm3, %v2753_v47, %v6202_v50  ;;  %v2397_v34 = vshrl.u32 %v2393_v29, 16  ;;  %v1142_v51 = vsel %vm1132_vm4, %v6036_v24, %v6052_v62  ;;  %v7039_v8 = vshrl.u32 %v6012_v48, 16 }
 0x2d0   :  { %v2755_v63 = vclz %v2754_v10  ;;  %v2376_v56 = vsel %vm2374_vm13, %v6151_v27, 2102212464  ;;  %vm2422_vm5 = vc.u32 %v2414_v58, %v2418_v61  ;;  %v2424_v30 = vadd.s32 %v2418_v61, %v2414_v58 }
 0x2d1   :  { %v1155_v38 = vmul.u32 %v7039_v8, %v6055_v0  ;;  %v2408_v7 = vadd.s32 %v2407_v37, %v2397_v34  ;;  %v2423_v12 = vsel %vm2422_vm5, 1, %v6949_v23  ;;  %v1165_v2 = vsel %vm6208_vm14, 1, %v6949_v23 }
 0x2d2   :  { %v3651_v24 = vadd.s32 4294967294, %v2755_v63  ;;  %v2375_v48 = vsel %vm2371_vm9, %v2355_v60, %v6133_v28  ;;  %v2425_v62 = vadd.s32 %v2423_v12, %v2417_v20  ;;  %vm2426_vm0 = vc.u32 %v2424_v30, %v2420_v54 }
 0x2d3   :  { %v1163_v29 = vadd.s32 %v1161_v49, %v1155_v38  ;;  %v2377_v27 = vsel %vm2373_vm8, %v6145_v14, %v2376_v56  ;;  %v2399_v36 = vshrl.u32 %v2394_v31, 16  ;;  %v2419_v59 = vshrl.u32 %v2415_v33, 16 }
 0x2d4   :  { %v2427_v15 = vsel %vm2426_vm0, 1, %v6949_v23  ;;  %vm3652_vm13 = vcmp.lt.s32.totalorder %v3651_v24, 0  ;;  %v1172_v44 = vand.u32 65535, %v1142_v51  ;;  %v1173_v17 = vshrl.u32 %v1142_v51, 16 }
 0x2d5   :  { %v2429_v13 = vadd.s32 %v2427_v15, %v2425_v62  ;;  %v2743_v6 = vadd.s32 %v6143_v18, %v6139_v11  ;;  %v2758_v49 = vsel %vm3652_vm13, 0, %v3651_v24  ;;  %v6242_v1 = vadd.s32 %v2408_v7, %v2399_v36 }
 0x2d6   :  { %v1167_v28 = vadd.s32 %v1165_v2, %v1163_v29  ;;  %v2759_v3 = vsub.s32 32, %v2758_v49  ;;  %v2763_v9 = vsub.s32 4294967266, %v2758_v49  ;;  %v2421_v58 = vshrl.u32 %v2416_v40, 16 }
 0x2d7   :  { %v2430_v47 = vadd.s32 %v2429_v13, %v2419_v59  ;;  %v2378_v14 = vsel %vm2372_vm11, %v2375_v48, %v2377_v27  ;;  %v6246_v31 = vadd.s32 %v2424_v30, %v2420_v54  ;;  %v1175_v33 = vmul.u32 %v1173_v17, %v6039_v53 }
 0x2d8   :  { %v1176_v60 = vmul.u32 %v1172_v44, %v6055_v0  ;;  %vm2651_vm9 = vcmp.lt.s32.totalorder %v7027_v46, 0  ;;  %v2760_v11 = vshll.u32 %v6202_v50, %v2758_v49  ;;  %v2761_v18 = vshrl.u32 %v2743_v6, %v2759_v3 }
 0x2d9   :  { %v2764_v4 = vadd.s32 127, %v2763_v9  ;;  %v2431_v37 = vadd.s32 %v2430_v47, %v2421_v58  ;;  %vm2434_vm8 = vc.u32 %v6242_v1, %v6246_v31  ;;  %v1157_v40 = vshrl.u32 %v6090_v41, 16 }
 0x2da   :  { %v1174_v22 = vmul.u32 %v1172_v44, %v6039_v53  ;;  %v1178_v20 = vshll.u32 %v1175_v33, 16  ;;  %v2762_v61 = vor.u32 %v2761_v18, %v2760_v11  ;;  %v2432_v10 = vmul.u32 %v6191_v55, %v2378_v14 }
 0x2db   :  { %v2765_v54 = vshll.u32 %v2764_v4, 23  ;;  %v2435_v34 = vadd.s32 1, %v2431_v37  ;;  %v1177_v51 = vmul.u32 %v1173_v17, %v6055_v0  ;;  %v1180_v8 = vshll.u32 %v1176_v60, 16 }
 0x2dc   :  { %vm1182_vm11 = vc.u32 %v1174_v22, %v1178_v20  ;;  %v1184_v50 = vadd.s32 %v1178_v20, %v1174_v22  ;;  %v1168_v56 = vadd.s32 %v1167_v28, %v1157_v40  ;;  %v2773_v41 = vsub.s32 4, %v6195_v43 }
 0x2dd   :  { %v2766_v38 = vor.u32 4788187, %v2765_v54  ;;  %v2436_v63 = vsel %vm2434_vm8, %v2435_v34, %v2431_v37  ;;  %v1183_v30 = vsel %vm1182_vm11, 1, %v6949_v23  ;;  %v2769_v29 = vcvt.s32.f32 %v2762_v61  ;;  %v7045_v37 = vld [vmem:[#allocation79_spill] sm:$0xff] }
 0x2de   :  { %v2437_v7 = vadd.s32 %v2436_v63, %v2432_v10  ;;  %v1185_v53 = vadd.s32 %v1183_v30, %v1177_v51  ;;  %vm1186_vm12 = vc.u32 %v1184_v50, %v1180_v8  ;;  %v1159_v55 = vshrl.u32 %v6104_v42, 16 }
 0x2df   :  { %v2767_v12 = vand.u32 2147483647, %v2766_v38  ;;  %v1187_v2 = vsel %vm1186_vm12, 1, %v6949_v23  ;;  %v6263_v0 = vsub.s32 32, %v5913_v26  ;;  %v1179_v48 = vshrl.u32 %v1175_v33, 16 }
 0x2e0   :  { %v2438_v24 = vadd.s32 536870912, %v2437_v7  ;;  %v1189_v62 = vadd.s32 %v1187_v2, %v1185_v53  ;;  %v1135_v36 = vsel %vm1131_vm15, %v6023_v57, %v6014_v5  ;;  %v1137_v59 = vsel %vm1133_vm6, %v5976_v32, %v6028_v16 }
 0x2e1   :  { %v2770_v27 = vmul.f32 %v2769_v29, %v2767_v12  ;;  %v6273_v42 = vadd.s32 %v1168_v56, %v1159_v55  ;;  %v2774_v15 = vsel %vm2651_vm9, %v2773_v41, %v6195_v43  ;;  %v1181_v44 = vshrl.u32 %v1176_v60, 16 }
 0x2e2   :  { %v2439_v13 = vshrl.u32 %v2438_v24, 30  ;;  %v1190_v17 = vadd.s32 %v1189_v62, %v1179_v48  ;;  %v6279_v6 = vshrl.u32 %v5888_v19, 5  ;;  %v6281_v28 = vadd.s32 %v1184_v50, %v1180_v8 }
 0x2e3   :  { %v2771_v49 = vxor.u32 2147483648, %v2770_v27  ;;  %v7040_v5 = vand.u32 2147483647, %v7027_v46  ;;  %v1138_v16 = vsel %vm1132_vm4, %v1135_v36, %v1137_v59  ;;  %v2055_v3 = vshll.u32 %v6900_v35, %v5913_v26 }
 0x2e4   :  { %v2440_v32 = vshll.u32 %v2439_v13, 30  ;;  %v1191_v43 = vadd.s32 %v1190_v17, %v1181_v44  ;;  %vm1194_vm6 = vc.u32 %v6273_v42, %v6281_v28  ;;  %v7043_v58 = vmov 920167782  }
 0x2e5   :  { %vm6285_vm15 = vcmp.le.f32.partialorder %v7040_v5, 0.7853982  ;;  %v2772_v19 = vsel %vm2651_vm9, %v2771_v49, %v2770_v27  ;;  %v2056_v47 = vshrl.u32 %v7043_v58, %v6263_v0  ;;  %v2058_v60 = vshll.u32 %v7043_v58, %v5913_v26  ;;  %v7049_v58 = vld [vmem:[#allocation40_spill] sm:$0xff] }
 0x2e6   :  { %v2776_v9 = vsel %vm6285_vm15, 0, %v2774_v15  ;;  %v2775_v39 = vsel %vm6285_vm15, %v7027_v46, %v2772_v19  ;;  %v2441_v14 = vsub.s32 %v2437_v7, %v2440_v32  ;;  %v1195_v33 = vadd.s32 1, %v1191_v43 }
 0x2e7   :  { %v7044_v11 = vmov 1326507024   ;;  %v2777_v4 = vmul.f32 %v2775_v39, %v2775_v39  ;;  %v1192_v40 = vmul.u32 %v7045_v37, %v1138_v16  ;;  %v2793_v22 = vadd.s32 3, %v2776_v9 }
 0x2e8   :  { %v2059_v18 = vshrl.u32 %v7044_v11, %v6263_v0  ;;  %vm2442_vm4 = vcmp.lt.s32.totalorder %v2441_v14, 0  ;;  %v2443_v20 = vsub.s32 0, %v2441_v14  ;;  %v1196_v61 = vsel %vm1194_vm6, %v1195_v33, %v1191_v43 }
 0x2e9   :  { %v2778_v54 = vmul.f32 -0.001358992, %v2777_v4  ;;  %v2785_v10 = vmul.f32 -0.00019511016, %v2777_v4  ;;  %v1197_v34 = vadd.s32 %v1196_v61, %v1192_v40  ;;  %v6309_v51 = vor.u32 %v2056_v47, %v2055_v3 }
 0x2ea   :  { %vm2064_vm7 = vcmp.lt.s32.totalorder %v6279_v6, 4  ;;  %v2444_v8 = vsel %vm2442_vm4, %v2443_v20, %v2441_v14  ;;  %v2060_v30 = vor.u32 %v2059_v18, %v2058_v60  ;;  %v2794_v41 = vand.u32 3, %v2793_v22  ;;  %v7050_v60 = vld [vmem:[#allocation92_spill] sm:$0xff] }
 0x2eb   :  { %v2779_v50 = vadd.f32 0.041655596, %v2778_v54  ;;  %v2786_v38 = vadd.f32 0.008332121, %v2785_v10  ;;  %v2445_v63 = vclz %v2444_v8  ;;  %v1198_v56 = vadd.s32 536870912, %v1197_v34 }
 0x2ec   :  { %v6317_v55 = vsel %vm2064_vm7, %v6309_v51, 920167782  ;;  %v2463_v2 = vsub.s32 4, %v2439_v13  ;;  %v6322_v27 = vsel %vm2064_vm7, %v2060_v30, 1326507024  ;;  %vm2341_vm14 = vcmp.lt.s32.totalorder %v4856_v25, 0 }
 0x2ed   :  { %v2780_v7 = vmul.f32 %v2779_v50, %v2777_v4  ;;  %v2787_v53 = vmul.f32 %v2786_v38, %v2777_v4  ;;  %v3645_v12 = vadd.s32 4294967294, %v2445_v63  ;;  %v6312_v29 = vshrl.u32 %v1198_v56, 30 }
 0x2ee   :  { %v7046_v36 = vand.u32 2147483647, %v4856_v25  ;;  %vm2795_vm3 = vcmp.lt.s32.totalorder %v2794_v41, 2  ;;  %v2433_v49 = vadd.s32 %v6246_v31, %v6242_v1  ;;  %vm2792_vm5 = vweird.f32 %v7027_v46 }
 0x2ef   :  { %v2781_v24 = vadd.f32 -0.4999988, %v2780_v7  ;;  %v2788_v48 = vadd.f32 -0.16666654, %v2787_v53  ;;  %vm3646_vm1 = vcmp.lt.s32.totalorder %v3645_v12, 0  ;;  %v1200_v62 = vshll.u32 %v6312_v29, 30 }
 0x2f0   :  { %vm6327_vm10 = vcmp.le.f32.partialorder %v7046_v36, 0.7853982  ;;  %v2448_v15 = vsel %vm3646_vm1, 0, %v3645_v12  ;;  %vm2796_vm0 = vcmp.eq.s32.totalorder %v2794_v41, 0  ;;  %v2464_v32 = vsel %vm2341_vm14, %v2463_v2, %v2439_v13 }
 0x2f1   :  { %v2782_v44 = vmul.f32 %v2781_v24, %v2777_v4  ;;  %v2789_v17 = vmul.f32 %v2788_v48, %v2777_v4  ;;  %v2449_v5 = vsub.s32 32, %v2448_v15  ;;  %v2453_v57 = vsub.s32 4294967266, %v2448_v15 }
 0x2f2   :  { %v1201_v16 = vsub.s32 %v1197_v34, %v1200_v62  ;;  %v2450_v19 = vshll.u32 %v2441_v14, %v2448_v15  ;;  %vm1101_vm13 = vcmp.lt.s32.totalorder %v7049_v58, 0  ;;  %v2029_v1 = vand.u32 2147483647, %v7050_v60 }
 0x2f3   :  { %v2783_v43 = vadd.f32 1.0, %v2782_v44  ;;  %v2790_v3 = vadd.f32 1.0, %v2789_v17  ;;  %v2451_v9 = vshrl.u32 %v2433_v49, %v2449_v5  ;;  %v2454_v47 = vadd.s32 127, %v2453_v57 }
 0x2f4   :  { %vm1202_vm9 = vcmp.lt.s32.totalorder %v1201_v16, 0  ;;  %v1203_v33 = vsub.s32 0, %v1201_v16  ;;  %vm2799_vm8 = vcmp.eq.s32.totalorder %v2794_v41, 2  ;;  %v2466_v13 = vsel %vm6327_vm10, 0, %v2464_v32 }
 0x2f5   :  { %v2791_v31 = vmul.f32 %v2790_v3, %v2775_v39  ;;  %v2800_v11 = vxor.u32 2147483648, %v2783_v43  ;;  %v2452_v18 = vor.u32 %v2451_v9, %v2450_v19  ;;  %v2455_v4 = vshll.u32 %v2454_v47, 23 }
 0x2f6   :  { %v1193_v37 = vadd.s32 %v6281_v28, %v6273_v42  ;;  %v1204_v14 = vsel %vm1202_vm9, %v1203_v33, %v1201_v16  ;;  %v1223_v20 = vsub.s32 4, %v6312_v29  ;;  %v2046_v61 = vshll.u32 %v6936_v21, %v5913_v26 }
 0x2f7   :  { %v2797_v40 = vxor.u32 2147483648, %v2791_v31  ;;  %v1205_v22 = vclz %v1204_v14  ;;  %v2801_v54 = vsel %vm2799_vm8, %v2800_v11, %v2791_v31  ;;  %v2456_v39 = vor.u32 4788187, %v2455_v4 }
 0x2f8   :  { %v2459_v10 = vcvt.s32.f32 %v2452_v18  ;;  %v2036_v34 = vand.u32 8388607, %v2029_v1  ;;  %v7051_v38 = vmov 2475754826   ;;  %v2050_v30 = vshrl.u32 %v6938_v52, %v6263_v0 }
 0x2f9   :  { %v2798_v8 = vsel %vm2796_vm0, %v2783_v43, %v2797_v40  ;;  %v3621_v50 = vadd.s32 4294967294, %v1205_v22  ;;  %v2047_v42 = vshrl.u32 %v7051_v38, %v6263_v0  ;;  %v2049_v28 = vshll.u32 %v7051_v38, %v5913_v26 }
 0x2fa   :  { %v2802_v63 = vsel %vm2795_vm3, %v2798_v8, %v2801_v54  ;;  %v2457_v56 = vand.u32 2147483647, %v2456_v39  ;;  %v2052_v7 = vshll.u32 %v6938_v52, %v5913_v26  ;;  %v2053_v2 = vshrl.u32 %v6900_v35, %v6263_v0 }
 0x2fb   :  { %v2803_v53 = vsel %vm2792_vm5, nan, %v2802_v63  ;;  %vm3622_vm11 = vcmp.lt.s32.totalorder %v3621_v50, 0  ;;  %v6359_v12 = vor.u32 %v2047_v42, %v2046_v61  ;;  %v6364_v62 = vor.u32 %v2050_v30, %v2049_v28 }
 0x2fc   :  { %v2820_v24 = vmul.f32 %v4708_v45, %v2803_v53  ;;  %v2460_v41 = vmul.f32 %v2459_v10, %v2457_v56  ;;  %v1208_v48 = vsel %vm3622_vm11, 0, %v3621_v50  ;;  %v2483_v36 = vadd.s32 3, %v2466_v13  ;;  %v7055_v56 = vld [vmem:[#allocation18_spill] sm:$0xff] }
 0x2fd   :  { %v1209_v15 = vsub.s32 32, %v1208_v48  ;;  %v1213_v44 = vsub.s32 4294967266, %v1208_v48  ;;  %v1224_v52 = vsel %vm1101_vm13, %v1223_v20, %v6312_v29  ;;  %v6370_v17 = vor.u32 %v2053_v2, %v2052_v7 }
 0x2fe   :  { %v2867_v26 = vsel %vm2821_vm2, %v2820_v24, 0.0  ;;  %v2461_v46 = vxor.u32 2147483648, %v2460_v41  ;;  %vm2061_vm12 = vcmp.lt.s32.totalorder %v6279_v6, 1  ;;  %v1210_v35 = vshll.u32 %v1201_v16, %v1208_v48 }
 0x2ff   :  { %2868 = vadd.xlane.f32.xlu2 %v2867_v26  ;;  %v1211_v49 = vshrl.u32 %v1193_v37, %v1209_v15  ;;  %v1214_v5 = vadd.s32 127, %v1213_v44  ;;  %v2037_v57 = vor.u32 8388608, %v2036_v34  ;;  %vm2062_vm15 = vcmp.lt.s32.totalorder %v6279_v6, 2 }
 0x300   :  { %v2462_v32 = vsel %vm2341_vm14, %v2461_v46, %v2460_v41  ;;  %vm2063_vm6 = vcmp.lt.s32.totalorder %v6279_v6, 3  ;;  %v2069_v29 = vsel %vm2061_vm12, %v6359_v12, %v6364_v62  ;;  %v7052_v16 = vand.u32 2147483647, %v7049_v58 }
 0x301   :  { %v6384_v43 = vsel %vm6327_vm10, %v4856_v25, %v2462_v32  ;;  %v1212_v19 = vor.u32 %v1211_v49, %v1210_v35  ;;  %v1215_v9 = vshll.u32 %v1214_v5, 23  ;;  %v6394_v33 = vand.u32 3, %v2483_v36 }
 0x302   :  { %vm6388_vm4 = vcmp.le.f32.partialorder %v7052_v16, 0.7853982  ;;  %v2467_v47 = vmul.f32 %v6384_v43, %v6384_v43  ;;  %v2071_v59 = vsel %vm2063_vm6, %v6370_v17, %v6317_v55  ;;  %v2073_v31 = vsel %vm2061_vm12, %v6364_v62, %v6370_v17 }
 0x303   :  { %v1216_v11 = vor.u32 4788187, %v1215_v9  ;;  %v1219_v18 = vcvt.s32.f32 %v1212_v19  ;;  %v1226_v4 = vsel %vm6388_vm4, 0, %v1224_v52  ;;  %v2072_v13 = vsel %vm2062_vm15, %v2069_v29, %v2071_v59 }
 0x304   :  { %v2468_v37 = vmul.f32 -0.001358992, %v2467_v47  ;;  %v2475_v14 = vmul.f32 -0.00019511016, %v2467_v47  ;;  %v2075_v55 = vsel %vm2063_vm6, %v6309_v51, %v6322_v27  ;;  %v6412_v40 = vshll.u32 %v2037_v57, 8 }
 0x305   :  { %v1217_v22 = vand.u32 2147483647, %v1216_v11  ;;  %v2076_v20 = vsel %vm2062_vm15, %v2073_v31, %v2075_v55  ;;  %v2102_v61 = vand.u32 65535, %v2072_v13  ;;  %v2103_v54 = vshrl.u32 %v2072_v13, 16  ;;  %v6420_v27 = vld [vmem:[#allocation5 + $0xc] sm:$0x3] }
 0x306   :  { %v2469_v39 = vadd.f32 0.041655596, %v2468_v37  ;;  %v2476_v10 = vadd.f32 0.008332121, %v2475_v14  ;;  %v2078_v34 = vand.u32 65535, %v6412_v40  ;;  %v2079_v8 = vshrl.u32 %v6412_v40, 16 }
 0x307   :  { %v1220_v50 = vmul.f32 %v1219_v18, %v1217_v22  ;;  %v2080_v38 = vand.u32 65535, %v2076_v20  ;;  %v2081_v42 = vshrl.u32 %v2076_v20, 16  ;;  %v6418_v51 = vadd.s32 3, %v1226_v4 }
 0x308   :  { %v2470_v28 = vmul.f32 %v2469_v39, %v2467_v47  ;;  %v2477_v63 = vmul.f32 %v2476_v10, %v2467_v47  ;;  %v6424_v30 = vmul.f32 %v6420_v27, %v7055_v56  ;;  %vm2489_vm1 = vcmp.eq.s32.totalorder %v6394_v33, 2 }
 0x309   :  { %v1221_v7 = vxor.u32 2147483648, %v1220_v50  ;;  %v2082_v53 = vmul.u32 %v2080_v38, %v2078_v34  ;;  %v2083_v2 = vmul.u32 %v2081_v42, %v2078_v34  ;;  %v6426_v24 = vmul.u32 %v2080_v38, %v2079_v8 }
 0x30a   :  { %v2471_v41 = vadd.f32 -0.4999988, %v2470_v28  ;;  %v2478_v48 = vadd.f32 -0.16666654, %v2477_v63  ;;  %v2104_v36 = vmul.u32 %v2102_v61, %v2078_v34  ;;  %v6429_v15 = vmul.u32 %v2103_v54, %v2078_v34 }
 0x30b   :  { %vm2486_vm14 = vcmp.eq.s32.totalorder %v6394_v33, 0  ;;  %v1222_v44 = vsel %vm1101_vm13, %v1221_v7, %v1220_v50  ;;  %v2085_v52 = vmul.u32 %v2081_v42, %v2079_v8  ;;  %v2086_v26 = vshll.u32 %v2083_v2, 16 }
 0x30c   :  { %v2088_v46 = vshll.u32 %v6426_v24, 16  ;;  %v2472_v35 = vmul.f32 %v2471_v41, %v2467_v47  ;;  %v2479_v49 = vmul.f32 %v2478_v48, %v2467_v47  ;;  %vm2485_vm10 = vcmp.lt.s32.totalorder %v6394_v33, 2 }
 0x30d   :  { %v1225_v5 = vsel %vm6388_vm4, %v7049_v58, %v1222_v44  ;;  %v2106_v57 = vmul.u32 %v2102_v61, %v2079_v8  ;;  %vm2482_vm3 = vweird.f32 %v4856_v25  ;;  %v2087_v29 = vshrl.u32 %v2083_v2, 16  ;;  %v7056_v44 = vld [vmem:[#allocation19_spill] sm:$0xff] }
 0x30e   :  { %v1227_v32 = vmul.f32 %v1225_v5, %v1225_v5  ;;  %vm2090_vm5 = vc.u32 %v2082_v53, %v2086_v26  ;;  %v2092_v16 = vadd.s32 %v2086_v26, %v2082_v53  ;;  %v2473_v19 = vadd.f32 1.0, %v2472_v35 }
 0x30f   :  { %v2480_v9 = vadd.f32 1.0, %v2479_v49  ;;  %v2091_v59 = vsel %vm2090_vm5, 1, %v6949_v23  ;;  %v2108_v31 = vshll.u32 %v6429_v15, 16  ;;  %v2107_v37 = vmul.u32 %v2103_v54, %v2079_v8 }
 0x310   :  { %v1228_v47 = vmul.f32 -0.001358992, %v1227_v32  ;;  %v1235_v11 = vmul.f32 -0.00019511016, %v1227_v32  ;;  %v2093_v18 = vadd.s32 %v2091_v59, %v2085_v52  ;;  %vm2094_vm0 = vc.u32 %v2092_v16, %v2088_v46 }
 0x311   :  { %v2481_v3 = vmul.f32 %v2480_v9, %v6384_v43  ;;  %v2490_v4 = vxor.u32 2147483648, %v2473_v19  ;;  %v2095_v13 = vsel %vm2094_vm0, 1, %v6949_v23  ;;  %v2045_v22 = vshrl.u32 %v6936_v21, %v6263_v0 }
 0x312   :  { %v1229_v14 = vadd.f32 0.041655596, %v1228_v47  ;;  %v1236_v55 = vadd.f32 0.008332121, %v1235_v11  ;;  %v2097_v20 = vadd.s32 %v2095_v13, %v2093_v18  ;;  %v2089_v39 = vshrl.u32 %v6426_v24, 16 }
 0x313   :  { %v2487_v61 = vxor.u32 2147483648, %v2481_v3  ;;  %v2110_v10 = vshll.u32 %v2106_v57, 16  ;;  %vm2112_vm13 = vc.u32 %v2104_v36, %v2108_v31  ;;  %v2491_v34 = vsel %vm2489_vm1, %v2490_v4, %v2481_v3 }
 0x314   :  { %v1230_v50 = vmul.f32 %v1229_v14, %v1227_v32  ;;  %v1237_v43 = vmul.f32 %v1236_v55, %v1227_v32  ;;  %v2113_v38 = vsel %vm2112_vm13, 1, %v6949_v23  ;;  %v2098_v8 = vadd.s32 %v2097_v20, %v2087_v29 }
 0x315   :  { %v2488_v54 = vsel %vm2486_vm14, %v2473_v19, %v2487_v61  ;;  %v2114_v42 = vadd.s32 %v2108_v31, %v2104_v36  ;;  %v2115_v28 = vadd.s32 %v2113_v38, %v2107_v37  ;;  %v2066_v7 = vsel %vm2064_vm7, %v6370_v17, 2102212464 }
 0x316   :  { %v2492_v21 = vsel %vm2485_vm10, %v2488_v54, %v2491_v34  ;;  %v1231_v0 = vadd.f32 -0.4999988, %v1230_v50  ;;  %v1238_v63 = vadd.f32 -0.16666654, %v1237_v43  ;;  %v2065_v2 = vsel %vm2061_vm12, %v2045_v22, %v6359_v12  ;;  %v7058_v22 = vld [vmem:[#allocation15_spill] sm:$0xff] }
 0x317   :  { %v2493_v53 = vsel %vm2482_vm3, nan, %v2492_v21  ;;  %v2109_v24 = vshrl.u32 %v6429_v15, 16  ;;  %vm2116_vm9 = vc.u32 %v2114_v42, %v2110_v10  ;;  %v7057_v52 = vperm.slane %v7056_v44, 0 }
 0x318   :  { %v2818_v41 = vmul.f32 %v4708_v45, %v2493_v53  ;;  %v1232_v33 = vmul.f32 %v1231_v0, %v1227_v32  ;;  %v1239_v48 = vmul.f32 %v1238_v63, %v1227_v32  ;;  %v2117_v36 = vsel %vm2116_vm9, 1, %v6949_v23  ;;  %v6483_v53 = vld [vmem:[#allocation5 + $0x6] sm:$0x3] }
 0x319   :  { %2967 = vperm.xlu2 %3686, %v7057_v52   ;;  %v2067_v25 = vsel %vm2063_vm6, %v6364_v62, %v2066_v7  ;;  %v2099_v17 = vadd.s32 %v2098_v8, %v2089_v39  ;;  %v2111_v26 = vshrl.u32 %v2106_v57, 16  ;;  %v2119_v46 = vadd.s32 %v2117_v36, %v2115_v28 }
 0x31a   :  { %v2861_v12 = vsel %vm2821_vm2, %v2818_v41, 0.0  ;;  %v1233_v15 = vadd.f32 1.0, %v1232_v33  ;;  %v1240_v35 = vadd.f32 1.0, %v1239_v48  ;;  %v2118_v49 = vadd.s32 %v2114_v42, %v2110_v10 }
 0x31b   :  { %2862 = vadd.xlane.f32.xlu0 %v2861_v12  ;;  %v1244_v32 = vand.u32 3, %v6418_v51  ;;  %v2120_v29 = vadd.s32 %v2119_v46, %v2109_v24  ;;  %v2068_v9 = vsel %vm2062_vm15, %v2065_v2, %v2067_v25  ;;  %v2969_v62 = vperm.slane %v6424_v30, 0 }
 0x31c   :  { %v1241_v16 = vmul.f32 %v1240_v35, %v1225_v5  ;;  %v1250_v19 = vxor.u32 2147483648, %v1233_v15  ;;  %vm2124_vm7 = vc.u32 %v2099_v17, %v2118_v49  ;;  %v2122_v18 = vmul.u32 %v6412_v40, %v2068_v9 }
 0x31d   :  { %v2121_v59 = vadd.s32 %v2120_v29, %v2111_v26  ;;  %vm1246_vm8 = vcmp.eq.s32.totalorder %v1244_v32, 0  ;;  %vm1249_vm11 = vcmp.eq.s32.totalorder %v1244_v32, 2  ;;  %vm1245_vm12 = vcmp.lt.s32.totalorder %v1244_v32, 2  ;;  %v7062_v26 = vld [vmem:[#allocation17_spill] sm:$0xff] }
 0x31e   :  { %v1247_v31 = vxor.u32 2147483648, %v1241_v16  ;;  %v1251_v11 = vsel %vm1249_vm11, %v1250_v19, %v1241_v16  ;;  %vm1242_vm6 = vweird.f32 %v7049_v58  ;;  %v7059_v40 = vrot.slane %v7058_v22, 4 }
 0x31f   :  { %v2125_v57 = vadd.s32 1, %v2121_v59  ;;  %v2123_v50 = vadd.s32 %v2118_v49, %v2099_v17  ;;  %v3159_v2 = vperm.slane %v6483_v53, 1  ;;  %vm2031_vm1 = vcmp.lt.s32.totalorder %v7050_v60, 0  ;;  %v7070_v53 = vld [vmem:[#allocation27_spill] sm:$0xff] }
 0x320   :  { %v1248_v47 = vsel %vm1246_vm8, %v1233_v15, %v1247_v31  ;;  %vm6491_vm14 = vcmp.le.f32.partialorder %v2029_v1, 0.7853982  ;;  %vm2172_vm0 = vweird.f32 %v7050_v60  ;;  %vm3348_vm13 = vcmask 1041409  }
 0x321   :  { %2980 = vperm.xlu2 %3686, %v2969_v62   ;;  %v1252_v6 = vsel %vm1245_vm12, %v1248_v47, %v1251_v11  ;;  %v2126_v51 = vsel %vm2124_vm7, %v2125_v57, %v2121_v59  ;;  %v7063_v59 = vld [vmem:[#allocation22_spill] sm:$0xff]  ;;  %vm3350_vm9 = vcmask 1042434   ;;  %vm3352_vm7 = vcmask 1043459  }
 0x322   :  { %v1253_v5 = vsel %vm1242_vm6, nan, %v1252_v6  ;;  %v2127_v3 = vadd.s32 %v2126_v51, %v2122_v18  ;;  %v7064_v31 = vperm.slane %v7063_v59, 0  ;;  %vm3354_vm8 = vcmask 1044484  }
 0x323   :  { %v2810_v4 = vmul.f32 %v4708_v45, %v1253_v5  ;;  %vm3356_vm11 = vcmask 1045509   ;;  %vm3358_vm12 = vcmask 1046534   ;;  %vm3360_vm6 = vcmask 1047559  }
 0x324   :  { %v2128_v13 = vadd.s32 536870912, %v2127_v3 }
 0x325   :  { %v2837_v37 = vsel %vm2821_vm2, %v2810_v4, 0.0  ;;  %v7065_v4 = vld [vmem:[#allocation23_spill] sm:$0xff] }
 0x326   :  { %2838 = vadd.xlane.f32.xlu1 %v2837_v37  ;;  %v2129_v14 = vshrl.u32 %v2128_v13, 30  ;;  %v7066_v13 = vperm.slane %v7065_v4, 0  ;;  %v7071_v4 = vld [vmem:[#allocation35_spill] sm:$0xff] }
 0x328   :  { %v2130_v55 = vshll.u32 %v2129_v14, 30  ;;  %v2153_v36 = vsub.s32 4, %v2129_v14 }
 0x329   :  { %3043 = vrot.lane.b32.xlu2 %v7059_v40, %s3884_s3 }
 0x32a   :  { %v2131_v20 = vsub.s32 %v2127_v3, %v2130_v55  ;;  %v2154_v46 = vsel %vm2031_vm1, %v2153_v36, %v2129_v14  ;;  %v6506_v55 = vld [vmem:[#allocation5 + $0xe] sm:$0x3] }
 0x32b   :  { %v2156_v1 = vsel %vm6491_vm14, 0, %v2154_v46  ;;  %v2882_v22 = vmul.f32 %v6506_v55, %v7055_v56  ;;  %v3738_v56 = vld [vmem:[#allocation5 + $0x4] sm:$0x3] }
 0x32c   :  { %vm2132_vm15 = vcmp.lt.s32.totalorder %v2131_v20, 0  ;;  %v2133_v61 = vsub.s32 0, %v2131_v20  ;;  %v2173_v16 = vadd.s32 3, %v2156_v1 }
 0x32e   :  { %v2134_v58 = vsel %vm2132_vm15, %v2133_v61, %v2131_v20  ;;  %v2174_v11 = vand.u32 3, %v2173_v16  ;;  %v2982_v61 = vperm.slane %v2882_v22, 0  ;;  %vm3363_vm15 = vcmask 130048  }
 0x32f   :  { %v2135_v39 = vclz %v2134_v58  ;;  %3164 = vperm.xlu0 %3677, %v3159_v2   ;;  %v3736_v58 = vld [vmem:[#allocation5] sm:$0x3] }
 0x330   :  { %vm2176_vm10 = vcmp.eq.s32.totalorder %v2174_v11, 0  ;;  %vm2179_vm3 = vcmp.eq.s32.totalorder %v2174_v11, 2  ;;  %vm2175_vm5 = vcmp.lt.s32.totalorder %v2174_v11, 2 }
 0x331   :  { %v3639_v10 = vadd.s32 4294967294, %v2135_v39  ;;  %v3120_v39 = vperm.slane %v3736_v58, 1 }
 0x333   :  { %vm3640_vm4 = vcmp.lt.s32.totalorder %v3639_v10, 0  ;;  %3131 = vperm.xlu2 %3686, %v3120_v39  }
 0x334   :  { %v2138_v34 = vsel %vm3640_vm4, 0, %v3639_v10  ;;  %v6512_v10 = vpop.permute.xlu2 %2909  ;;  %vm7085_vm4 = vcmask 261120  }
 0x335   :  { %v2139_v43 = vsub.s32 32, %v2138_v34  ;;  %v2143_v38 = vsub.s32 4294967266, %v2138_v34  ;;  %v2140_v54 = vshll.u32 %v2131_v20, %v2138_v34 }
 0x337   :  { %v2141_v8 = vshrl.u32 %v2123_v50, %v2139_v43  ;;  %v2144_v42 = vadd.s32 127, %v2143_v38  ;;  %3690 = vset.pattern.permute.xlu0 %v7062_v26  ;;  %v7067_v50 = vld [vmem:[#allocation16_spill] sm:$0xff]  ;;  %v3146_v38 = vperm.slane %v3738_v56, 1 }
 0x339   :  { %v2142_v28 = vor.u32 %v2141_v8, %v2140_v54  ;;  %v2145_v21 = vshll.u32 %v2144_v42, 23  ;;  %v7068_v42 = vld [vmem:[#allocation20_spill] sm:$0xff] }
 0x33b   :  { %v2146_v0 = vor.u32 4788187, %v2145_v21  ;;  %v2149_v7 = vcvt.s32.f32 %v2142_v28  ;;  %3688 = vset.pattern.permute.xlu2 %v7067_v50 }
 0x33c   :  { %v6515_v43 = vpop.permute.xlu2 %2928 }
 0x33d   :  { %v2147_v63 = vand.u32 2147483647, %v2146_v0 }
 0x33f   :  { %v2150_v24 = vmul.f32 %v2149_v7, %v2147_v63  ;;  %2915 = vperm.xlu0 %3690, %v7064_v31   ;;  %v7069_v7 = vld [vmem:[#allocation30_spill] sm:$0xff] }
 0x341   :  { %v2151_v41 = vxor.u32 2147483648, %v2150_v24 }
 0x343   :  { %v2152_v48 = vsel %vm2031_vm1, %v2151_v41, %v2150_v24  ;;  %3151 = vperm.xlu2 %3688, %v3146_v38   ;;  %v3739_v41 = vld [vmem:[#allocation5 + $0xa] sm:$0x3]  ;;  %vm7086_vm1 = vmmov %vm7085_vm4 }
 0x344   :  { %v2155_v44 = vsel %vm6491_vm14, %v7050_v60, %v2152_v48  ;;  %v3737_v60 = vld [vmem:[#allocation5 + $0x2] sm:$0x3]  ;;  %v6517_v54 = vpop.permute.xlu2 %2948  ;;  %v3185_v33 = vperm.slane %v3739_v41, 1  ;;  %vm7087_vm14 = vmmov %vm7086_vm1 }
 0x345   :  { %v2157_v52 = vmul.f32 %v2155_v44, %v2155_v44  ;;  %v3133_v34 = vperm.slane %v3737_v60, 1 }
 0x347   :  { %v2158_v25 = vmul.f32 -0.001358992, %v2157_v52  ;;  %v2165_v17 = vmul.f32 -0.00019511016, %v2157_v52  ;;  %2941 = vperm.xlu0 %3690, %v7066_v13   ;;  %v7072_v13 = vld [vmem:[#allocation24_spill] sm:$0xff] }
 0x349   :  { %v2159_v12 = vadd.f32 0.041655596, %v2158_v25  ;;  %v2166_v15 = vadd.f32 0.008332121, %v2165_v17  ;;  %v3198_v25 = vperm.slane %v6420_v27, 1 }
 0x34b   :  { %v2160_v35 = vmul.f32 %v2159_v12, %v2157_v52  ;;  %v2167_v49 = vmul.f32 %v2166_v15, %v2157_v52  ;;  %3691 = vset.pattern.permute.xlu2 %v7062_v26  ;;  %v3211_v12 = vperm.slane %v6506_v55, 1 }
 0x34c   :  { %v2836_v21 = vpop.xlane.xlu2 %2835 }
 0x34d   :  { %v2161_v32 = vadd.f32 -0.4999988, %v2160_v35  ;;  %v2168_v29 = vadd.f32 -0.16666654, %v2167_v49 }
 0x34f   :  { %v2162_v19 = vmul.f32 %v2161_v32, %v2157_v52  ;;  %v2169_v9 = vmul.f32 %v2168_v29, %v2157_v52  ;;  %2993 = vperm.xlu0 %3690, %v2982_v61  }
 0x351   :  { %v2163_v57 = vadd.f32 1.0, %v2162_v19  ;;  %v2170_v47 = vadd.f32 1.0, %v2169_v9  ;;  %v2897_v19 = vpop.permute.xlu0 %2896 }
 0x353   :  { %v2171_v18 = vmul.f32 %v2170_v47, %v2155_v44  ;;  %v2180_v6 = vxor.u32 2147483648, %v2163_v57  ;;  %3170 = vperm.xlu2 %3691, %v3159_v2  }
 0x354   :  { %v2842_v30 = vpop.xlane.xlu2 %2841 }
 0x355   :  { %v2177_v51 = vxor.u32 2147483648, %v2171_v18  ;;  %v2181_v3 = vsel %vm2179_vm3, %v2180_v6, %v2171_v18  ;;  %vm7089_vm3 = vmmov %vm7086_vm1 }
 0x357   :  { %v2178_v5 = vsel %vm2176_vm10, %v2163_v57, %v2177_v51  ;;  %3144 = vperm.xlu0 %3690, %v3133_v34   ;;  %vm7088_vm10 = vmmov %vm7086_vm1 }
 0x358   :  { %v2182_v37 = vsel %vm2175_vm5, %v2178_v5, %v2181_v3  ;;  %vm7090_vm5 = vmmov %vm7086_vm1 }
 0x359   :  { %v2183_v14 = vsel %vm2172_vm0, nan, %v2182_v37  ;;  %v6551_v59 = vpop.permute.xlu0 %2961  ;;  %v3011_v37 = vadd.f32 %v2897_v19, %v7072_v13  ;;  %v7077_v13 = vld [vmem:[#allocation34_spill] sm:$0xff]  ;;  %vm7091_vm0 = vmmov %vm7086_vm1 }
 0x35a   :  { %v2816_v40 = vmul.f32 %v4708_v45, %v2183_v14  ;;  %v2903_v45 = vpop.permute.xlu1 %2902  ;;  %v7073_v14 = vld [vmem:[#allocation26_spill] sm:$0xff] }
 0x35b   :  { %v3012_v2 = vadd.f32 %v2903_v45, %v7070_v53  ;;  %v3013_v55 = vadd.f32 %v6512_v10, %v7073_v14 }
 0x35c   :  { %v2855_v20 = vsel %vm2821_vm2, %v2816_v40, 0.0  ;;  %v2860_v44 = vpop.xlane.xlu2 %2859  ;;  %vm3325_vm2 = vcmask 130112  }
 0x35d   :  { %2856 = vadd.xlane.f32.xlu1 %v2855_v20 }
 0x35f   :  { %3196 = vperm.xlu0 %3690, %v3185_v33  }
 0x361   :  { %v2830_v31 = vpop.xlane.xlu0 %2829 }
 0x362   :  { %v2923_v8 = vpop.permute.xlu1 %2922  ;;  %v3029_v20 = vadd.f32 %v3013_v55, %v2830_v31  ;;  %v7076_v31 = vld [vmem:[#allocation21_spill] sm:$0xff] }
 0x363   :  { %v3015_v28 = vadd.f32 %v2923_v8, %v7068_v42 }
 0x364   :  { %v2827_v52 = vpop.xlane.xlu2 %2826 }
 0x365   :  { %v6523_v0 = vadd.f32 %v3015_v28, %v2836_v21  ;;  %v6533_v17 = vadd.f32 %v3012_v2, %v2827_v52  ;;  %v7075_v2 = vld [vmem:[#allocation29_spill] sm:$0xff] }
 0x367   :  { %3695 = vset.pattern.permute.xlu0 %v6949_v23 }
 0x369   :  { %v6554_v47 = vpop.xlane.xlu0 %2853 }
 0x36a   :  { %v2936_v63 = vpop.permute.xlu1 %2935 }
 0x36b   :  { %v3017_v24 = vadd.f32 %v2936_v63, %v7069_v7  ;;  %v7074_v7 = vld [vmem:[#allocation25_spill] sm:$0xff] }
 0x36c   :  { %v6535_v46 = vpop.xlane.xlu2 %2850 }
 0x36d   :  { %v3033_v36 = vadd.f32 %v3017_v24, %v2842_v30  ;;  %v3019_v24 = vadd.f32 %v6517_v54, %v7074_v7 }
 0x371   :  { %v6558_v18 = vpop.xlane.xlu0 %2844 }
 0x372   :  { %v6544_v35 = vpop.permute.xlu1 %2954 }
 0x374   :  { %v6539_v15 = vpop.xlane.xlu2 %2868 }
 0x376   :  { %2974 = vperm.xlu1 %3687, %v2969_v62   ;;  %v3740_v62 = vld [vmem:[#allocation5 + $0x8] sm:$0x3] }
 0x377   :  { %v3172_v48 = vperm.slane %v3740_v62, 1 }
 0x379   :  { %3183 = vperm.xlu2 %3691, %v3172_v48  }
 0x37a   :  { %v2824_v49 = vpop.xlane.xlu1 %2823 }
 0x37b   :  { %v3027_v40 = vadd.f32 %v3011_v37, %v2824_v49  ;;  %v3021_v37 = vadd.f32 %v6551_v59, %v7077_v13 }
 0x37c   :  { %v6542_v1 = vpop.permute.xlu2 %2967 }
 0x37e   :  { %2987 = vperm.xlu1 %3687, %v2982_v61  }
 0x381   :  { %3693 = vset.pattern.permute.xlu2 %v7067_v50 }
 0x382   :  { %v2848_v29 = vpop.xlane.xlu1 %2847 }
 0x383   :  { %v3035_v30 = vadd.f32 %v3019_v24, %v2848_v29 }
 0x384   :  { %v6546_v27 = vpop.permute.xlu2 %2980 }
 0x386   :  { %3125 = vperm.xlu1 %3687, %v3120_v39  }
 0x389   :  { %3203 = vperm.xlu2 %3693, %v3198_v25  }
 0x38a   :  { %v6549_v16 = vpop.xlane.xlu1 %2865 }
 0x38c   :  { %v3044_v32 = vpop.permute.xlu2 %3043 }
 0x38d   :  { %3655 = vpush %v3044_v32 }
 0x38e   :  { %3138 = vperm.xlu1 %3687, %v3133_v34   ;;  %v6562_v51 = vpop.xlane.xlu0 %2862 }
 0x391   :  { %3216 = vperm.xlu2 %3693, %v3211_v12  }
 0x392   :  { %v2833_v9 = vpop.xlane.xlu1 %2832 }
 0x394   :  { %v6560_v6 = vpop.permute.xlu2 %3131 }
 0x396   :  { %3689 = vset.pattern.permute.xlu1 %v7062_v26 }
 0x399   :  { %3697 = vset.pattern.permute.xlu2 %v6949_v23 }
 0x39a   :  { %v2839_v57 = vpop.xlane.xlu1 %2838 }
 0x39d   :  { %v6564_v5 = vpop.permute.xlu2 %3151 }
 0x39e   :  { %3157 = vperm.xlu1 %3689, %v3146_v38  }
 0x3a1   :  { %v3165_v58 = vpop.permute.xlu0 %3164 }
 0x3a6   :  { %3692 = vset.pattern.permute.xlu1 %v7067_v50 }
 0x3ad   :  { %v6578_v56 = vpop.permute.xlu2 %3170 }
 0x3ae   :  { %3177 = vperm.xlu1 %3692, %v3172_v48  }
 0x3b1   :  { %v2916_v41 = vpop.permute.xlu0 %2915 }
 0x3b2   :  { %v3014_v52 = vadd.f32 %v2916_v41, %v7075_v2  ;;  %v7082_v2 = vld [vmem:[#allocation36_spill] sm:$0xff] }
 0x3b6   :  { %3190 = vperm.xlu1 %3692, %v3185_v33  }
 0x3b9   :  { %v2942_v55 = vpop.permute.xlu0 %2941 }
 0x3be   :  { %3694 = vset.pattern.permute.xlu1 %v7062_v26  ;;  %s3656_s11 = spop %3655 }
 0x3bf   :  { %v6572_v22 = vstv %s3656_s11 }
 0x3c0   :  { %v3048_v39 = vadd.f32 %v6572_v22, %v3027_v40  ;;  %v3050_v60 = vadd.f32 %v6572_v22, %v3029_v20  ;;  %v3054_v34 = vadd.f32 %v6572_v22, %v3033_v36  ;;  %v3052_v33 = vadd.f32 %v6572_v22, %v6523_v0 }
 0x3c1   :  { %v3049_v36 = vadd.f32 %v6572_v22, %v6533_v17  ;;  %v3016_v17 = vadd.f32 %v6515_v43, %v7076_v31  ;;  %v3037_v43 = vadd.f32 %v3021_v37, %v6554_v47 }
 0x3c2   :  { %v3064_v38 = vmax.f32 %v3048_v39, 0.0  ;;  %v3066_v45 = vmax.f32 %v3050_v60, 0.0  ;;  %v3070_v8 = vmax.f32 %v3054_v34, 0.0  ;;  %v3068_v48 = vmax.f32 %v3052_v33, 0.0  ;;  %v7078_v39 = vld [vmem:[#allocation28_spill] sm:$0xff] }
 0x3c3   :  { %v3065_v19 = vmax.f32 %v3049_v36, 0.0  ;;  %v3032_v14 = vadd.f32 %v3016_v17, %v2839_v57  ;;  %v3058_v57 = vadd.f32 %v6572_v22, %v3037_v43  ;;  %v2994_v36 = vpop.permute.xlu0 %2993 }
 0x3c4   :  { %v3080_v42 = vmul.f32 1.442695, %v3064_v38  ;;  %v3084_v28 = vmul.f32 1.442695, %v3066_v45  ;;  %v3092_v21 = vmul.f32 1.442695, %v3070_v8 }
 0x3c5   :  { %v3088_v54 = vmul.f32 1.442695, %v3068_v48  ;;  %v3082_v40 = vmul.f32 1.442695, %v3065_v19  ;;  %v7080_v45 = vld [vmem:[#allocation33_spill] sm:$0xff]  ;;  %v3074_v24 = vmax.f32 %v3058_v57, 0.0 }
 0x3c6   :  { %3209 = vperm.xlu1 %3694, %v3198_v25   ;;  %3698 = vpow2.f32 %v3080_v42  ;;  %v3020_v8 = vadd.f32 %v6544_v35, %v7080_v45  ;;  %v7081_v48 = vld [vmem:[#allocation31_spill] sm:$0xff] }
 0x3c7   :  { %3700 = vpow2.f32 %v3084_v28 }
 0x3c8   :  { %3702 = vpow2.f32 %v3092_v21 }
 0x3cb   :  { %v3145_v13 = vpop.permute.xlu0 %3144 }
 0x3cc   :  { %v3699_v53 = vpop.eup %3698 }
 0x3ce   :  { %3222 = vperm.xlu1 %3694, %v3211_v12   ;;  %v3701_v12 = vpop.eup %3700 }
 0x3cf   :  { %v3703_v0 = vpop.eup %3702 }
 0x3d0   :  { %v6556_v11 = vpop.xlane.xlu1 %2856 }
 0x3d3   :  { %v6588_v25 = vpop.permute.xlu2 %3183 }
 0x3d6   :  { %3696 = vset.pattern.permute.xlu1 %v6949_v23 }
 0x3e8   :  { %v2975_v26 = vpop.permute.xlu1 %2974 }
 0x3e9   :  { %v3023_v23 = vadd.f32 %v2975_v26, %v7071_v4  ;;  %v6597_v4 = vmul.f32 %v3703_v0, %v3165_v58  ;;  %v3022_v58 = vadd.f32 %v6542_v1, %v7078_v39 }
 0x3eb   :  { %v3039_v61 = vadd.f32 %v3023_v23, %v2860_v44  ;;  %v3056_v44 = vadd.f32 %v6572_v22, %v3035_v30  ;;  %v3030_v23 = vadd.f32 %v3014_v52, %v2833_v9  ;;  %3291 = vperm.xlu2 %3697, %v6597_v4   ;;  %v3053_v9 = vadd.f32 %v6572_v22, %v3032_v14  ;;  %v7083_v14 = vld [vmem:[#allocation39_spill] sm:$0xff] }
 0x3ec   :  { %v3038_v1 = vadd.f32 %v3022_v58, %v6556_v11  ;;  %v3024_v52 = vadd.f32 %v6546_v27, %v7082_v2 }
 0x3ed   :  { %v3060_v50 = vadd.f32 %v6572_v22, %v3039_v61  ;;  %v3072_v26 = vmax.f32 %v3056_v44, 0.0  ;;  %v3051_v20 = vadd.f32 %v6572_v22, %v3030_v23  ;;  %v3069_v21 = vmax.f32 %v3053_v9, 0.0 }
 0x3ee   :  { %v3059_v35 = vadd.f32 %v6572_v22, %v3038_v1  ;;  %v3040_v17 = vadd.f32 %v3024_v52, %v6562_v51 }
 0x3ef   :  { %v3076_v63 = vmax.f32 %v3060_v50, 0.0  ;;  %v3096_v60 = vmul.f32 1.442695, %v3072_v26  ;;  %v7079_v50 = vld [vmem:[#allocation32_spill] sm:$0xff]  ;;  %v3067_v47 = vmax.f32 %v3051_v20, 0.0 }
 0x3f0   :  { %v6566_v3 = vpop.permute.xlu1 %2987  ;;  %v3018_v38 = vadd.f32 %v2942_v55, %v7079_v50  ;;  %v3090_v33 = vmul.f32 1.442695, %v3069_v21  ;;  %v3075_v44 = vmax.f32 %v3059_v35, 0.0  ;;  %v3061_v37 = vadd.f32 %v6572_v22, %v3040_v17 }
 0x3f1   :  { %v3104_v62 = vmul.f32 1.442695, %v3076_v63  ;;  %v3036_v63 = vadd.f32 %v3020_v8, %v6535_v46  ;;  %v3025_v46 = vadd.f32 %v6566_v3, %v7081_v48  ;;  %v3026_v55 = vadd.f32 %v2994_v36, %v7083_v14 }
 0x3f2   :  { %v3034_v7 = vadd.f32 %v3018_v38, %v6558_v18  ;;  %v3102_v31 = vmul.f32 1.442695, %v3075_v44  ;;  %v3077_v39 = vmax.f32 %v3061_v37, 0.0  ;;  %v7084_v36 = vlaneseq }
 0x3f3   :  { %3704 = vpow2.f32 %v3104_v62  ;;  %v3057_v41 = vadd.f32 %v6572_v22, %v3036_v63  ;;  %v3041_v19 = vadd.f32 %v3025_v46, %v6549_v16  ;;  %v3042_v9 = vadd.f32 %v3026_v55, %v6539_v15 }
 0x3f4   :  { %3706 = vpow2.f32 %v3088_v54  ;;  %v3055_v11 = vadd.f32 %v6572_v22, %v3034_v7  ;;  %v3106_v38 = vmul.f32 1.442695, %v3077_v39  ;;  %v3321_v44 = vand.u32 127, %v7084_v36 }
 0x3f5   :  { %3708 = vpow2.f32 %v3082_v40  ;;  %v3073_v18 = vmax.f32 %v3057_v41, 0.0  ;;  %v3062_v27 = vadd.f32 %v6572_v22, %v3041_v19  ;;  %v3063_v57 = vadd.f32 %v6572_v22, %v3042_v9 }
 0x3f6   :  { %3710 = vpow2.f32 %v3096_v60  ;;  %v3323_v2 = vadd.s32 4294967288, %v3321_v44 }
 0x3f7   :  { %v3098_v3 = vmul.f32 1.442695, %v3073_v18  ;;  %v3078_v40 = vmax.f32 %v3062_v27, 0.0 }
 0x3f8   :  { %v3126_v10 = vpop.permute.xlu1 %3125 }
 0x3f9   :  { %v6590_v32 = vmul.f32 %v3699_v53, %v3126_v10  ;;  %v3705_v61 = vpop.eup %3704  ;;  %v3204_v10 = vpop.permute.xlu2 %3203  ;;  %v3100_v53 = vmul.f32 1.442695, %v3074_v24  ;;  %v3108_v60 = vmul.f32 1.442695, %v3078_v40 }
 0x3fa   :  { %v3707_v34 = vpop.eup %3706  ;;  %v6616_v28 = vmul.f32 %v3705_v61, %v3204_v10 }
 0x3fb   :  { %3273 = vperm.xlu0 %3695, %v6590_v32   ;;  %v6613_v42 = vmul.f32 %v3707_v34, %v6564_v5  ;;  %v3086_v5 = vmul.f32 1.442695, %v3067_v47  ;;  %v3709_v30 = vpop.eup %3708  ;;  %v3079_v47 = vmax.f32 %v3063_v57, 0.0 }
 0x3fc   :  { %3309 = vperm.xlu2 %3697, %v6616_v28   ;;  %v3711_v62 = vpop.eup %3710 }
 0x3fd   :  { %3712 = vpow2.f32 %v3086_v5  ;;  %v3110_v1 = vmul.f32 1.442695, %v3079_v47 }
 0x3fe   :  { %3714 = vpow2.f32 %v3090_v33 }
 0x3ff   :  { %3716 = vpow2.f32 %v3100_v53 }
 0x400   :  { %v3139_v49 = vpop.permute.xlu1 %3138  ;;  %3718 = vpow2.f32 %v3102_v31 }
 0x401   :  { %v6592_v29 = vmul.f32 %v3701_v12, %v3139_v49  ;;  %v6630_v12 = vmul.f32 %v3709_v30, %v6560_v6  ;;  %v3071_v49 = vmax.f32 %v3055_v11, 0.0  ;;  %3720 = vpow2.f32 %v3098_v3  ;;  %v3217_v22 = vpop.permute.xlu2 %3216 }
 0x403   :  { %3279 = vperm.xlu1 %3696, %v6592_v29   ;;  %v3094_v26 = vmul.f32 1.442695, %v3071_v49  ;;  %v3713_v23 = vpop.eup %3712 }
 0x404   :  { %3276 = vperm.xlu2 %3697, %v6630_v12   ;;  %v3715_v6 = vpop.eup %3714  ;;  %v6641_v61 = vmul.f32 %v3713_v23, %v3145_v13 }
 0x405   :  { %v3717_v16 = vpop.eup %3716  ;;  %3722 = vpow2.f32 %v3094_v26 }
 0x406   :  { %v3719_v58 = vpop.eup %3718  ;;  %3724 = vpow2.f32 %v3108_v60 }
 0x407   :  { %v3721_v34 = vpop.eup %3720  ;;  %3726 = vpow2.f32 %v3106_v38 }
 0x408   :  { %v6653_v45 = vmul.f32 %v3721_v34, %v6588_v25  ;;  %3728 = vpow2.f32 %v3110_v1 }
 0x40b   :  { %3285 = vperm.xlu1 %3696, %v6613_v42   ;;  %v3723_v50 = vpop.eup %3722 }
 0x40c   :  { %3282 = vperm.xlu2 %3697, %v6641_v61   ;;  %v6658_v10 = vmul.f32 %v3723_v50, %v6578_v56  ;;  %v3725_v15 = vpop.eup %3724 }
 0x40d   :  { %v3727_v21 = vpop.eup %3726  ;;  %v6663_v25 = vmul.f32 %v3725_v15, %v3217_v22 }
 0x40e   :  { %v3729_v56 = vpop.eup %3728 }
 0x410   :  { %v3158_v59 = vpop.permute.xlu1 %3157 }
 0x411   :  { %v6643_v43 = vmul.f32 %v3715_v6, %v3158_v59  ;;  %v3197_v59 = vpop.permute.xlu0 %3196 }
 0x412   :  { %v6655_v8 = vmul.f32 %v3719_v58, %v3197_v59 }
 0x414   :  { %3300 = vperm.xlu2 %3697, %v6653_v45  }
 0x420   :  { %v3178_v54 = vpop.permute.xlu1 %3177 }
 0x421   :  { %v6632_v0 = vmul.f32 %v3711_v62, %v3178_v54 }
 0x423   :  { %3297 = vperm.xlu0 %3695, %v6632_v0  }
 0x428   :  { %v3191_v20 = vpop.permute.xlu1 %3190 }
 0x429   :  { %v6645_v51 = vmul.f32 %v3717_v16, %v3191_v20 }
 0x42b   :  { %3288 = vperm.xlu0 %3695, %v6643_v43   ;;  %3303 = vperm.xlu1 %3696, %v6645_v51  }
 0x433   :  { %3294 = vperm.xlu1 %3696, %v6658_v10   ;;  %3306 = vperm.xlu0 %3695, %v6655_v8  }
 0x438   :  { %v3210_v63 = vpop.permute.xlu1 %3209 }
 0x439   :  { %v6665_v7 = vmul.f32 %v3727_v21, %v3210_v63 }
 0x43b   :  { %3312 = vperm.xlu1 %3696, %v6665_v7   ;;  %3315 = vperm.xlu0 %3695, %v6663_v25  }
 0x440   :  { %v3223_v35 = vpop.permute.xlu1 %3222 }
 0x441   :  { %v6669_v24 = vmul.f32 %v3729_v56, %v3223_v35 }
 0x443   :  { %3318 = vperm.xlu2 %3697, %v6669_v24  }
 0x445   :  { %v3292_v5 = vpop.permute.xlu2 %3291 }
 0x446   :  { %v3333_v6 = vperm.slane %v3292_v5, %v3321_v44 }
 0x456   :  { %v3310_v41 = vpop.permute.xlu2 %3309 }
 0x457   :  { %v3342_v59 = vperm.slane %v3310_v41, %v3321_v44 }
 0x45e   :  { %v3277_v30 = vpop.permute.xlu2 %3276 }
 0x45f   :  { %v3324_v3 = vperm.slane %v3277_v30, %v3323_v2 }
 0x466   :  { %v3283_v46 = vpop.permute.xlu2 %3282 }
 0x467   :  { %v3328_v54 = vperm.slane %v3283_v46, %v3323_v2 }
 0x46d   :  { %v3274_v11 = vpop.permute.xlu0 %3273 }
 0x46e   :  { %v3322_v49 = vperm.slane %v3274_v11, %v3321_v44  ;;  %v3301_v19 = vpop.permute.xlu2 %3300 }
 0x46f   :  { %v3337_v55 = vperm.slane %v3301_v19, %v3323_v2 }
 0x470   :  { %v3326_v26 = vsel %vm3325_vm2, %v3324_v3, %v3322_v49 }
 0x475   :  { %v3280_v33 = vpop.permute.xlu1 %3279 }
 0x476   :  { %v3327_v52 = vperm.slane %v3280_v33, %v3321_v44 }
 0x478   :  { %v3329_v27 = vsel %vm3325_vm2, %v3328_v54, %v3327_v52 }
 0x479   :  { %v3349_v14 = vsel %vm3348_vm13, %v3329_v27, %v3326_v26 }
 0x47d   :  { %v3286_v62 = vpop.permute.xlu1 %3285 }
 0x47e   :  { %v3330_v17 = vperm.slane %v3286_v62, %v3321_v44 }
 0x495   :  { %v3298_v48 = vpop.permute.xlu0 %3297 }
 0x496   :  { %v3336_v40 = vperm.slane %v3298_v48, %v3321_v44 }
 0x498   :  { %v3338_v60 = vsel %vm3325_vm2, %v3337_v55, %v3336_v40  ;;  %v109_v55 = vld [vmem:[#allocation7 + $0x30] sm:$0xff]  ;;  %v108_v40 = vld [vmem:[#allocation7 + $0x28] sm:$0xff] }
 0x49d   :  { %v3304_v53 = vpop.permute.xlu1 %3303  ;;  %v3289_v18 = vpop.permute.xlu0 %3288 }
 0x49e   :  { %v3331_v31 = vperm.slane %v3289_v18, %v3323_v2  ;;  %v3319_v34 = vpop.permute.xlu2 %3318  ;;  %v3339_v50 = vperm.slane %v3304_v53, %v3321_v44 }
 0x49f   :  { %v3346_v22 = vperm.slane %v3319_v34, %v3323_v2 }
 0x4a0   :  { %v3332_v13 = vsel %vm3325_vm2, %v3331_v31, %v3330_v17 }
 0x4a1   :  { %v3351_v39 = vsel %vm3350_vm9, %v3332_v13, %v3349_v14  ;;  %v105_v13 = vld [vmem:[#allocation7 + $0x10] sm:$0xff]  ;;  %v103_v14 = vld [vmem:[#allocation7] sm:$0xff] }
 0x4a5   :  { %v3295_v23 = vpop.permute.xlu1 %3294  ;;  %v3307_v16 = vpop.permute.xlu0 %3306 }
 0x4a6   :  { %v3334_v37 = vperm.slane %v3295_v23, %v3323_v2  ;;  %v3340_v9 = vperm.slane %v3307_v16, %v3323_v2  ;;  %v106_v16 = vld [vmem:[#allocation7 + $0x18] sm:$0xff] }
 0x4a8   :  { %v3335_v20 = vsel %vm3325_vm2, %v3334_v37, %v3333_v6  ;;  %v3341_v1 = vsel %vm3325_vm2, %v3340_v9, %v3339_v50  ;;  %v107_v37 = vld [vmem:[#allocation7 + $0x20] sm:$0xff]  ;;  %v112_v50 = vld [vmem:[#allocation7 + $0x48] sm:$0xff] }
 0x4a9   :  { %v3353_v58 = vsel %vm3352_vm7, %v3335_v20, %v3351_v39  ;;  %v111_v39 = vld [vmem:[#allocation7 + $0x40] sm:$0xff] }
 0x4aa   :  { %v3355_v57 = vsel %vm3354_vm8, %v3338_v60, %v3353_v58  ;;  %v110_v58 = vld [vmem:[#allocation7 + $0x38] sm:$0xff] }
 0x4ab   :  { %v3357_v56 = vsel %vm3356_vm11, %v3341_v1, %v3355_v57 }
 0x4ad   :  { %v3313_v38 = vpop.permute.xlu1 %3312  ;;  %v3316_v15 = vpop.permute.xlu0 %3315 }
 0x4ae   :  { %v3343_v47 = vperm.slane %v3313_v38, %v3323_v2  ;;  %v3345_v21 = vperm.slane %v3316_v15, %v3321_v44 }
 0x4b0   :  { %v3344_v63 = vsel %vm3325_vm2, %v3343_v47, %v3342_v59  ;;  %v3347_v35 = vsel %vm3325_vm2, %v3346_v22, %v3345_v21  ;;  %v114_v59 = vld [vmem:[#allocation7 + $0x58] sm:$0xff]  ;;  %vm7092_vm2 = vmmov %vm7091_vm0 }
 0x4b1   :  { %v3359_v5 = vsel %vm3358_vm12, %v3344_v63, %v3357_v56 }
 0x4b2   :  { %v3361_v33 = vsel %vm3360_vm6, %v3347_v35, %v3359_v5  ;;  %v113_v35 = vld [vmem:[#allocation7 + $0x50] sm:$0xff] }
 0x4b3   :  { %v3364_v41 = vsel %vm3363_vm15, %v3361_v33, 0.0  ;;  %vm7093_vm15 = vmmov %vm7091_vm0 }
 0x4b4   :  { %3365 = vadd.xlane.f32.xlu1 %v3364_v41 }
 0x527   :  { %v3366_v11 = vpop.xlane.xlu1 %3365 }
 0x528   :  { %3730 = vrcp.f32 %v3366_v11 }
 0x52e   :  { %v3731_v30 = vpop.eup %3730 }
 0x52f   :  { %v3374_v62 = vperm.slane %v3731_v30, 5  ;;  %v3369_v48 = vperm.slane %v3731_v30, 0  ;;  %v3370_v53 = vperm.slane %v3731_v30, 1  ;;  %v3371_v52 = vperm.slane %v3731_v30, 2 }
 0x530   :  { %v3373_v19 = vperm.slane %v3731_v30, 4  ;;  %v3375_v31 = vperm.slane %v3731_v30, 6  ;;  %v3376_v3 = vperm.slane %v3731_v30, 7 }
 0x531   :  { %v3396_v46 = vmul.f32 %v3374_v62, %v6655_v8  ;;  %v3386_v36 = vmul.f32 %v3369_v48, %v6630_v12  ;;  %v3385_v44 = vmul.f32 %v3369_v48, %v6590_v32  ;;  %v3388_v18 = vmul.f32 %v3370_v53, %v6641_v61 }
 0x532   :  { %v3387_v2 = vmul.f32 %v3370_v53, %v6592_v29  ;;  %v3390_v54 = vmul.f32 %v3371_v52, %v6643_v43  ;;  %v3389_v49 = vmul.f32 %v3371_v52, %v6613_v42  ;;  %v3372_v12 = vperm.slane %v3731_v30, 3 }
 0x533   :  { %3458 = vperm.xlu1 %3696, %v3396_v46   ;;  %3408 = vperm.xlu2 %3697, %v3386_v36   ;;  %v3394_v61 = vmul.f32 %v3373_v19, %v6653_v45  ;;  %v3393_v29 = vmul.f32 %v3373_v19, %v6632_v0  ;;  %v3397_v43 = vmul.f32 %v3375_v31, %v6616_v28 }
 0x534   :  { %3403 = vperm.xlu0 %3695, %v3385_v44   ;;  %v3392_v32 = vmul.f32 %v3372_v12, %v6658_v10  ;;  %v3391_v8 = vmul.f32 %v3372_v12, %v6597_v4  ;;  %v3395_v42 = vmul.f32 %v3374_v62, %v6645_v51  ;;  %v3399_v10 = vmul.f32 %v3376_v3, %v6663_v25 }
 0x535   :  { %v3398_v4 = vmul.f32 %v3375_v31, %v6665_v7  ;;  %v3400_v45 = vmul.f32 %v3376_v3, %v6669_v24  ;;  %v104_v24 = vld [vmem:[#allocation7 + $0x8] sm:$0xff] }
 0x536   :  { %v116_v3 = vld [vmem:[#allocation7 + $0x68] sm:$0xff] }
 0x53b   :  { %3418 = vperm.xlu2 %3697, %v3388_v18  }
 0x53c   :  { %3413 = vperm.xlu0 %3695, %v3387_v2  }
 0x543   :  { %3428 = vperm.xlu2 %3697, %v3390_v54  }
 0x544   :  { %3423 = vperm.xlu0 %3695, %v3389_v49  }
 0x54b   :  { %3438 = vperm.xlu2 %3697, %v3392_v32  }
 0x54c   :  { %3433 = vperm.xlu0 %3695, %v3391_v8  }
 0x553   :  { %3448 = vperm.xlu2 %3697, %v3394_v61   ;;  %v115_v61 = vld [vmem:[#allocation7 + $0x60] sm:$0xff] }
 0x554   :  { %3443 = vperm.xlu0 %3695, %v3393_v29  }
 0x55b   :  { %3463 = vperm.xlu2 %3697, %v3397_v43  }
 0x55c   :  { %3453 = vperm.xlu0 %3695, %v3395_v42  }
 0x563   :  { %3473 = vperm.xlu2 %3697, %v3399_v10  }
 0x564   :  { %3468 = vperm.xlu0 %3695, %v3398_v4  }
 0x56c   :  { %3478 = vperm.xlu0 %3695, %v3400_v45  }
 0x58d   :  { %v3409_v0 = vpop.permute.xlu2 %3408 }
 0x58e   :  { %v3482_v22 = vmul.f32 %v3409_v0, %v104_v24  ;;  %v118_v24 = vld [vmem:[#allocation7 + $0x78] sm:$0xff] }
 0x590   :  { %v3498_v36 = vsel %vm7092_vm2, %v3482_v22, 0.0 }
 0x595   :  { %v3419_v27 = vpop.permute.xlu2 %3418 }
 0x596   :  { %v3484_v60 = vmul.f32 %v3419_v27, %v106_v16  ;;  %v117_v16 = vld [vmem:[#allocation7 + $0x70] sm:$0xff] }
 0x598   :  { %v3507_v5 = vsel %vm7087_vm14, %v3484_v60, 0.0  ;;  %vm7096_vm14 = vmmov %vm7091_vm0 }
 0x59d   :  { %v3429_v23 = vpop.permute.xlu2 %3428 }
 0x59e   :  { %v3486_v57 = vmul.f32 %v3429_v23, %v108_v40 }
 0x5a0   :  { %v3516_v30 = vsel %vm7090_vm5, %v3486_v57, 0.0  ;;  %vm7099_vm5 = vmmov %vm7091_vm0 }
 0x5a5   :  { %v3439_v6 = vpop.permute.xlu2 %3438  ;;  %v3459_v47 = vpop.permute.xlu1 %3458 }
 0x5a6   :  { %v3404_v17 = vpop.permute.xlu0 %3403  ;;  %v3488_v1 = vmul.f32 %v3439_v6, %v110_v58  ;;  %v3492_v33 = vmul.f32 %v3459_v47, %v114_v59 }
 0x5a7   :  { %v3481_v34 = vmul.f32 %v3404_v17, %v103_v14 }
 0x5a8   :  { %v3525_v44 = vsel %vm7093_vm15, %v3488_v1, 0.0 }
 0x5a9   :  { %v3497_v41 = vsel %vm7088_vm10, %v3481_v34, 0.0  ;;  %vm7097_vm10 = vmmov %vm7091_vm0 }
 0x5aa   :  { %v3499_v2 = vadd.f32 %v3498_v36, %v3497_v41 }
 0x5ac   :  { %v3500_v43 = vrot.slane %v3499_v2, 4 }
 0x5ad   :  { %v3449_v25 = vpop.permute.xlu2 %3448 }
 0x5ae   :  { %v3414_v26 = vpop.permute.xlu0 %3413  ;;  %v3490_v63 = vmul.f32 %v3449_v25, %v112_v50  ;;  %v3501_v23 = vadd.f32 %v3500_v43, %v3499_v2 }
 0x5af   :  { %v3483_v20 = vmul.f32 %v3414_v26, %v105_v13 }
 0x5b0   :  { %v3502_v40 = vrot.slane %v3501_v23, 2 }
 0x5b1   :  { %v3506_v21 = vsel %vm7085_vm4, %v3483_v20, 0.0  ;;  %vm7094_vm4 = vmmov %vm7091_vm0 }
 0x5b2   :  { %v3508_v62 = vadd.f32 %v3507_v5, %v3506_v21  ;;  %v3534_v52 = vsel %vm7094_vm4, %v3490_v63, 0.0  ;;  %v3503_v47 = vadd.f32 %v3502_v40, %v3501_v23 }
 0x5b4   :  { %v3509_v19 = vrot.slane %v3508_v62, 4 }
 0x5b5   :  { %v3464_v54 = vpop.permute.xlu2 %3463 }
 0x5b6   :  { %v3424_v28 = vpop.permute.xlu0 %3423  ;;  %v3493_v10 = vmul.f32 %v3464_v54, %v115_v61  ;;  %v3510_v45 = vadd.f32 %v3509_v19, %v3508_v62 }
 0x5b7   :  { %v3485_v9 = vmul.f32 %v3424_v28, %v107_v37 }
 0x5b8   :  { %v3551_v6 = vsel %vm7097_vm10, %v3493_v10, 0.0  ;;  %v3511_v37 = vrot.slane %v3510_v45, 2 }
 0x5b9   :  { %v3515_v56 = vsel %vm7086_vm1, %v3485_v9, 0.0  ;;  %vm7095_vm1 = vmmov %vm7091_vm0 }
 0x5ba   :  { %v3517_v53 = vadd.f32 %v3516_v30, %v3515_v56  ;;  %v3543_v12 = vsel %vm7095_vm1, %v3492_v33, 0.0  ;;  %v3512_v60 = vadd.f32 %v3511_v37, %v3510_v45 }
 0x5bc   :  { %v3518_v31 = vrot.slane %v3517_v53, 4  ;;  %v3513_v56 = vrot.slane %v3512_v60, 1 }
 0x5bd   :  { %v3474_v14 = vpop.permute.xlu2 %3473 }
 0x5be   :  { %v3434_v51 = vpop.permute.xlu0 %3433  ;;  %v3519_v27 = vadd.f32 %v3518_v31, %v3517_v53  ;;  %v3495_v58 = vmul.f32 %v3474_v14, %v117_v16 }
 0x5bf   :  { %v3487_v38 = vmul.f32 %v3434_v51, %v109_v55 }
 0x5c0   :  { %v3560_v1 = vsel %vm7099_vm5, %v3495_v58, 0.0 }
 0x5c1   :  { %v3524_v11 = vsel %vm7089_vm3, %v3487_v38, 0.0  ;;  %vm7098_vm3 = vmmov %vm7091_vm0 }
 0x5c2   :  { %v3526_v49 = vadd.f32 %v3525_v44, %v3524_v11  ;;  %v3504_v11 = vrot.slane %v3503_v47, 1 }
 0x5c4   :  { %v3527_v42 = vrot.slane %v3526_v49, 4  ;;  %v3505_v2 = vadd.f32 %v3504_v11, %v3503_v47 }
 0x5c6   :  { %v3444_v7 = vpop.permute.xlu0 %3443  ;;  %v3528_v28 = vadd.f32 %v3527_v42, %v3526_v49 }
 0x5c7   :  { %v3489_v15 = vmul.f32 %v3444_v7, %v111_v39  ;;  %v3520_v7 = vrot.slane %v3519_v27, 2 }
 0x5c8   :  { %v3529_v20 = vrot.slane %v3528_v28, 2 }
 0x5c9   :  { %v3533_v48 = vsel %vm7091_vm0, %v3489_v15, 0.0  ;;  %v3521_v57 = vadd.f32 %v3520_v7, %v3519_v27 }
 0x5ca   :  { %v3535_v32 = vadd.f32 %v3534_v52, %v3533_v48  ;;  %v3530_v15 = vadd.f32 %v3529_v20, %v3528_v28 }
 0x5cb   :  { %v3522_v33 = vrot.slane %v3521_v57, 1 }
 0x5cc   :  { %v3536_v4 = vrot.slane %v3535_v32, 4  ;;  %v3531_v30 = vrot.slane %v3530_v15, 1 }
 0x5cd   :  { %v3523_v53 = vadd.f32 %v3522_v33, %v3521_v57 }
 0x5ce   :  { %v3454_v46 = vpop.permute.xlu0 %3453  ;;  %v3537_v51 = vadd.f32 %v3536_v4, %v3535_v32  ;;  %v3532_v52 = vadd.f32 %v3531_v30, %v3530_v15 }
 0x5cf   :  { %v3491_v18 = vmul.f32 %v3454_v46, %v113_v35  ;;  %v3514_v46 = vadd.f32 %v3513_v56, %v3512_v60 }
 0x5d0   :  { %v3538_v9 = vrot.slane %v3537_v51, 2 }
 0x5d1   :  { %v3542_v8 = vsel %vm7096_vm14, %v3491_v18, 0.0 }
 0x5d2   :  { %v3544_v29 = vadd.f32 %v3543_v12, %v3542_v8  ;;  %v3539_v21 = vadd.f32 %v3538_v9, %v3537_v51  ;;  %v3577_v12 = vsel %vm3348_vm13, %v3514_v46, %v3505_v2  ;;  %vm7100_vm13 = vmmov %vm7091_vm0 }
 0x5d3   :  { %v3578_v19 = vsel %vm3350_vm9, %v3523_v53, %v3577_v12 }
 0x5d4   :  { %v3545_v0 = vrot.slane %v3544_v29, 4  ;;  %v3540_v48 = vrot.slane %v3539_v21, 1 }
 0x5d6   :  { %v3469_v17 = vpop.permute.xlu0 %3468  ;;  %v3546_v25 = vadd.f32 %v3545_v0, %v3544_v29  ;;  %v3541_v49 = vadd.f32 %v3540_v48, %v3539_v21  ;;  %v3579_v29 = vsel %vm3352_vm7, %v3532_v52, %v3578_v19 }
 0x5d7   :  { %v3494_v26 = vmul.f32 %v3469_v17, %v116_v3 }
 0x5d8   :  { %v3547_v34 = vrot.slane %v3546_v25, 2  ;;  %v3580_v43 = vsel %vm3354_vm8, %v3541_v49, %v3579_v29 }
 0x5d9   :  { %v3552_v13 = vsel %vm7098_vm3, %v3494_v26, 0.0 }
 0x5da   :  { %v3553_v55 = vadd.f32 %v3552_v13, %v3551_v6  ;;  %v3548_v35 = vadd.f32 %v3547_v34, %v3546_v25 }
 0x5dc   :  { %v3554_v39 = vrot.slane %v3553_v55, 4  ;;  %v3549_v36 = vrot.slane %v3548_v35, 1 }
 0x5de   :  { %v3555_v50 = vadd.f32 %v3554_v39, %v3553_v55  ;;  %v3479_v38 = vpop.permute.xlu0 %3478  ;;  %v3550_v32 = vadd.f32 %v3549_v36, %v3548_v35 }
 0x5df   :  { %v3496_v59 = vmul.f32 %v3479_v38, %v118_v24 }
 0x5e0   :  { %v3556_v22 = vrot.slane %v3555_v50, 2  ;;  %v3581_v3 = vsel %vm3356_vm11, %v3550_v32, %v3580_v43 }
 0x5e1   :  { %v3561_v63 = vsel %vm7091_vm0, %v3496_v59, 0.0 }
 0x5e2   :  { %v3562_v5 = vadd.f32 %v3561_v63, %v3560_v1  ;;  %v3557_v41 = vadd.f32 %v3556_v22, %v3555_v50 }
 0x5e4   :  { %v3563_v62 = vrot.slane %v3562_v5, 4  ;;  %v3558_v18 = vrot.slane %v3557_v41, 1 }
 0x5e6   :  { %v3564_v44 = vadd.f32 %v3563_v62, %v3562_v5  ;;  %v3559_v61 = vadd.f32 %v3558_v18, %v3557_v41 }
 0x5e8   :  { %v3565_v54 = vrot.slane %v3564_v44, 2  ;;  %v3582_v10 = vsel %vm3358_vm12, %v3559_v61, %v3581_v3 }
 0x5ea   :  { %v3566_v8 = vadd.f32 %v3565_v54, %v3564_v44 }
 0x5ec   :  { %v3567_v31 = vrot.slane %v3566_v8, 1 }
 0x5ee   :  { %v3568_v42 = vadd.f32 %v3567_v31, %v3566_v8 }
 0x5f0   :  { %v3583_v4 = vsel %vm3360_vm6, %v3568_v42, %v3582_v10 }
 0x5f1   :  { %3585 = vst.msk [vmem:[#allocation10] sm:$0xff] %vm7100_vm13, %v3583_v4 }
 0x5f2   :  { %3596 = dma.vmem_to_hbm [thread:$0]  %s3592_s13, 128, %s3594_s16, [#allocation4]  }
 0x5f3   :  { %3867 = dma.done.wait [#allocation4], 128  }
 0x5f4   :  { %3868 = vsyncadd [#allocation4], 4294967168 }
 0x5f5   :  { %3601 = vsyncpa [#allocation3], 1 }
 0x5f6   :  { %3602 = vsyncpa [#allocation6], 1 }
 0x5f7   :  { %3603 = vsyncpa [#allocation9], 1 }
 0x5f8   :  { %3604 = vsyncpa [#allocation4], 1 }

</bundles_post_ra>
